<compile_context>
chip_gen: v5e
topology: v5e:2x2
jax: 0.10.0
libtpu: 0.0.40
codegen_flags: <defaults>
</compile_context>

<pallas_src>
import functools
import math

import jax
import jax.numpy as jnp
from jax.experimental import pallas as pl
from jax.experimental.pallas import tpu as pltpu


_COMPUTE_DTYPE = jnp.bfloat16
_VMEM_LIMIT = 48 * 1024 * 1024  # explicit scoped-VMEM budget, safe on v5e/v6e/v7x


# -----------------------------------------------------------------------------
# Pallas kernels
# -----------------------------------------------------------------------------
def _fused_conv_kernel(*refs, H, W, has_mean, apply_relu, apply_pool):
    """conv3x3(SAME) + bias (+ReLU) (+2x2 maxpool) for one batch element.

    refs (in order):
      x_ref   : (1, H, W, Cin)     activations (bf16)
      w_ref   : (9, Cin, Cout)     3x3 weights, tap-major (bf16, 1/std folded
                                   in for the first layer)
      b_ref   : (1, Cout)          bias (f32)
      mean_ref: (1, 1, Cin)        per-channel mean (f32)  [only if has_mean]
      o_ref   : (1, Ho, Wo, Cout)  output (bf16); Ho,Wo = H,W or H//2,W//2
      xpad_ref: (H+2, W+2, Cin)    VMEM scratch holding the zero-padded tile
    """
    if has_mean:
        x_ref, w_ref, b_ref, mean_ref, o_ref, xpad_ref = refs
    else:
        x_ref, w_ref, b_ref, o_ref, xpad_ref = refs
        mean_ref = None

    cin = x_ref.shape[-1]
    cout = w_ref.shape[-1]

    x = x_ref[0]                                           # (H, W, Cin)
    if mean_ref is not None:
        # Mean part of the input normalization.  The 1/std scale is folded
        # into the conv0 weights (exact: zero padding stays zero).
        x = (x.astype(jnp.float32) - mean_ref[...]).astype(x_ref.dtype)

    # Build the 1-pixel zero halo in VMEM (no HBM-side jnp.pad / padded copy).
    xpad_ref[...] = jnp.zeros((H + 2, W + 2, cin), x_ref.dtype)
    xpad_ref[pl.ds(1, H), pl.ds(1, W), :] = x

    # 3x3 conv == sum of 9 shifted [H*W, Cin] @ [Cin, Cout] MXU matmuls,
    # accumulated in f32.
    # TODO(synk): the Cin=3 first layer could use one [H*W,27]x[27,Cout]
    # im2col matmul to feed the MXU more densely.
    acc = jnp.zeros((H * W, cout), jnp.float32)
    for dy in range(3):
        for dx in range(3):
            patch = xpad_ref[pl.ds(dy, H), pl.ds(dx, W), :].reshape(H * W, cin)
            acc = acc + jnp.dot(patch, w_ref[dy * 3 + dx],
                                preferred_element_type=jnp.float32)
    acc = acc + b_ref[...]                                 # f32 bias broadcast

    if apply_relu:
        acc = jnp.maximum(acc, 0.0)                        # ReLU on the f32 acc

    if apply_pool:
        a = acc.reshape(H, W, cout)
        a = a[:(H // 2) * 2, :(W // 2) * 2, :]             # floor, as MaxPool2d
        a = jnp.maximum(a[0::2, :, :], a[1::2, :, :])
        a = jnp.maximum(a[:, 0::2, :], a[:, 1::2, :])
        o_ref[...] = a.reshape(1, H // 2, W // 2, cout).astype(o_ref.dtype)
    else:
        o_ref[...] = acc.reshape(1, H, W, cout).astype(o_ref.dtype)


def _relu_kernel(x_ref, o_ref):
    # Standalone ReLU (only used when the pre-ReLU conv output is requested).
    o_ref[...] = jnp.maximum(x_ref[...], 0).astype(o_ref.dtype)


def _maxpool2x2_kernel(x_ref, o_ref):
    # Standalone 2x2/2 max pool (only used when it could not be fused).
    x = x_ref[...].astype(jnp.float32)          # pool in f32 (v5e-friendly)
    h, w = x.shape[1], x.shape[2]
    x = x[:, :(h // 2) * 2, :(w // 2) * 2, :]
    x = jnp.maximum(x[:, 0::2, :, :], x[:, 1::2, :, :])
    x = jnp.maximum(x[:, :, 0::2, :], x[:, :, 1::2, :])
    o_ref[...] = x.astype(o_ref.dtype)


# -----------------------------------------------------------------------------
# pallas_call wrappers (one grid step per batch element; whole image in VMEM)
# -----------------------------------------------------------------------------
def fused_conv(x, wt, b, *, mean=None, apply_relu=False, apply_pool=False):
    n, h, wdt, cin = x.shape
    cout = wt.shape[-1]
    ho, wo = (h // 2, wdt // 2) if apply_pool else (h, wdt)
    has_mean = mean is not None
    kernel = functools.partial(_fused_conv_kernel, H=h, W=wdt,
                               has_mean=has_mean, apply_relu=apply_relu,
                               apply_pool=apply_pool)
    in_specs = [
        pl.BlockSpec((1, h, wdt, cin), lambda i: (i, 0, 0, 0)),
        pl.BlockSpec((9, cin, cout), lambda i: (0, 0, 0)),
        pl.BlockSpec((1, cout), lambda i: (0, 0)),
    ]
    args = [x, wt, b]
    if has_mean:
        in_specs.append(pl.BlockSpec((1, 1, cin), lambda i: (0, 0, 0)))
        args.append(mean)
    # TODO(synk): for large (224x224+) inputs, tile the grid over H with a
    # manual halo DMA (pl.ANY input + make_async_copy) so VMEM stays bounded;
    # whole-image blocks fit easily at the small shapes exercised here.
    return pl.pallas_call(
        kernel,
        out_shape=jax.ShapeDtypeStruct((n, ho, wo, cout), x.dtype),
        grid=(n,),
        in_specs=in_specs,
        out_specs=pl.BlockSpec((1, ho, wo, cout), lambda i: (i, 0, 0, 0)),
        scratch_shapes=[pltpu.VMEM((h + 2, wdt + 2, cin), x.dtype)],
        compiler_params=pltpu.CompilerParams(
            dimension_semantics=("parallel",),
            vmem_limit_bytes=_VMEM_LIMIT),
    )(*args)


def relu(x):
    n, h, w, c = x.shape
    return pl.pallas_call(
        _relu_kernel,
        out_shape=jax.ShapeDtypeStruct(x.shape, x.dtype),
        grid=(n,),
        in_specs=[pl.BlockSpec((1, h, w, c), lambda i: (i, 0, 0, 0))],
        out_specs=pl.BlockSpec((1, h, w, c), lambda i: (i, 0, 0, 0)),
        compiler_params=pltpu.CompilerParams(
            dimension_semantics=("parallel",),
            vmem_limit_bytes=_VMEM_LIMIT),
    )(x)


def maxpool2x2(x):
    n, h, w, c = x.shape
    ho, wo = h // 2, w // 2
    return pl.pallas_call(
        _maxpool2x2_kernel,
        out_shape=jax.ShapeDtypeStruct((n, ho, wo, c), x.dtype),
        grid=(n,),
        in_specs=[pl.BlockSpec((1, h, w, c), lambda i: (i, 0, 0, 0))],
        out_specs=pl.BlockSpec((1, ho, wo, c), lambda i: (i, 0, 0, 0)),
        compiler_params=pltpu.CompilerParams(
            dimension_semantics=("parallel",),
            vmem_limit_bytes=_VMEM_LIMIT),
    )(x)


# -----------------------------------------------------------------------------
# VGG19 `features` layout (torchvision): conv3x3+ReLU per entry, 'M' = maxpool
# -----------------------------------------------------------------------------
_VGG19_CFG = [64, 64, 'M', 128, 128, 'M', 256, 256, 256, 256, 'M',
              512, 512, 512, 512, 'M', 512, 512, 512, 512, 'M']


def _vgg19_feature_layers():
    layers = []
    cin = 3
    for v in _VGG19_CFG:
        if v == 'M':
            layers.append(('pool',))
        else:
            layers.append(('conv', cin, v))
            layers.append(('relu',))
            cin = v
    return layers


class PerceptualVGGPallas:
    """Pallas/JAX re-implementation of mmgen's PerceptualVGG forward."""

    def __init__(self, layer_name_list, vgg_type='vgg19', use_input_norm=True,
                 seed=0):
        assert vgg_type == 'vgg19'
        self.layer_name_list = [str(n) for n in layer_name_list]
        self.use_input_norm = use_input_norm

        num_layers = max(map(int, self.layer_name_list)) + 1
        full = _vgg19_feature_layers()
        assert len(full) >= num_layers
        self.layers = full[:num_layers]

        # ImageNet normalization buffers (same values as the PyTorch module).
        mean = jnp.array([0.485, 0.456, 0.406], jnp.float32)
        std = jnp.array([0.229, 0.224, 0.225], jnp.float32)
        self.ref_mean = mean.reshape(1, 1, 1, 3)
        self.ref_std = std.reshape(1, 1, 1, 3)
        self.mean_arr = mean.reshape(1, 1, 3)       # pallas input (f32)

        # TODO(synk): the PyTorch module loads torchvision pretrained weights
        # (load_checkpoint); deterministic synthetic weights of the same
        # shapes are built here instead.
        key = jax.random.PRNGKey(seed)
        self.ref_params = {}   # f32 HWIO weights, original semantics (checking)
        self.params = {}       # kernel form: (9, Cin, Cout) bf16 (+1/std fold)
        for idx, kind in enumerate(self.layers):
            if kind[0] != 'conv':
                continue
            _, cin, cout = kind
            key, kw, kb = jax.random.split(key, 3)
            w = jax.random.normal(kw, (3, 3, cin, cout), jnp.float32)
            w = w * (1.0 / (3.0 * math.sqrt(cin)))
            b = jax.random.normal(kb, (1, cout), jnp.float32) * 0.01
            self.ref_params[idx] = (w, b)
            wk = w
            if idx == 0 and self.use_input_norm:
                # exact fold of the per-input-channel 1/std into conv0 weights
                wk = wk / std.reshape(1, 1, 3, 1)
            self.params[idx] = (wk.reshape(9, cin, cout).astype(_COMPUTE_DTYPE),
                                b)

        # Fused execution plan. A conv fuses the following ReLU (and then the
        # following maxpool) unless an intermediate activation in between is
        # explicitly requested via layer_name_list -- that preserves the exact
        # per-layer outputs of the original module (the .clone() before the
        # in-place ReLU).
        names = set(self.layer_name_list)
        plan = []
        idx = 0
        layers = self.layers
        while idx < len(layers):
            op = layers[idx][0]
            if op == 'conv':
                relu_idx = None
                pool_idx = None
                j = idx + 1
                if str(idx) not in names and j < len(layers) and layers[j][0] == 'relu':
                    relu_idx = j
                    j += 1
                    if (str(relu_idx) not in names and j < len(layers)
                            and layers[j][0] == 'pool'):
                        pool_idx = j
                        j += 1
                plan.append(('conv', idx, relu_idx, pool_idx))
                idx = j
            elif op == 'relu':
                plan.append(('relu', idx, None, None))
                idx += 1
            else:
                plan.append(('pool', idx, None, None))
                idx += 1
        self.plan = plan

    def __call__(self, x_nchw):
        # NCHW (PyTorch convention) -> NHWC bf16 for the kernels.
        x = jnp.transpose(x_nchw, (0, 2, 3, 1)).astype(_COMPUTE_DTYPE)
        requested = set(self.layer_name_list)
        output = {}

        def emit(layer_idx, val):
            name = str(layer_idx)
            if name in requested:
                output[name] = jnp.transpose(val, (0, 3, 1, 2)).astype(jnp.float32)

        for op, idx, relu_idx, pool_idx in self.plan:
            if op == 'conv':
                wt, b = self.params[idx]
                mean = (self.mean_arr
                        if (idx == 0 and self.use_input_norm) else None)
                x = fused_conv(x, wt, b, mean=mean,
                               apply_relu=relu_idx is not None,
                               apply_pool=pool_idx is not None)
                last = pool_idx if pool_idx is not None else (
                    relu_idx if relu_idx is not None else idx)
                emit(last, x)
            elif op == 'relu':
                x = relu(x)
                emit(idx, x)
            else:
                x = maxpool2x2(x)
                emit(idx, x)
        return output


# -----------------------------------------------------------------------------
# Pure-JAX f32 reference (original, un-fused semantics) for a sanity check
# -----------------------------------------------------------------------------
def _ref_forward(x_nchw, model):
    x = jnp.transpose(x_nchw, (0, 2, 3, 1)).astype(jnp.float32)
    if model.use_input_norm:
        x = (x - model.ref_mean) / model.ref_std
    out = {}
    for idx, kind in enumerate(model.layers):
        if kind[0] == 'conv':
            w, b = model.ref_params[idx]
            x = jax.lax.conv_general_dilated(
                x, w, window_strides=(1, 1), padding='SAME',
                dimension_numbers=('NHWC', 'HWIO', 'NHWC'),
                precision=jax.lax.Precision.HIGHEST) + b.reshape(1, 1, 1, -1)
        elif kind[0] == 'relu':
            x = jnp.maximum(x, 0.0)
        else:
            x = jax.lax.reduce_window(x, -jnp.inf, jax.lax.max,
                                      (1, 2, 2, 1), (1, 2, 2, 1), 'VALID')
        if str(idx) in model.layer_name_list:
            out[str(idx)] = jnp.transpose(x, (0, 3, 1, 2))
    return out


if __name__ == "__main__":
    # Layers exercised: '2' (2nd conv output, pre-ReLU -> conv runs unfused),
    # '4' (standalone pool), '9' (fully fused conv+ReLU+pool block).
    layer_name_list = ['2', '4', '9']
    model = PerceptualVGGPallas(layer_name_list)

    key = jax.random.PRNGKey(0)
    x = jax.random.uniform(key, (2, 3, 16, 16), jnp.float32)  # range [0, 1]

    out = model(x)
    out = jax.tree_util.tree_map(jax.block_until_ready, out)

    # sanity check vs. the pure-JAX f32 reference (bf16 kernels -> loose tol)
    ref = _ref_forward(x, model)
    assert set(out.keys()) == set(layer_name_list)
    assert out['2'].shape == (2, 64, 16, 16)
    assert out['4'].shape == (2, 64, 8, 8)
    assert out['9'].shape == (2, 128, 4, 4)
    for name in layer_name_list:
        o = out[name].astype(jnp.float32)
        r = ref[name]
        err = float(jnp.max(jnp.abs(o - r)))
        scale = float(jnp.max(jnp.abs(r))) + 1e-6
        assert err <= 0.1 * scale + 0.02, (name, err, scale)

    print("KERNEL_OK")
</pallas_src>

<mosaic_0001>
module attributes {stable_mosaic.version = 11 : i64} {
  func.func @_fused_conv_kernel(%arg0: i32, %arg1: memref<1x16x16x3xbf16, #tpu.memory_space<vmem>>, %arg2: memref<9x3x64xbf16, #tpu.memory_space<vmem>>, %arg3: memref<1x64xf32, #tpu.memory_space<vmem>>, %arg4: memref<1x1x3xf32, #tpu.memory_space<vmem>>, %arg5: memref<1x16x16x64xbf16, #tpu.memory_space<vmem>>, %arg6: memref<18x18x3xbf16, #tpu.memory_space<vmem>>) attributes {dimension_semantics = [#tpu.dimension_semantics<parallel>], iteration_bounds = array<i64: 2>, scalar_prefetch = 0 : i64, scratch_operands = 1 : i64, tpu.core_type = #tpu.core_type<tc>, window_params = [{transform_indices = @transform_0, window_bounds = array<i64: 1, 16, 16, 3>}, {pipeline_mode = #tpu.pipeline_mode<synchronous>, transform_indices = @transform_1, window_bounds = array<i64: 9, 3, 64>}, {pipeline_mode = #tpu.pipeline_mode<synchronous>, transform_indices = @transform_2, window_bounds = array<i64: 1, 64>}, {pipeline_mode = #tpu.pipeline_mode<synchronous>, transform_indices = @transform_3, window_bounds = array<i64: 1, 1, 3>}, {transform_indices = @transform_4, window_bounds = array<i64: 1, 16, 16, 64>}]} {
    %c0 = arith.constant 0 : index
    %c0_0 = arith.constant 0 : index
    %c0_1 = arith.constant 0 : index
    %c0_2 = arith.constant 0 : index
    %0 = vector.load %arg1[%c0, %c0_0, %c0_1, %c0_2] : memref<1x16x16x3xbf16, #tpu.memory_space<vmem>>, vector<1x16x16x3xbf16>
    %1 = vector.shape_cast %0 : vector<1x16x16x3xbf16> to vector<16x16x3xbf16>
    %2 = arith.extf %1 : vector<16x16x3xbf16> to vector<16x16x3xf32>
    %c0_3 = arith.constant 0 : index
    %c0_4 = arith.constant 0 : index
    %c0_5 = arith.constant 0 : index
    %3 = vector.load %arg4[%c0_3, %c0_4, %c0_5] : memref<1x1x3xf32, #tpu.memory_space<vmem>>, vector<1x1x3xf32>
    %4 = vector.broadcast %3 : vector<1x1x3xf32> to vector<16x16x3xf32>
    %5 = arith.subf %2, %4 : vector<16x16x3xf32>
    %6 = arith.truncf %5 : vector<16x16x3xf32> to vector<16x16x3xbf16>
    %cst = arith.constant 0.000000e+00 : bf16
    %7 = vector.broadcast %cst : bf16 to vector<18x18x3xbf16>
    %c0_6 = arith.constant 0 : index
    %c0_7 = arith.constant 0 : index
    %c0_8 = arith.constant 0 : index
    %8 = vector.load %arg6[%c0_6, %c0_7, %c0_8] : memref<18x18x3xbf16, #tpu.memory_space<vmem>>, vector<18x18x3xbf16>
    tpu.vector_store %arg6[%c0_6, %c0_7, %c0_8], %7 {strides = array<i32>} : memref<18x18x3xbf16, #tpu.memory_space<vmem>>, vector<18x18x3xbf16>,
    %c1 = arith.constant 1 : index
    %c1_9 = arith.constant 1 : index
    %c0_10 = arith.constant 0 : index
    %9 = vector.load %arg6[%c1, %c1_9, %c0_10] : memref<18x18x3xbf16, #tpu.memory_space<vmem>>, vector<16x16x3xbf16>
    tpu.vector_store %arg6[%c1, %c1_9, %c0_10], %6 {strides = array<i32>} : memref<18x18x3xbf16, #tpu.memory_space<vmem>>, vector<16x16x3xbf16>,
    %cst_11 = arith.constant 0.000000e+00 : f32
    %10 = vector.broadcast %cst_11 : f32 to vector<256x64xf32>
    %c0_12 = arith.constant 0 : index
    %c0_13 = arith.constant 0 : index
    %c0_14 = arith.constant 0 : index
    %11 = vector.load %arg6[%c0_12, %c0_13, %c0_14] : memref<18x18x3xbf16, #tpu.memory_space<vmem>>, vector<16x16x3xbf16>
    %12 = vector.shape_cast %11 : vector<16x16x3xbf16> to vector<256x3xbf16>
    %c0_15 = arith.constant 0 : index
    %c0_16 = arith.constant 0 : index
    %c0_17 = arith.constant 0 : index
    %13 = vector.load %arg2[%c0_15, %c0_16, %c0_17] : memref<9x3x64xbf16, #tpu.memory_space<vmem>>, vector<1x3x64xbf16>
    %14 = vector.shape_cast %13 : vector<1x3x64xbf16> to vector<3x64xbf16>
    %cst_18 = arith.constant dense<0.000000e+00> : vector<256x64xf32>
    %15 = tpu.matmul %12, %14, %cst_18 {dimension_numbers = #tpu.dot_dimension_numbers<[1], [0], [0], [1], [0, 0, 1, 1], [], []>} : vector<256x3xbf16>, vector<3x64xbf16>, vector<256x64xf32> -> vector<256x64xf32>
    %16 = arith.addf %10, %15 : vector<256x64xf32>
    %c0_19 = arith.constant 0 : index
    %c1_20 = arith.constant 1 : index
    %c0_21 = arith.constant 0 : index
    %17 = vector.load %arg6[%c0_19, %c1_20, %c0_21] : memref<18x18x3xbf16, #tpu.memory_space<vmem>>, vector<16x16x3xbf16>
    %18 = vector.shape_cast %17 : vector<16x16x3xbf16> to vector<256x3xbf16>
    %c1_22 = arith.constant 1 : index
    %c0_23 = arith.constant 0 : index
    %c0_24 = arith.constant 0 : index
    %19 = vector.load %arg2[%c1_22, %c0_23, %c0_24] : memref<9x3x64xbf16, #tpu.memory_space<vmem>>, vector<1x3x64xbf16>
    %20 = vector.shape_cast %19 : vector<1x3x64xbf16> to vector<3x64xbf16>
    %cst_25 = arith.constant dense<0.000000e+00> : vector<256x64xf32>
    %21 = tpu.matmul %18, %20, %cst_25 {dimension_numbers = #tpu.dot_dimension_numbers<[1], [0], [0], [1], [0, 0, 1, 1], [], []>} : vector<256x3xbf16>, vector<3x64xbf16>, vector<256x64xf32> -> vector<256x64xf32>
    %22 = arith.addf %16, %21 : vector<256x64xf32>
    %c0_26 = arith.constant 0 : index
    %c2 = arith.constant 2 : index
    %c0_27 = arith.constant 0 : index
    %23 = vector.load %arg6[%c0_26, %c2, %c0_27] : memref<18x18x3xbf16, #tpu.memory_space<vmem>>, vector<16x16x3xbf16>
    %24 = vector.shape_cast %23 : vector<16x16x3xbf16> to vector<256x3xbf16>
    %c2_28 = arith.constant 2 : index
    %c0_29 = arith.constant 0 : index
    %c0_30 = arith.constant 0 : index
    %25 = vector.load %arg2[%c2_28, %c0_29, %c0_30] : memref<9x3x64xbf16, #tpu.memory_space<vmem>>, vector<1x3x64xbf16>
    %26 = vector.shape_cast %25 : vector<1x3x64xbf16> to vector<3x64xbf16>
    %cst_31 = arith.constant dense<0.000000e+00> : vector<256x64xf32>
    %27 = tpu.matmul %24, %26, %cst_31 {dimension_numbers = #tpu.dot_dimension_numbers<[1], [0], [0], [1], [0, 0, 1, 1], [], []>} : vector<256x3xbf16>, vector<3x64xbf16>, vector<256x64xf32> -> vector<256x64xf32>
    %28 = arith.addf %22, %27 : vector<256x64xf32>
    %c1_32 = arith.constant 1 : index
    %c0_33 = arith.constant 0 : index
    %c0_34 = arith.constant 0 : index
    %29 = vector.load %arg6[%c1_32, %c0_33, %c0_34] : memref<18x18x3xbf16, #tpu.memory_space<vmem>>, vector<16x16x3xbf16>
    %30 = vector.shape_cast %29 : vector<16x16x3xbf16> to vector<256x3xbf16>
    %c3 = arith.constant 3 : index
    %c0_35 = arith.constant 0 : index
    %c0_36 = arith.constant 0 : index
    %31 = vector.load %arg2[%c3, %c0_35, %c0_36] : memref<9x3x64xbf16, #tpu.memory_space<vmem>>, vector<1x3x64xbf16>
    %32 = vector.shape_cast %31 : vector<1x3x64xbf16> to vector<3x64xbf16>
    %cst_37 = arith.constant dense<0.000000e+00> : vector<256x64xf32>
    %33 = tpu.matmul %30, %32, %cst_37 {dimension_numbers = #tpu.dot_dimension_numbers<[1], [0], [0], [1], [0, 0, 1, 1], [], []>} : vector<256x3xbf16>, vector<3x64xbf16>, vector<256x64xf32> -> vector<256x64xf32>
    %34 = arith.addf %28, %33 : vector<256x64xf32>
    %c1_38 = arith.constant 1 : index
    %c1_39 = arith.constant 1 : index
    %c0_40 = arith.constant 0 : index
    %35 = vector.load %arg6[%c1_38, %c1_39, %c0_40] : memref<18x18x3xbf16, #tpu.memory_space<vmem>>, vector<16x16x3xbf16>
    %36 = vector.shape_cast %35 : vector<16x16x3xbf16> to vector<256x3xbf16>
    %c4 = arith.constant 4 : index
    %c0_41 = arith.constant 0 : index
    %c0_42 = arith.constant 0 : index
    %37 = vector.load %arg2[%c4, %c0_41, %c0_42] : memref<9x3x64xbf16, #tpu.memory_space<vmem>>, vector<1x3x64xbf16>
    %38 = vector.shape_cast %37 : vector<1x3x64xbf16> to vector<3x64xbf16>
    %cst_43 = arith.constant dense<0.000000e+00> : vector<256x64xf32>
    %39 = tpu.matmul %36, %38, %cst_43 {dimension_numbers = #tpu.dot_dimension_numbers<[1], [0], [0], [1], [0, 0, 1, 1], [], []>} : vector<256x3xbf16>, vector<3x64xbf16>, vector<256x64xf32> -> vector<256x64xf32>
    %40 = arith.addf %34, %39 : vector<256x64xf32>
    %c1_44 = arith.constant 1 : index
    %c2_45 = arith.constant 2 : index
    %c0_46 = arith.constant 0 : index
    %41 = vector.load %arg6[%c1_44, %c2_45, %c0_46] : memref<18x18x3xbf16, #tpu.memory_space<vmem>>, vector<16x16x3xbf16>
    %42 = vector.shape_cast %41 : vector<16x16x3xbf16> to vector<256x3xbf16>
    %c5 = arith.constant 5 : index
    %c0_47 = arith.constant 0 : index
    %c0_48 = arith.constant 0 : index
    %43 = vector.load %arg2[%c5, %c0_47, %c0_48] : memref<9x3x64xbf16, #tpu.memory_space<vmem>>, vector<1x3x64xbf16>
    %44 = vector.shape_cast %43 : vector<1x3x64xbf16> to vector<3x64xbf16>
    %cst_49 = arith.constant dense<0.000000e+00> : vector<256x64xf32>
    %45 = tpu.matmul %42, %44, %cst_49 {dimension_numbers = #tpu.dot_dimension_numbers<[1], [0], [0], [1], [0, 0, 1, 1], [], []>} : vector<256x3xbf16>, vector<3x64xbf16>, vector<256x64xf32> -> vector<256x64xf32>
    %46 = arith.addf %40, %45 : vector<256x64xf32>
    %c2_50 = arith.constant 2 : index
    %c0_51 = arith.constant 0 : index
    %c0_52 = arith.constant 0 : index
    %47 = vector.load %arg6[%c2_50, %c0_51, %c0_52] : memref<18x18x3xbf16, #tpu.memory_space<vmem>>, vector<16x16x3xbf16>
    %48 = vector.shape_cast %47 : vector<16x16x3xbf16> to vector<256x3xbf16>
    %c6 = arith.constant 6 : index
    %c0_53 = arith.constant 0 : index
    %c0_54 = arith.constant 0 : index
    %49 = vector.load %arg2[%c6, %c0_53, %c0_54] : memref<9x3x64xbf16, #tpu.memory_space<vmem>>, vector<1x3x64xbf16>
    %50 = vector.shape_cast %49 : vector<1x3x64xbf16> to vector<3x64xbf16>
    %cst_55 = arith.constant dense<0.000000e+00> : vector<256x64xf32>
    %51 = tpu.matmul %48, %50, %cst_55 {dimension_numbers = #tpu.dot_dimension_numbers<[1], [0], [0], [1], [0, 0, 1, 1], [], []>} : vector<256x3xbf16>, vector<3x64xbf16>, vector<256x64xf32> -> vector<256x64xf32>
    %52 = arith.addf %46, %51 : vector<256x64xf32>
    %c2_56 = arith.constant 2 : index
    %c1_57 = arith.constant 1 : index
    %c0_58 = arith.constant 0 : index
    %53 = vector.load %arg6[%c2_56, %c1_57, %c0_58] : memref<18x18x3xbf16, #tpu.memory_space<vmem>>, vector<16x16x3xbf16>
    %54 = vector.shape_cast %53 : vector<16x16x3xbf16> to vector<256x3xbf16>
    %c7 = arith.constant 7 : index
    %c0_59 = arith.constant 0 : index
    %c0_60 = arith.constant 0 : index
    %55 = vector.load %arg2[%c7, %c0_59, %c0_60] : memref<9x3x64xbf16, #tpu.memory_space<vmem>>, vector<1x3x64xbf16>
    %56 = vector.shape_cast %55 : vector<1x3x64xbf16> to vector<3x64xbf16>
    %cst_61 = arith.constant dense<0.000000e+00> : vector<256x64xf32>
    %57 = tpu.matmul %54, %56, %cst_61 {dimension_numbers = #tpu.dot_dimension_numbers<[1], [0], [0], [1], [0, 0, 1, 1], [], []>} : vector<256x3xbf16>, vector<3x64xbf16>, vector<256x64xf32> -> vector<256x64xf32>
    %58 = arith.addf %52, %57 : vector<256x64xf32>
    %c2_62 = arith.constant 2 : index
    %c2_63 = arith.constant 2 : index
    %c0_64 = arith.constant 0 : index
    %59 = vector.load %arg6[%c2_62, %c2_63, %c0_64] : memref<18x18x3xbf16, #tpu.memory_space<vmem>>, vector<16x16x3xbf16>
    %60 = vector.shape_cast %59 : vector<16x16x3xbf16> to vector<256x3xbf16>
    %c8 = arith.constant 8 : index
    %c0_65 = arith.constant 0 : index
    %c0_66 = arith.constant 0 : index
    %61 = vector.load %arg2[%c8, %c0_65, %c0_66] : memref<9x3x64xbf16, #tpu.memory_space<vmem>>, vector<1x3x64xbf16>
    %62 = vector.shape_cast %61 : vector<1x3x64xbf16> to vector<3x64xbf16>
    %cst_67 = arith.constant dense<0.000000e+00> : vector<256x64xf32>
    %63 = tpu.matmul %60, %62, %cst_67 {dimension_numbers = #tpu.dot_dimension_numbers<[1], [0], [0], [1], [0, 0, 1, 1], [], []>} : vector<256x3xbf16>, vector<3x64xbf16>, vector<256x64xf32> -> vector<256x64xf32>
    %64 = arith.addf %58, %63 : vector<256x64xf32>
    %c0_68 = arith.constant 0 : index
    %c0_69 = arith.constant 0 : index
    %65 = vector.load %arg3[%c0_68, %c0_69] : memref<1x64xf32, #tpu.memory_space<vmem>>, vector<1x64xf32>
    %66 = vector.broadcast %65 : vector<1x64xf32> to vector<256x64xf32>
    %67 = arith.addf %64, %66 : vector<256x64xf32>
    %cst_70 = arith.constant 0.000000e+00 : f32
    %68 = vector.broadcast %cst_70 : f32 to vector<256x64xf32>
    %69 = arith.maximumf %67, %68 : vector<256x64xf32>
    %70 = vector.shape_cast %69 : vector<256x64xf32> to vector<1x16x16x64xf32>
    %71 = arith.truncf %70 : vector<1x16x16x64xf32> to vector<1x16x16x64xbf16>
    %c0_71 = arith.constant 0 : index
    %c0_72 = arith.constant 0 : index
    %c0_73 = arith.constant 0 : index
    %c0_74 = arith.constant 0 : index
    %72 = vector.load %arg5[%c0_71, %c0_72, %c0_73, %c0_74] : memref<1x16x16x64xbf16, #tpu.memory_space<vmem>>, vector<1x16x16x64xbf16>
    tpu.vector_store %arg5[%c0_71, %c0_72, %c0_73, %c0_74], %71 {strides = array<i32>} : memref<1x16x16x64xbf16, #tpu.memory_space<vmem>>, vector<1x16x16x64xbf16>,
    return
  }
  func.func @transform_0(%arg0: i32) -> (i32, i32, i32, i32) {
    %c0_i32 = arith.constant 0 : i32
    %c0_i32_0 = arith.constant 0 : i32
    %c0_i32_1 = arith.constant 0 : i32
    %c0_i32_2 = arith.constant 0 : i32
    return %arg0, %c0_i32, %c0_i32_0, %c0_i32_1 : i32, i32, i32, i32
  }
  func.func @transform_1(%arg0: i32) -> (i32, i32, i32) {
    %c0_i32 = arith.constant 0 : i32
    %c0_i32_0 = arith.constant 0 : i32
    %c0_i32_1 = arith.constant 0 : i32
    %c0_i32_2 = arith.constant 0 : i32
    return %c0_i32, %c0_i32_0, %c0_i32_1 : i32, i32, i32
  }
  func.func @transform_2(%arg0: i32) -> (i32, i32) {
    %c0_i32 = arith.constant 0 : i32
    %c0_i32_0 = arith.constant 0 : i32
    %c0_i32_1 = arith.constant 0 : i32
    return %c0_i32, %c0_i32_0 : i32, i32
  }
  func.func @transform_3(%arg0: i32) -> (i32, i32, i32) {
    %c0_i32 = arith.constant 0 : i32
    %c0_i32_0 = arith.constant 0 : i32
    %c0_i32_1 = arith.constant 0 : i32
    %c0_i32_2 = arith.constant 0 : i32
    return %c0_i32, %c0_i32_0, %c0_i32_1 : i32, i32, i32
  }
  func.func @transform_4(%arg0: i32) -> (i32, i32, i32, i32) {
    %c0_i32 = arith.constant 0 : i32
    %c0_i32_0 = arith.constant 0 : i32
    %c0_i32_1 = arith.constant 0 : i32
    %c0_i32_2 = arith.constant 0 : i32
    return %arg0, %c0_i32, %c0_i32_0, %c0_i32_1 : i32, i32, i32, i32
  }
}

</mosaic_0001>

<bundles_post_ra>
// kernel: tpu_custom_call.1
= control target key start
LH: loop header
LB: loop body
LE: loop exit
PB: predicated region body
PF: predicated region fallthrough
CT: control target
= control target key end

     0   :  { %9 = vsyncpa [#allocation4], 0  ;;  %s7403_s0 = inlined_call_operand.vmem [shape: bf16[2,16,16,3], index: 0, kind: input, shape index: {}]   ;;  %s7404_s1 = inlined_call_operand.vmem [shape: bf16[9,3,64], index: 1, kind: input, shape index: {}]   ;;  %s7405_s2 = inlined_call_operand.vmem [shape: f32[1,64], index: 2, kind: input, shape index: {}]   ;;  %s7406_s3 = inlined_call_operand.vmem [shape: f32[1,1,3], index: 3, kind: input, shape index: {}]   ;;  %s7407_s4 = inlined_call_operand.hbm [shape: bf16[2,16,16,64], index: 4, kind: output, shape index: {}]  }
   0x1   :  { %11 = vsyncpa [#allocation4 + $0x1], 0  ;;  %s5683_s15 = smov 0   ;;  %s5685_s16 = smov 0  }
   0x2   :  { %s5687_s17 = smov 0   ;;  %s5689_s18 = smov 0  }
   0x3 LB: > { %s5704_s19 = sadd.s32 4294967295, %s5652_s18   ;;  %s4950_s20 = sadd.s32 4294967294, %s5652_s18   ;;  %s5652_s18 = sphi %s5689_s18, %s7435_s18   ;;  %s5648_s17 = sphi %s5687_s17, %s7434_s17   ;;  %s5644_s16 = sphi %s5685_s16, %s7433_s16   ;;  %s5640_s15 = sphi %s5683_s15, %s7432_s15  }
   0x4   : > { %s5708_s21 = sadd.s32 1, %s5652_s18   ;;  %s113_s22 = sadd.s32 1, %s5648_s17 }
   0x5   : > { %s110_s23 = ssub.s32 %s5652_s18, %s5708_s21  ;;  %p123_p0 = scmp.ne.s32.totalorder %s5648_s17, %s5644_s16 }
   0x6   : > { %p111_p1 = scmp.eq.s32.totalorder %s110_s23, 0  ;;  %p124_p2 = scmp.eq.s32.totalorder %s5704_s19, 1 }
   0x7   : > { %p129_p3 = scmp.ne.s32.totalorder %s5644_s16, %s5640_s15  ;;  %p130_p4 = scmp.eq.s32.totalorder %s4950_s20, 1 }
   0x8   : > { %s5719_s24 = scalar_select %p111_p1, %s5648_s17, %s113_s22  }
   0x9   : > { %p5721_p5 = por %p124_p2, %p123_p0  ;;  %p5725_p6 = por %p130_p4, %p129_p3 }
   0xa   : > { %p4953_p7 = scmp.ge.s32.totalorder %s5652_s18, 1  ;;  %p165_p8 = scmp.lt.s32.totalorder %s5652_s18, 3 }
   0xc   : > { %p166_p9 = pnand %p4953_p7, %p165_p8 }
   0xe   : > { %169 = sbr.rel (%p166_p9) target bundleno = 860 (0x35c), region = 36 }
  0x13   : > { %v4957_v0 = vld [vmem:[%s7404_s1 + $0x2] sm:$0x3]  ;;  %vm1361_vm0 = vcmask 1040384   ;;  %vm1362_vm1 = vcmask 1041408   ;;  %p191_p10 = scmp.lt.s32.totalorder %s5704_s19, 1  ;;  %v5654_v1 = vmov 65535  }
  0x14   : > { %v1363_v2 = vsel %vm1361_vm0, 4294967295, %v5654_v1  ;;  %vm329_vm2 = vcmask 19456   ;;  %vm332_vm3 = vcmask 16384   ;;  %v5655_v5 = vmov 0   ;;  %v5751_v6 = vld [vmem:[%s7406_s3] ss:$0 sm:$0xff] }
  0x15   : > { %v5735_v3 = vsel %vm1362_vm1, %v1363_v2, 0  ;;  %s192_s29 = scalar_select %p191_p10, %s5704_s19, 1  ;;  %343 = vst.msk [vmem:[#allocation2 + $0x30] sm:$0xf] %vm329_vm2, %v5655_v5  ;;  %vm385_vm4 = vsmask.f32 256 }
  0x16   : > { %v1366_v4 = vand.u32 %v4957_v0, %v5735_v3  ;;  %344 = vst.msk [vmem:[#allocation2 + $0x34] sm:$0xf] %vm329_vm2, %v5655_v5  ;;  %vm386_vm5 = vsmask.f32 4368  ;;  %vm710_vm6 = vsmask.f32 7938  ;;  %vm5776_vm7 = vmand %vm332_vm3, %vm385_vm4 }
  0x17   : > { %s5354_s30 = sshll.u32 %s192_s29, 7  ;;  %345 = vst.msk [vmem:[#allocation2 + $0x38] sm:$0x1] %vm332_vm3, %v5655_v5  ;;  %vm5783_vm8 = vmor %vm385_vm4, %vm386_vm5  ;;  %vm875_vm10 = vsmask.f32 3328  ;;  %vm1312_vm12 = vcmask 23552  }
  0x18   : > { %5483 = vmatpush.bf16.msra.mxu1 %v1366_v4  ;;  %5484 = vmatpush.bf16.msra.mxu2 %v1366_v4  ;;  %s5746_s7 = scalar_lea.vmem %s7403_s0, %s5354_s30  ;;  %330 = vst.msk [vmem:[#allocation2] sm:$0xf] %vm329_vm2, %v5655_v5  ;;  %vm5792_vm9 = vmand %vm329_vm2, %vm710_vm6  ;;  %vm876_vm11 = vsmask.f32 7440  ;;  %vm1725_vm14 = vcmask 1042432   ;;  %vm1726_vm15 = vcmask 1046532  }
  0x19   : > { %5485 = vmatpush.bf16.msra.mxu3 %v1366_v4  ;;  %1375 = vmatpush.bf16.msra.mxu0 %v1366_v4  ;;  %v5470_v7 = vld [vmem:[%s5746_s7 + $0x18] sm:$0xff]   ;;  %331 = vst.msk [vmem:[#allocation2 + $0x4] sm:$0xf] %vm329_vm2, %v5655_v5  ;;  %vm5852_vm13 = vmor %vm875_vm10, %vm876_vm11  ;;  %s188_s20 = sand.u32 1, %s5644_s16   ;;  %vm4839_vm1 = vcmask 519168   ;;  %s5403_s29 = sshll.u32 %s5704_s19, 7 }
  0x1a   : > { %v5418_v8 = vunpack.c.l.bf16 %v5470_v7  ;;  %v5419_v9 = vunpack.c.h.bf16 %v5470_v7  ;;  %v5474_v10 = vld [vmem:[%s5746_s7 + $0x38] sm:$0xff]   ;;  %333 = vst.msk [vmem:[#allocation2 + $0x8] sm:$0x1] %vm332_vm3, %v5655_v5  ;;  %vm6340_vm0 = vmor %vm1725_vm14, %vm1726_vm15  ;;  %s4954_s22 = sshll.u32 %s188_s20, 7  ;;  %s4884_s6 = scalar_lea.hbm %s7407_s4, %s5403_s29 }
  0x1b   : > { %334 = vst.msk [vmem:[#allocation2 + $0xc] sm:$0xf] %vm329_vm2, %v5655_v5  ;;  %v5434_v13 = vunpack.c.l.bf16 %v5474_v10  ;;  %v5435_v21 = vunpack.c.h.bf16 %v5474_v10  ;;  %v5478_v26 = vld [vmem:[%s5746_s7 + $0x58] sm:$0xff]   ;;  %s7056_s23 = scalar_lea.vmem [#allocation3], %s4954_s22  ;;  %s4887_s9 = sshll.u32 %s4884_s6, 4  ;;  %s4888_s9 = int_to_ptr.hbm [resolvable:$true] %s4887_s9 }
  0x1c   : > { %v271_v11 = vsub.f32 %v5418_v8, %v5751_v6  ;;  %v272_v12 = vsub.f32 %v5419_v9, %v5751_v6  ;;  %335 = vst.msk [vmem:[#allocation2 + $0x10] sm:$0xf] %vm329_vm2, %v5655_v5  ;;  %v735_v28 = vld [vmem:[#allocation2 + $0x30] sm:$0xf]  ;;  %v5450_v30 = vunpack.c.l.bf16 %v5478_v26  ;;  %v5451_v31 = vunpack.c.h.bf16 %v5478_v26  ;;  %s4885_s8 = sshll.u32 %s7056_s23, 4  ;;  %s4873_s19 = scalar_lea.sflag [#allocation4], %s188_s20  ;;  %s4886_s8 = int_to_ptr.vmem [resolvable:$true] %s4885_s8 }
  0x1d   : > { %336 = vst.msk [vmem:[#allocation2 + $0x14] sm:$0x1] %vm332_vm3, %v5655_v5  ;;  %v279_v22 = vsub.f32 %v5434_v13, %v5751_v6  ;;  %v280_v36 = vsub.f32 %v5435_v21, %v5751_v6  ;;  %s5604_s10 = sshra.s32 %s4888_s9, 4  ;;  %s5605_s10 = int_to_ptr.hbm [resolvable:$true] %s5604_s10 }
  0x1e   : > { %v303_v14 = vpack.c.bf16 %v271_v11, %v271_v11  ;;  %v304_v15 = vpack.c.bf16 %v272_v12, %v272_v12  ;;  %337 = vst.msk [vmem:[#allocation2 + $0x18] sm:$0xf] %vm329_vm2, %v5655_v5  ;;  %v739_v29 = vld [vmem:[#allocation2 + $0x38] sm:$0x1]  ;;  %v287_v38 = vsub.f32 %v5450_v30, %v5751_v6  ;;  %v288_v42 = vsub.f32 %v5451_v31, %v5751_v6  ;;  %s5606_s11 = scalar_lea.hbm %s5605_s10, 128  ;;  %p5611_p0 = scmp.lt.s32.totalorder %s5605_s10, %s7407_s4 }
  0x1f   : > { %338 = vst.msk [vmem:[#allocation2 + $0x1c] sm:$0xf] %vm329_vm2, %v5655_v5  ;;  %v5803_v37 = vpack.c.bf16 %v279_v22, %v279_v22  ;;  %v312_v44 = vpack.c.bf16 %v280_v36, %v280_v36  ;;  %p5607_p11 = scmp.ne.s32.totalorder %s5605_s10, %s5606_s11 }
  0x20   : > { %v440_v16 = vshrl.u32 %v303_v14, 16  ;;  %v443_v17 = vshll.u32 %v303_v14, 16  ;;  %v448_v18 = vshrl.u32 %v304_v15, 16  ;;  %v451_v19 = vshll.u32 %v304_v15, 16  ;;  %339 = vst.msk [vmem:[#allocation2 + $0x20] sm:$0x1] %vm332_vm3, %v5655_v5 }
  0x21   : > { %340 = vst.msk [vmem:[#allocation2 + $0x24] sm:$0xf] %vm329_vm2, %v5655_v5  ;;  %v5815_v43 = vpack.c.bf16 %v287_v38, %v287_v38  ;;  %v508_v45 = vshrl.u32 %v5803_v37, 16  ;;  %v320_v46 = vpack.c.bf16 %v288_v42, %v288_v42  ;;  %v516_v49 = vshrl.u32 %v312_v44, 16  ;;  %p5608_p12 = pnand %p5607_p11, %p5721_p5 }
  0x22   : > { %v442_v24 = vrot.slane %v440_v16, 7  ;;  %v450_v25 = vrot.slane %v448_v18, 7  ;;  %341 = vst.msk [vmem:[#allocation2 + $0x28] sm:$0xf] %vm329_vm2, %v5655_v5  ;;  %v519_v50 = vshll.u32 %v312_v44, 16  ;;  %v511_v2 = vshll.u32 %v5803_v37, 16 }
  0x23   : > { %342 = vst.msk [vmem:[#allocation2 + $0x2c] sm:$0x1] %vm332_vm3, %v5655_v5  ;;  %v576_v47 = vshrl.u32 %v5815_v43, 16  ;;  %v5828_v48 = vrot.slane %v508_v45, 7  ;;  %v584_v53 = vshrl.u32 %v320_v46, 16  ;;  %v5840_v63 = vrot.slane %v516_v49, 7  ;;  %p5609_p13 = pneg %p5608_p12 }
  0x24   : > { %v445_v32 = vor.u32 %v443_v17, %v442_v24  ;;  %v446_v33 = vrot.slane %v442_v24, 4  ;;  %v453_v34 = vor.u32 %v451_v19, %v450_v25  ;;  %v455_v35 = vrot.slane %v450_v25, 4  ;;  %346 = vst.msk [vmem:[#allocation2 + $0x3c] sm:$0xf] %vm329_vm2, %v5655_v5  ;;  %v5471_v17 = vld [vmem:[%s5746_s7 + $0x20] sm:$0xff]  }
  0x25   : > { %347 = vst.msk [vmem:[#allocation2 + $0x40] sm:$0xf] %vm329_vm2, %v5655_v5  ;;  %v5832_v52 = vrot.slane %v576_v47, 7  ;;  %v514_v7 = vrot.slane %v5828_v48, 4  ;;  %v5848_v8 = vrot.slane %v584_v53, 7  ;;  %v587_v9 = vshll.u32 %v320_v46, 16 }
  0x26   : > { %v454_v39 = vsel %vm5783_vm8, %v446_v33, %v453_v34  ;;  %v736_v40 = vsel %vm5792_vm9, %v445_v32, %v735_v28  ;;  %v740_v41 = vsel %vm5776_vm7, %v455_v35, %v739_v29  ;;  %348 = vst.msk [vmem:[#allocation2 + $0x44] sm:$0x1] %vm332_vm3, %v5655_v5  ;;  %v579_v13 = vshll.u32 %v5815_v43, 16  ;;  %v5475_v18 = vld [vmem:[%s5746_s7 + $0x40] sm:$0xff]  }
  0x27   : > { %737 = vst [vmem:[#allocation2 + $0x30] sm:$0xf] %v736_v40  ;;  %v582_v14 = vrot.slane %v5832_v52, 4  ;;  %v521_v16 = vor.u32 %v519_v50, %v5840_v63  ;;  %v5866_v19 = vld [vmem:[%s5746_s7 + $0x60] sm:$0xff]   ;;  %v5422_v22 = vunpack.c.l.bf16 %v5471_v17  ;;  %v5423_v24 = vunpack.c.h.bf16 %v5471_v17 }
  0x28   : > { %738 = vst.msk [vmem:[#allocation2 + $0x34] sm:$0xf] %vm329_vm2, %v454_v39  ;;  %v5438_v25 = vunpack.c.l.bf16 %v5475_v18  ;;  %v589_v28 = vor.u32 %v587_v9, %v5848_v8  ;;  %v5439_v29 = vunpack.c.h.bf16 %v5475_v18  ;;  %v5454_v30 = vunpack.c.l.bf16 %v5866_v19  ;;  %v5405_v47 = vld [vmem:[%s5746_s7] sm:$0xff]  }
  0x29   : > { %741 = vst [vmem:[#allocation2 + $0x38] sm:$0x1] %v740_v41  ;;  %v273_v33 = vsub.f32 %v5422_v22, %v5751_v6  ;;  %v274_v34 = vsub.f32 %v5423_v24, %v5751_v6  ;;  %v5885_v36 = vor.u32 %v511_v2, %v5828_v48  ;;  %v5893_v39 = vsel %vm5783_vm8, %v514_v7, %v521_v16  ;;  %v826_v48 = vld [vmem:[#allocation2] sm:$0xf]  ;;  %v827_v49 = vld [vmem:[#allocation2 + $0x4] sm:$0xf] }
  0x2a   : > { %349 = vst.msk [vmem:[#allocation2 + $0x48] sm:$0xf] %vm329_vm2, %v5655_v5  ;;  %v281_v37 = vsub.f32 %v5438_v25, %v5751_v6  ;;  %v282_v38 = vsub.f32 %v5439_v29, %v5751_v6  ;;  %v523_v40 = vrot.slane %v5840_v63, 4  ;;  %v5899_v44 = vor.u32 %v579_v13, %v5832_v52  ;;  %v859_v7 = vld [vmem:[#allocation2 + $0x8] sm:$0x1] }
  0x2b   : > { %350 = vst.msk [vmem:[#allocation2 + $0x4c] sm:$0xf] %vm329_vm2, %v5655_v5  ;;  %v305_v41 = vpack.c.bf16 %v273_v33, %v273_v33  ;;  %v306_v42 = vpack.c.bf16 %v274_v34, %v274_v34  ;;  %v5903_v45 = vsel %vm5783_vm8, %v582_v14, %v589_v28  ;;  %v591_v46 = vrot.slane %v5848_v8, 4 }
  0x2c   : > { %351 = vst.msk [vmem:[#allocation2 + $0x50] sm:$0x1] %vm332_vm3, %v5655_v5  ;;  %v5909_v50 = vpack.c.bf16 %v281_v37, %v281_v37  ;;  %v5455_v53 = vunpack.c.h.bf16 %v5866_v19  ;;  %v289_v52 = vsub.f32 %v5454_v30, %v5751_v6  ;;  %v5407_v13 = vunpack.c.h.bf16 %v5405_v47  ;;  %v5945_v30 = vld [vmem:[#allocation2 + $0x3c] sm:$0xf] }
  0x2d   : > { %352 = vst.msk [vmem:[#allocation2 + $0x54] sm:$0xf] %vm329_vm2, %v5655_v5  ;;  %v898_v16 = vshll.u32 %v859_v7, 16  ;;  %v5168_v7 = vld [vmem:[%s7404_s1 + $0x8] sm:$0x3] }
  0x2e   : > { %v834_v51 = vld [vmem:[#allocation2 + $0x30] sm:$0xf]  ;;  %353 = vst.msk [vmem:[#allocation2 + $0x58] sm:$0xf] %vm329_vm2, %v5655_v5  ;;  %v525_v17 = vshrl.u32 %v5909_v50, 16  ;;  %v290_v24 = vsub.f32 %v5455_v53, %v5751_v6  ;;  %v266_v34 = vsub.f32 %v5407_v13, %v5751_v6 }
  0x2f   : > { %v835_v54 = vld [vmem:[#allocation2 + $0x34] sm:$0xf]  ;;  %v975_v55 = vshrl.u32 %v834_v51, 16  ;;  %v978_v56 = vshll.u32 %v834_v51, 16  ;;  %354 = vst.msk [vmem:[#allocation2 + $0x5c] sm:$0x1] %vm332_vm3, %v5655_v5  ;;  %v5911_v51 = vpack.c.bf16 %v282_v38, %v282_v38 }
  0x30   : > { %v863_v57 = vld [vmem:[#allocation2 + $0x38] sm:$0x1]  ;;  %v984_v58 = vshll.u32 %v835_v54, 16  ;;  %v988_v59 = vshrl.u32 %v835_v54, 16  ;;  %355 = vst.msk [vmem:[#allocation2 + $0x60] sm:$0xf] %vm329_vm2, %v5655_v5 }
  0x31   : > { %v977_v60 = vrot.slane %v975_v55, 4  ;;  %v980_v61 = vrot.slane %v978_v56, 5  ;;  %v994_v62 = vshll.u32 %v863_v57, 16  ;;  %356 = vst.msk [vmem:[#allocation2 + $0x64] sm:$0xf] %vm329_vm2, %v5655_v5  ;;  %v879_v55 = vshrl.u32 %v826_v48, 16 }
  0x32   : > { %v986_v0 = vrot.slane %v984_v58, 5  ;;  %v990_v1 = vrot.slane %v988_v59, 4  ;;  %357 = vst.msk [vmem:[#allocation2 + $0x68] sm:$0x1] %vm332_vm3, %v5655_v5  ;;  %v882_v56 = vshll.u32 %v826_v48, 16  ;;  %v888_v57 = vshll.u32 %v827_v49, 16 }
  0x33   : > { %v981_v4 = vor.u32 %v980_v61, %v977_v60  ;;  %v996_v12 = vrot.slane %v994_v62, 5  ;;  %358 = vst.msk [vmem:[#allocation2 + $0x6c] sm:$0xf] %vm329_vm2, %v5655_v5  ;;  %v892_v58 = vshrl.u32 %v827_v49, 16  ;;  %v457_v59 = vshrl.u32 %v305_v41, 16 }
  0x34   : > { %v991_v11 = vor.u32 %v990_v1, %v986_v0  ;;  %359 = vst.msk [vmem:[#allocation2 + $0x70] sm:$0xf] %vm329_vm2, %v5655_v5  ;;  %v460_v60 = vshll.u32 %v305_v41, 16  ;;  %v465_v61 = vshrl.u32 %v306_v42, 16  ;;  %v468_v62 = vshll.u32 %v306_v42, 16 }
  0x35   : > { %v982_v15 = vrot.slane %v981_v4, 4  ;;  %360 = vst.msk [vmem:[#allocation2 + $0x74] sm:$0x1] %vm332_vm3, %v5655_v5  ;;  %v884_v1 = vrot.slane %v882_v56, 5  ;;  %v890_v2 = vrot.slane %v888_v57, 5  ;;  %v894_v4 = vrot.slane %v892_v58, 4 }
  0x36   : > { %v992_v21 = vrot.slane %v991_v11, 4  ;;  %361 = vst.msk [vmem:[#allocation2 + $0x78] sm:$0xf] %vm329_vm2, %v5655_v5  ;;  %v459_v9 = vrot.slane %v457_v59, 7  ;;  %v5926_v11 = vrot.slane %v465_v61, 7  ;;  %v900_v28 = vrot.slane %v898_v16, 5 }
  0x37   : > { %v987_v26 = vsel %vm5852_vm13, %v982_v15, %v986_v0  ;;  %362 = vst.msk [vmem:[#allocation2 + $0x7c] sm:$0xf] %vm329_vm2, %v5655_v5  ;;  %v5918_v54 = vld [vmem:[#allocation2 + $0x60] sm:$0xf]  ;;  %v881_v0 = vrot.slane %v879_v55, 4  ;;  %v895_v15 = vor.u32 %v894_v4, %v890_v2  ;;  %v5960_v41 = vrot.slane %v525_v17, 7 }
  0x38   : > { %v997_v31 = vsel %vm5852_vm13, %v992_v21, %v996_v12  ;;  %v1272_v32 = vunpack.c.l.b16 %v987_v26  ;;  %363 = vst.msk [vmem:[#allocation2 + $0x80] sm:$0x1] %vm332_vm3, %v5655_v5  ;;  %v5406_v12 = vunpack.c.l.bf16 %v5405_v47  ;;  %v764_v18 = vsel %vm5792_vm9, %v5885_v36, %v5918_v54  ;;  %v746_v53 = vld [vmem:[#allocation2 + $0x44] sm:$0x1] }
  0x39   : > { %v1273_v35 = vunpack.c.l.b16 %v997_v31  ;;  %364 = vst.msk [vmem:[#allocation2 + $0x84] sm:$0xf] %vm329_vm2, %v5655_v5  ;;  %v885_v14 = vor.u32 %v884_v1, %v881_v0  ;;  %v767_v19 = vld [vmem:[#allocation2 + $0x68] sm:$0x1]  ;;  %v5937_v21 = vor.u32 %v460_v60, %v459_v9  ;;  %v463_v22 = vrot.slane %v459_v9, 4 }
  0x3a   : > { %365 = vst.msk [vmem:[#allocation2 + $0x88] sm:$0xf] %vm329_vm2, %v5655_v5  ;;  %v896_v26 = vrot.slane %v895_v15, 4  ;;  %v470_v29 = vor.u32 %v468_v62, %v5926_v11  ;;  %v533_v31 = vshrl.u32 %v5911_v51, 16  ;;  %v265_v33 = vsub.f32 %v5406_v12, %v5751_v6  ;;  %v5070_v56 = vld [vmem:[%s7404_s1 + $0x4] sm:$0x3] }
  0x3b   : > { %v1300_v43 = vpack.c.b16 %v1273_v35, %v1272_v32  ;;  %366 = vst.msk [vmem:[#allocation2 + $0x8c] sm:$0x1] %vm332_vm3, %v5655_v5  ;;  %v886_v25 = vrot.slane %v885_v14, 4  ;;  %v5948_v32 = vpack.c.bf16 %v289_v52, %v289_v52  ;;  %v528_v42 = vshll.u32 %v5909_v50, 16  ;;  %v5087_v0 = vld [vmem:[%s7404_s1 + $0x6] sm:$0x3] }
  0x3c   : > { %367 = vst.msk [vmem:[#allocation2 + $0x90] sm:$0xf] %vm329_vm2, %v5655_v5  ;;  %v901_v38 = vsel %vm5852_vm13, %v896_v26, %v900_v28  ;;  %v472_v49 = vrot.slane %v5926_v11, 4  ;;  %v5976_v50 = vsel %vm5783_vm8, %v463_v22, %v470_v29  ;;  %v743_v63 = vsel %vm5792_vm9, %v5937_v21, %v5945_v30  ;;  %v6019_v11 = vld [vmem:[#allocation2 + $0x6c] sm:$0xf] }
  0x3d   : > { %4962 = vmatmul.msk.bf16.vlgmr.msra.gmra.mxu1 %vm1312_vm12, %v1300_v43  ;;  %368 = vst.msk [vmem:[#allocation2 + $0x94] sm:$0xf] %vm329_vm2, %v5655_v5  ;;  %v891_v37 = vsel %vm5852_vm13, %v886_v25, %v890_v2  ;;  %v5969_v43 = vsel %vm5776_vm7, %v523_v40, %v767_v19  ;;  %v1265_v48 = vunpack.c.l.b16 %v901_v38  ;;  %v5982_v40 = vrot.slane %v533_v31, 7  ;;  %v5476_v38 = vld [vmem:[%s5746_s7 + $0x48] sm:$0xff]  }
  0x3e   : > { %369 = vst.msk [vmem:[#allocation2 + $0x98] sm:$0x1] %vm332_vm3, %v5655_v5  ;;  %v1264_v47 = vunpack.c.l.b16 %v891_v37  ;;  %v322_v55 = vpack.c.bf16 %v290_v24, %v290_v24  ;;  %v536_v58 = vshll.u32 %v5911_v51, 16  ;;  %v593_v59 = vshrl.u32 %v5948_v32, 16  ;;  %v858_v51 = vld [vmem:[%s7404_s1] sm:$0x3] }
  0x3f   : > { %370 = vst.msk [vmem:[#allocation2 + $0x9c] sm:$0xf] %vm329_vm2, %v5655_v5  ;;  %v297_v60 = vpack.c.bf16 %v265_v33, %v265_v33  ;;  %v1939_v62 = vand.u32 %v5070_v56, %v5735_v3  ;;  %v6005_v1 = vor.u32 %v528_v42, %v5960_v41  ;;  %v298_v2 = vpack.c.bf16 %v266_v34, %v266_v34  ;;  %v5472_v24 = vld [vmem:[%s5746_s7 + $0x28] sm:$0xff]  }
  0x40   : > { %371 = vst.msk [vmem:[#allocation2 + $0xa0] sm:$0xf] %vm329_vm2, %v5655_v5  ;;  %v1296_v57 = vpack.c.b16 %v1265_v48, %v1264_v47  ;;  %v1586_v4 = vand.u32 %v5735_v3, %v858_v51  ;;  %v6017_v9 = vsel %vm5776_vm7, %v472_v49, %v746_v53  ;;  %v2879_v12 = vand.u32 %v5168_v7, %v5735_v3 }
  0x41   : > { %372 = vst.msk [vmem:[#allocation2 + $0xa4] sm:$0x1] %vm332_vm3, %v5655_v5  ;;  %1948 = vmatpush.bf16.msrb.mxu2 %v1939_v62  ;;  %v595_v13 = vrot.slane %v593_v59, 7  ;;  %v596_v14 = vshll.u32 %v5948_v32, 16  ;;  %v601_v15 = vshrl.u32 %v322_v55, 16  ;;  %v531_v17 = vrot.slane %v5960_v41, 4 }
  0x42   : > { %373 = vst.msk [vmem:[#allocation2 + $0xa8] sm:$0xf] %vm329_vm2, %v5655_v5  ;;  %4958 = vmatmul.msk.bf16.vlgmr.msra.gmra.mxu0 %vm1312_vm12, %v1296_v57  ;;  %1595 = vmatpush.bf16.msrb.mxu1 %v1586_v4  ;;  %v604_v19 = vshll.u32 %v322_v55, 16  ;;  %v389_v22 = vshrl.u32 %v297_v60, 16  ;;  %v538_v25 = vor.u32 %v536_v58, %v5982_v40  ;;  %v392_v28 = vshll.u32 %v297_v60, 16 }
  0x43   : > { %374 = vst.msk [vmem:[#allocation2 + $0xac] sm:$0xf] %vm329_vm2, %v5655_v5  ;;  %v5954_v35 = vld [vmem:[#allocation2 + $0x90] sm:$0xf]  ;;  %2888 = vmatpush.bf16.msrb.mxu0 %v2879_v12  ;;  %v603_v26 = vrot.slane %v601_v15, 7  ;;  %v397_v8 = vshrl.u32 %v298_v2, 16  ;;  %v5426_v32 = vunpack.c.l.bf16 %v5472_v24  ;;  %v5427_v33 = vunpack.c.h.bf16 %v5472_v24 }
  0x44   : > { %375 = vst.msk [vmem:[#allocation2 + $0xb0] sm:$0x1] %vm332_vm3, %v5655_v5  ;;  %v792_v61 = vsel %vm5792_vm9, %v5899_v44, %v5954_v35  ;;  %v2225_v44 = vand.u32 %v5087_v0, %v5735_v3  ;;  %v391_v29 = vrot.slane %v389_v22, 7  ;;  %v400_v31 = vshll.u32 %v298_v2, 16  ;;  %v6081_v60 = vld [vmem:[#allocation2 + $0xc] sm:$0xf] }
  0x45   : > { %376 = vst.msk [vmem:[#allocation2 + $0xb4] sm:$0xf] %vm329_vm2, %v5655_v5  ;;  %v795_v52 = vld [vmem:[#allocation2 + $0x98] sm:$0x1]  ;;  %v540_v34 = vrot.slane %v5982_v40, 4  ;;  %v771_v35 = vsel %vm5792_vm9, %v6005_v1, %v6019_v11  ;;  %v399_v37 = vrot.slane %v397_v8, 7  ;;  %v606_v42 = vor.u32 %v604_v19, %v603_v26 }
  0x46   : > { %377 = vst.msk [vmem:[#allocation2 + $0xb8] sm:$0xf] %vm329_vm2, %v5655_v5  ;;  %v796_v16 = vsel %vm5776_vm7, %v591_v46, %v795_v52  ;;  %2234 = vmatpush.bf16.msrb.mxu3 %v2225_v44  ;;  %v774_v46 = vld [vmem:[#allocation2 + $0x74] sm:$0x1]  ;;  %v599_v41 = vrot.slane %v595_v13, 4  ;;  %v275_v36 = vsub.f32 %v5426_v32, %v5751_v6  ;;  %v276_v54 = vsub.f32 %v5427_v33, %v5751_v6  ;;  %v6065_v52 = vld [vmem:[%s5746_s7 + $0x68] sm:$0xff]  }
  0x47   : > { %378 = vst.msk [vmem:[#allocation2 + $0xbc] sm:$0x1] %vm332_vm3, %v5655_v5  ;;  %v6053_v47 = vld [vmem:[#allocation2 + $0x9c] sm:$0xf]  ;;  %v608_v48 = vrot.slane %v603_v26, 4  ;;  %v6062_v49 = vor.u32 %v392_v28, %v391_v29  ;;  %v395_v53 = vrot.slane %v391_v29, 4  ;;  %v402_v40 = vor.u32 %v400_v31, %v399_v37 }
  0x48   : > { %379 = vst.msk [vmem:[#allocation2 + $0xc0] sm:$0xf] %vm329_vm2, %v5655_v5  ;;  %v6067_v55 = vpack.c.bf16 %v275_v36, %v275_v36  ;;  %v6069_v56 = vpack.c.bf16 %v276_v54, %v276_v54  ;;  %v5442_v57 = vunpack.c.l.bf16 %v5476_v38  ;;  %v404_v59 = vrot.slane %v399_v37, 4  ;;  %v718_v0 = vld [vmem:[#allocation2 + $0x14] sm:$0x1] }
  0x49   : > { %380 = vst.msk [vmem:[#allocation2 + $0xc4] sm:$0xf] %vm329_vm2, %v5655_v5  ;;  %v6085_v62 = vsel %vm5783_vm8, %v599_v41, %v606_v42  ;;  %v5458_v1 = vunpack.c.l.bf16 %v6065_v52  ;;  %v6106_v12 = vsel %vm5783_vm8, %v395_v53, %v402_v40  ;;  %v713_v21 = vsel %vm5792_vm9, %v6062_v49, %v6081_v60 }
  0x4a   : > { %381 = vst.msk [vmem:[#allocation2 + $0xc8] sm:$0x1] %vm332_vm3, %v5655_v5  ;;  %v482_v51 = vshrl.u32 %v6069_v56, 16  ;;  %v477_v44 = vshll.u32 %v6067_v55, 16  ;;  %v485_v4 = vshll.u32 %v6069_v56, 16  ;;  %v283_v7 = vsub.f32 %v5442_v57, %v5751_v6 }
  0x4b   : > { %382 = vst.msk [vmem:[#allocation2 + $0xcc] sm:$0xf] %vm329_vm2, %v5655_v5  ;;  %v5459_v24 = vunpack.c.h.bf16 %v6065_v52 }
  0x4c   : > { %383 = vst.msk [vmem:[#allocation2 + $0xd0] sm:$0xf] %vm329_vm2, %v5655_v5 }
  0x4d   : > { %384 = vst.msk [vmem:[#allocation2 + $0xd4] sm:$0x1] %vm332_vm3, %v5655_v5  ;;  %v6048_v5 = vor.u32 %v596_v14, %v595_v13 }
  0x4e   : > { %765 = vst [vmem:[#allocation2 + $0x60] sm:$0xf] %v764_v18  ;;  %v6060_v18 = vsel %vm5783_vm8, %v531_v17, %v538_v25  ;;  %v6124_v25 = vsub.f32 %v5458_v1, %v5751_v6 }
  0x4f   : > { %766 = vst.msk [vmem:[#allocation2 + $0x64] sm:$0xf] %vm329_vm2, %v5893_v39  ;;  %v802_v39 = vld [vmem:[#allocation2 + $0xa4] sm:$0x1]  ;;  %v799_v58 = vsel %vm5792_vm9, %v6048_v5, %v6053_v47 }
  0x50   : > { %769 = vst [vmem:[#allocation2 + $0x68] sm:$0x1] %v5969_v43  ;;  %v6075_v43 = vsel %vm5776_vm7, %v540_v34, %v774_v46  ;;  %v6097_v2 = vsel %vm5776_vm7, %v608_v48, %v802_v39 }
  0x51   : > { %793 = vst [vmem:[#allocation2 + $0x90] sm:$0xf] %v792_v61  ;;  %v5443_v61 = vunpack.c.h.bf16 %v5476_v38 }
  0x52   : > { %794 = vst.msk [vmem:[#allocation2 + $0x94] sm:$0xf] %vm329_vm2, %v5903_v45  ;;  %v474_v45 = vshrl.u32 %v6067_v55, 16 }
  0x53   : > { %797 = vst [vmem:[#allocation2 + $0x98] sm:$0x1] %v796_v16  ;;  %v284_v16 = vsub.f32 %v5443_v61, %v5751_v6 }
  0x54   : > { %744 = vst [vmem:[#allocation2 + $0x3c] sm:$0xf] %v743_v63  ;;  %v6112_v30 = vrot.slane %v474_v45, 7  ;;  %v6114_v63 = vrot.slane %v482_v51, 7 }
  0x55   : > { %v842_v11 = vld [vmem:[#allocation2 + $0x60] sm:$0xf]  ;;  %745 = vst.msk [vmem:[#allocation2 + $0x40] sm:$0xf] %vm329_vm2, %v5976_v50  ;;  %v6119_v50 = vsel %vm5776_vm7, %v404_v59, %v718_v0  ;;  %v6128_v0 = vpack.c.bf16 %v284_v16, %v284_v16 }
  0x56   : > { %v843_v13 = vld [vmem:[#allocation2 + $0x64] sm:$0xf]  ;;  %v1071_v14 = vshrl.u32 %v842_v11, 16  ;;  %v1074_v15 = vshll.u32 %v842_v11, 16  ;;  %748 = vst [vmem:[#allocation2 + $0x44] sm:$0x1] %v6017_v9  ;;  %v6126_v9 = vpack.c.bf16 %v283_v7, %v283_v7  ;;  %v479_v47 = vor.u32 %v477_v44, %v6112_v30 }
  0x57   : > { %v867_v17 = vld [vmem:[#allocation2 + $0x68] sm:$0x1]  ;;  %v1080_v19 = vshll.u32 %v843_v13, 16  ;;  %v1084_v22 = vshrl.u32 %v843_v13, 16  ;;  %772 = vst [vmem:[#allocation2 + $0x6c] sm:$0xf] %v771_v35 }
  0x58   : > { %v1073_v26 = vrot.slane %v1071_v14, 4  ;;  %v1076_v28 = vrot.slane %v1074_v15, 5  ;;  %v1090_v8 = vshll.u32 %v867_v17, 16  ;;  %v850_v46 = vld [vmem:[#allocation2 + $0x90] sm:$0xf]  ;;  %v480_v55 = vrot.slane %v6112_v30, 4 }
  0x59   : > { %v1082_v29 = vrot.slane %v1080_v19, 5  ;;  %v1086_v31 = vrot.slane %v1084_v22, 4  ;;  %v851_v32 = vld [vmem:[#allocation2 + $0x94] sm:$0xf]  ;;  %v1167_v33 = vshrl.u32 %v850_v46, 16  ;;  %v1170_v34 = vshll.u32 %v850_v46, 16 }
  0x5a   : > { %v1077_v37 = vor.u32 %v1076_v28, %v1073_v26  ;;  %v1092_v38 = vrot.slane %v1090_v8, 5  ;;  %v871_v41 = vld [vmem:[#allocation2 + $0x98] sm:$0x1]  ;;  %v1176_v35 = vshll.u32 %v851_v32, 16  ;;  %v1180_v42 = vshrl.u32 %v851_v32, 16 }
  0x5b   : > { %v1087_v36 = vor.u32 %v1086_v31, %v1082_v29  ;;  %v1169_v54 = vrot.slane %v1167_v33, 4  ;;  %v1172_v48 = vrot.slane %v1170_v34, 5  ;;  %v1186_v53 = vshll.u32 %v871_v41, 16  ;;  %v836_v39 = vld [vmem:[#allocation2 + $0x3c] sm:$0xf] }
  0x5c   : > { %v1078_v40 = vrot.slane %v1077_v37, 4  ;;  %v1178_v57 = vrot.slane %v1176_v35, 5  ;;  %v1182_v59 = vrot.slane %v1180_v42, 4  ;;  %v837_v61 = vld [vmem:[#allocation2 + $0x40] sm:$0xf]  ;;  %v999_v11 = vshrl.u32 %v836_v39, 16 }
  0x5d   : > { %v1088_v45 = vrot.slane %v1087_v36, 4  ;;  %v1173_v51 = vor.u32 %v1172_v48, %v1169_v54  ;;  %v1188_v1 = vrot.slane %v1186_v53, 5  ;;  %v864_v7 = vld [vmem:[#allocation2 + $0x44] sm:$0x1]  ;;  %v1002_v15 = vshll.u32 %v836_v39, 16 }
  0x5e   : > { %v1083_v13 = vsel %vm5852_vm13, %v1078_v40, %v1082_v29  ;;  %v1183_v14 = vor.u32 %v1182_v59, %v1178_v57  ;;  %v1008_v17 = vshll.u32 %v837_v61, 16  ;;  %773 = vst.msk [vmem:[#allocation2 + $0x70] sm:$0xf] %vm329_vm2, %v6060_v18  ;;  %v844_v19 = vld [vmem:[#allocation2 + $0x6c] sm:$0xf]  ;;  %v1001_v28 = vrot.slane %v999_v11, 4 }
  0x5f   : > { %v1093_v22 = vsel %vm5852_vm13, %v1088_v45, %v1092_v38  ;;  %v1280_v16 = vunpack.c.l.b16 %v1083_v13  ;;  %v1174_v26 = vrot.slane %v1173_v51, 4  ;;  %776 = vst [vmem:[#allocation2 + $0x74] sm:$0x1] %v6075_v43  ;;  %v1004_v31 = vrot.slane %v1002_v15, 5 }
  0x60   : > { %v1281_v8 = vunpack.c.l.b16 %v1093_v22  ;;  %v1184_v46 = vrot.slane %v1183_v14, 4  ;;  %v1010_v32 = vrot.slane %v1008_v17, 5  ;;  %800 = vst [vmem:[#allocation2 + $0x9c] sm:$0xf] %v799_v58  ;;  %v1012_v29 = vshrl.u32 %v837_v61, 16 }
  0x61   : > { %v1179_v18 = vsel %vm5852_vm13, %v1174_v26, %v1178_v57  ;;  %v1018_v33 = vshll.u32 %v864_v7, 16  ;;  %v1095_v34 = vshrl.u32 %v844_v19, 16  ;;  %801 = vst.msk [vmem:[#allocation2 + $0xa0] sm:$0xf] %vm329_vm2, %v6085_v62  ;;  %v1005_v41 = vor.u32 %v1004_v31, %v1001_v28  ;;  %v749_v62 = vld [vmem:[#allocation2 + $0x48] sm:$0xf] }
  0x62   : > { %v1304_v43 = vpack.c.b16 %v1281_v8, %v1280_v16  ;;  %v1189_v37 = vsel %vm5852_vm13, %v1184_v46, %v1188_v1  ;;  %v1288_v38 = vunpack.c.l.b16 %v1179_v18  ;;  %804 = vst [vmem:[#allocation2 + $0xa4] sm:$0x1] %v6097_v2  ;;  %v1014_v5 = vrot.slane %v1012_v29, 4 }
  0x63   : > { %v1289_v35 = vunpack.c.l.b16 %v1189_v37  ;;  %714 = vst [vmem:[#allocation2 + $0xc] sm:$0xf] %v713_v21  ;;  %v6160_v58 = vor.u32 %v485_v4, %v6114_v63  ;;  %v1006_v2 = vrot.slane %v1005_v41, 4  ;;  %v1020_v42 = vrot.slane %v1018_v33, 5 }
  0x64   : > { %4966 = vmatmul.msk.bf16.vlgmr.msra.gmra.mxu2 %vm1312_vm12, %v1304_v43  ;;  %v1097_v36 = vrot.slane %v1095_v34, 4  ;;  %v1098_v54 = vshll.u32 %v844_v19, 16  ;;  %715 = vst.msk [vmem:[#allocation2 + $0x10] sm:$0xf] %vm329_vm2, %v6106_v12  ;;  %v1015_v60 = vor.u32 %v1014_v5, %v1010_v32  ;;  %v489_v56 = vrot.slane %v6114_v63, 4 }
  0x65   : > { %v1308_v49 = vpack.c.b16 %v1289_v35, %v1288_v38  ;;  %v845_v21 = vld [vmem:[#allocation2 + $0x70] sm:$0xf]  ;;  %720 = vst [vmem:[#allocation2 + $0x14] sm:$0x1] %v6119_v50  ;;  %v1011_v44 = vsel %vm5852_vm13, %v1006_v2, %v1010_v32  ;;  %v750_v50 = vsel %vm5792_vm9, %v479_v47, %v749_v62  ;;  %v542_v43 = vshrl.u32 %v6126_v9, 16 }
  0x66   : > { %v868_v4 = vld [vmem:[#allocation2 + $0x74] sm:$0x1]  ;;  %v1100_v48 = vrot.slane %v1098_v54, 5  ;;  %v1104_v53 = vshll.u32 %v845_v21, 16  ;;  %v1108_v39 = vshrl.u32 %v845_v21, 16  ;;  %v1016_v40 = vrot.slane %v1015_v60, 4 }
  0x67   : > { %4970 = vmatmul.msk.bf16.vlgmr.msra.gmra.mxu3 %vm1312_vm12, %v1308_v49  ;;  %v1274_v12 = vunpack.c.l.b16 %v1011_v44  ;;  %v1114_v57 = vshll.u32 %v868_v4, 16  ;;  %v852_v59 = vld [vmem:[#allocation2 + $0x9c] sm:$0xf]  ;;  %751 = vst [vmem:[#allocation2 + $0x48] sm:$0xf] %v750_v50 }
  0x68   : > { %v1101_v61 = vor.u32 %v1100_v48, %v1097_v36  ;;  %v1106_v45 = vrot.slane %v1104_v53, 5  ;;  %v1110_v51 = vrot.slane %v1108_v39, 4  ;;  %v853_v1 = vld [vmem:[#allocation2 + $0xa0] sm:$0xf]  ;;  %v1191_v7 = vshrl.u32 %v852_v59, 16 }
  0x69   : > { %v1021_v11 = vsel %vm5852_vm13, %v1016_v40, %v1020_v42  ;;  %v1116_v13 = vrot.slane %v1114_v57, 5  ;;  %v872_v14 = vld [vmem:[#allocation2 + $0xa4] sm:$0x1]  ;;  %v1194_v15 = vshll.u32 %v852_v59, 16  ;;  %v1200_v17 = vshll.u32 %v853_v1, 16 }
  0x6a   : > { %v1275_v19 = vunpack.c.l.b16 %v1021_v11  ;;  %v1102_v22 = vrot.slane %v1101_v61, 4  ;;  %v1111_v16 = vor.u32 %v1110_v51, %v1106_v45  ;;  %v1193_v26 = vrot.slane %v1191_v7, 4  ;;  %v828_v28 = vld [vmem:[#allocation2 + $0xc] sm:$0xf]  ;;  %v753_v53 = vld [vmem:[#allocation2 + $0x50] sm:$0x1] }
  0x6b   : > { %v1196_v8 = vrot.slane %v1194_v15, 5  ;;  %v1202_v46 = vrot.slane %v1200_v17, 5  ;;  %v1204_v31 = vshrl.u32 %v853_v1, 16  ;;  %v1210_v32 = vshll.u32 %v872_v14, 16  ;;  %v6175_v18 = vld [vmem:[#allocation2 + $0x10] sm:$0xf] }
  0x6c   : > { %v1301_v29 = vpack.c.b16 %v1275_v19, %v1274_v12  ;;  %v1107_v33 = vsel %vm5852_vm13, %v1102_v22, %v1106_v45  ;;  %v1112_v34 = vrot.slane %v1111_v16, 4  ;;  %v6180_v5 = vld [vmem:[#allocation2 + $0x14] sm:$0x1]  ;;  %v903_v62 = vshrl.u32 %v828_v28, 16 }
  0x6d   : > { %v1282_v37 = vunpack.c.l.b16 %v1107_v33  ;;  %v1197_v38 = vor.u32 %v1196_v8, %v1193_v26  ;;  %v1206_v41 = vrot.slane %v1204_v31, 4  ;;  %v1212_v35 = vrot.slane %v1210_v32, 5  ;;  %v5468_v8 = vld [vmem:[%s5746_s7 + $0x8] sm:$0xff]  }
  0x6e   : > { %4963 = vmatmul.msk.bf16.gmra.mxu1 %vm1312_vm12, %v1301_v29  ;;  %v1117_v47 = vsel %vm5852_vm13, %v1112_v34, %v1116_v13  ;;  %v906_v2 = vshll.u32 %v828_v28, 16  ;;  %v912_v42 = vshll.u32 %v6175_v18, 16  ;;  %v916_v60 = vshrl.u32 %v6175_v18, 16  ;;  %v838_v59 = vld [vmem:[#allocation2 + $0x48] sm:$0xf] }
  0x6f   : > { %v1283_v36 = vunpack.c.l.b16 %v1117_v47  ;;  %v1198_v54 = vrot.slane %v1197_v38, 4  ;;  %v1207_v49 = vor.u32 %v1206_v41, %v1202_v46  ;;  %v905_v21 = vrot.slane %v903_v62, 4  ;;  %v777_v28 = vld [vmem:[#allocation2 + $0x78] sm:$0xf] }
  0x70   : > { %v908_v44 = vrot.slane %v906_v2, 5  ;;  %v914_v4 = vrot.slane %v912_v42, 5  ;;  %v922_v48 = vshll.u32 %v6180_v5, 16  ;;  %v918_v57 = vrot.slane %v916_v60, 4 }
  0x71   : > { %v1305_v39 = vpack.c.b16 %v1283_v36, %v1282_v37  ;;  %v1203_v40 = vsel %vm5852_vm13, %v1198_v54, %v1202_v46  ;;  %v1208_v12 = vrot.slane %v1207_v49, 4  ;;  %v488_v51 = vsel %vm5783_vm8, %v480_v55, %v6160_v58 }
  0x72   : > { %v1290_v50 = vunpack.c.l.b16 %v1203_v40  ;;  %v909_v61 = vor.u32 %v908_v44, %v905_v21  ;;  %v924_v45 = vrot.slane %v922_v48, 5  ;;  %v919_v7 = vor.u32 %v918_v57, %v914_v4  ;;  %752 = vst.msk [vmem:[#allocation2 + $0x4c] sm:$0xf] %vm329_vm2, %v488_v51  ;;  %v805_v57 = vld [vmem:[#allocation2 + $0xa8] sm:$0xf] }
  0x73   : > { %v1213_v1 = vsel %vm5852_vm13, %v1208_v12, %v1212_v35  ;;  %v754_v11 = vsel %vm5776_vm7, %v489_v56, %v753_v53  ;;  %v1023_v13 = vshrl.u32 %v838_v59, 16  ;;  %v1026_v15 = vshll.u32 %v838_v59, 16 }
  0x74   : > { %4967 = vmatmul.msk.bf16.gmra.mxu2 %vm1312_vm12, %v1305_v39  ;;  %v1291_v14 = vunpack.c.l.b16 %v1213_v1  ;;  %v910_v30 = vrot.slane %v909_v61, 4  ;;  %755 = vst [vmem:[#allocation2 + $0x50] sm:$0x1] %v754_v11  ;;  %v544_v58 = vrot.slane %v542_v43, 7  ;;  %v920_v55 = vrot.slane %v919_v7, 4 }
  0x75   : > { %v1025_v17 = vrot.slane %v1023_v13, 4  ;;  %v545_v19 = vshll.u32 %v6126_v9, 16  ;;  %v550_v22 = vshrl.u32 %v6128_v0, 16  ;;  %v1028_v56 = vrot.slane %v1026_v15, 5  ;;  %v781_v43 = vld [vmem:[#allocation2 + $0x80] sm:$0x1] }
  0x76   : > { %v1309_v16 = vpack.c.b16 %v1291_v14, %v1290_v50  ;;  %v915_v63 = vsel %vm5852_vm13, %v910_v30, %v914_v4  ;;  %v548_v26 = vrot.slane %v544_v58, 4  ;;  %v925_v46 = vsel %vm5852_vm13, %v920_v55, %v924_v45  ;;  %v6228_v50 = vld [vmem:[%s7406_s3] ss:$0 sm:$0xff]  ;;  %v809_v11 = vld [vmem:[#allocation2 + $0xb0] sm:$0x1] }
  0x77   : > { %v1266_v31 = vunpack.c.l.b16 %v915_v63  ;;  %v547_v32 = vor.u32 %v545_v19, %v544_v58  ;;  %v552_v29 = vrot.slane %v550_v22, 7  ;;  %v1267_v33 = vunpack.c.l.b16 %v925_v46 }
  0x78   : > { %4971 = vmatmul.msk.bf16.gmra.mxu3 %vm1312_vm12, %v1309_v16  ;;  %v1029_v9 = vor.u32 %v1028_v56, %v1025_v17  ;;  %v553_v34 = vshll.u32 %v6128_v0, 16  ;;  %v292_v37 = vsub.f32 %v5459_v24, %v5751_v6  ;;  %v323_v35 = vpack.c.bf16 %v6124_v25, %v6124_v25 }
  0x79   : > { %v557_v38 = vrot.slane %v552_v29, 4  ;;  %v778_v41 = vsel %vm5792_vm9, %v547_v32, %v777_v28  ;;  %v5410_v47 = vunpack.c.l.bf16 %v5468_v8  ;;  %v1297_v62 = vpack.c.b16 %v1267_v33, %v1266_v31  ;;  %v839_v2 = vld [vmem:[#allocation2 + $0x4c] sm:$0xf] }
  0x7a   : > { %v1030_v42 = vrot.slane %v1029_v9, 4  ;;  %v555_v36 = vor.u32 %v553_v34, %v552_v29  ;;  %779 = vst [vmem:[#allocation2 + $0x78] sm:$0xf] %v778_v41  ;;  %v324_v54 = vpack.c.bf16 %v292_v37, %v292_v37  ;;  %v1032_v49 = vshll.u32 %v839_v2, 16 }
  0x7b   : > { %v865_v0 = vld [vmem:[#allocation2 + $0x50] sm:$0x1]  ;;  %v1036_v60 = vshrl.u32 %v839_v2, 16  ;;  %v782_v6 = vsel %vm5776_vm7, %v557_v38, %v781_v43  ;;  %v610_v52 = vshrl.u32 %v323_v35, 16  ;;  %4959 = vmatmul.msk.bf16.gmra.mxu0 %vm1312_vm12, %v1297_v62  ;;  %v613_v21 = vshll.u32 %v323_v35, 16 }
  0x7c   : > { %v1042_v24 = vshll.u32 %v865_v0, 16  ;;  %v556_v25 = vsel %vm5783_vm8, %v548_v26, %v555_v36  ;;  %783 = vst [vmem:[#allocation2 + $0x80] sm:$0x1] %v782_v6  ;;  %v618_v44 = vshrl.u32 %v324_v54, 16  ;;  %v1034_v4 = vrot.slane %v1032_v49, 5  ;;  %v6241_v26 = vld [vmem:[%s5746_s7 + $0x30] sm:$0xff]  }
  0x7d   : > { %v1038_v48 = vrot.slane %v1036_v60, 4  ;;  %780 = vst.msk [vmem:[#allocation2 + $0x7c] sm:$0xf] %vm329_vm2, %v556_v25  ;;  %v612_v53 = vrot.slane %v610_v52, 7  ;;  %v621_v39 = vshll.u32 %v324_v54, 16  ;;  %v5411_v59 = vunpack.c.h.bf16 %v5468_v8  ;;  %v5477_v54 = vld [vmem:[%s5746_s7 + $0x50] sm:$0xff]  }
  0x7e   : > { %v1044_v40 = vrot.slane %v1042_v24, 5  ;;  %v620_v12 = vrot.slane %v618_v44, 7  ;;  %v267_v61 = vsub.f32 %v5410_v47, %v6228_v50  ;;  %v1035_v45 = vsel %vm5852_vm13, %v1030_v42, %v1034_v4  ;;  %v721_v36 = vld [vmem:[#allocation2 + $0x18] sm:$0xf] }
  0x7f   : > { %v1039_v51 = vor.u32 %v1038_v48, %v1034_v4  ;;  %v615_v1 = vor.u32 %v613_v21, %v612_v53  ;;  %v616_v7 = vrot.slane %v612_v53, 4  ;;  %v268_v30 = vsub.f32 %v5411_v59, %v6228_v50 }
  0x80   : > { %v623_v13 = vor.u32 %v621_v39, %v620_v12  ;;  %v625_v14 = vrot.slane %v620_v12, 4  ;;  %v1276_v58 = vunpack.c.l.b16 %v1035_v45  ;;  %v299_v19 = vpack.c.bf16 %v267_v61, %v267_v61 }
  0x81   : > { %v1040_v15 = vrot.slane %v1039_v51, 4  ;;  %v846_v55 = vld [vmem:[#allocation2 + $0x78] sm:$0xf]  ;;  %v806_v17 = vsel %vm5792_vm9, %v615_v1, %v805_v57  ;;  %v300_v46 = vpack.c.bf16 %v268_v30, %v268_v30  ;;  %v5430_v35 = vunpack.c.l.bf16 %v6241_v26 }
  0x82   : > { %v1119_v22 = vshrl.u32 %v846_v55, 16  ;;  %v1122_v16 = vshll.u32 %v846_v55, 16  ;;  %v624_v63 = vsel %vm5783_vm8, %v616_v7, %v623_v13  ;;  %807 = vst [vmem:[#allocation2 + $0xa8] sm:$0xf] %v806_v17  ;;  %v810_v56 = vsel %vm5776_vm7, %v625_v14, %v809_v11  ;;  %v725_v11 = vld [vmem:[#allocation2 + $0x20] sm:$0x1] }
  0x83   : > { %v1045_v28 = vsel %vm5852_vm13, %v1040_v15, %v1044_v40  ;;  %v869_v8 = vld [vmem:[#allocation2 + $0x80] sm:$0x1]  ;;  %808 = vst.msk [vmem:[#allocation2 + $0xac] sm:$0xf] %vm329_vm2, %v624_v63  ;;  %v406_v31 = vshrl.u32 %v299_v19, 16  ;;  %v409_v32 = vshll.u32 %v299_v19, 16  ;;  %v5431_v21 = vunpack.c.h.bf16 %v6241_v26 }
  0x84   : > { %v1277_v29 = vunpack.c.l.b16 %v1045_v28  ;;  %v847_v33 = vld [vmem:[#allocation2 + $0x7c] sm:$0xf]  ;;  %v1121_v9 = vrot.slane %v1119_v22, 4  ;;  %v1124_v34 = vrot.slane %v1122_v16, 5  ;;  %v1138_v43 = vshll.u32 %v869_v8, 16 }
  0x85   : > { %v1128_v37 = vshll.u32 %v847_v33, 16  ;;  %v1132_v38 = vshrl.u32 %v847_v33, 16  ;;  %811 = vst [vmem:[#allocation2 + $0xb0] sm:$0x1] %v810_v56  ;;  %v408_v41 = vrot.slane %v406_v31, 7  ;;  %v414_v42 = vshrl.u32 %v300_v46, 16 }
  0x86   : > { %v1302_v47 = vpack.c.b16 %v1277_v29, %v1276_v58  ;;  %v1125_v62 = vor.u32 %v1124_v34, %v1121_v9  ;;  %v1140_v2 = vrot.slane %v1138_v43, 5  ;;  %v417_v25 = vshll.u32 %v300_v46, 16 }
  0x87   : > { %v1130_v0 = vrot.slane %v1128_v37, 5  ;;  %v1134_v49 = vrot.slane %v1132_v38, 4  ;;  %v411_v60 = vor.u32 %v409_v32, %v408_v41  ;;  %v412_v6 = vrot.slane %v408_v41, 4 }
  0x88   : > { %4964 = vmatmul.msk.bf16.gmra.mxu1 %vm1312_vm12, %v1302_v47  ;;  %v1126_v52 = vrot.slane %v1125_v62, 4  ;;  %v416_v24 = vrot.slane %v414_v42, 7  ;;  %v277_v53 = vsub.f32 %v5430_v35, %v6228_v50  ;;  %v5446_v39 = vunpack.c.l.bf16 %v5477_v54 }
  0x89   : > { %v1135_v44 = vor.u32 %v1134_v49, %v1130_v0  ;;  %v854_v4 = vld [vmem:[#allocation2 + $0xa8] sm:$0xf]  ;;  %v722_v48 = vsel %vm5792_vm9, %v411_v60, %v721_v36  ;;  %v278_v8 = vsub.f32 %v5431_v21, %v6228_v50  ;;  %v5447_v29 = vunpack.c.h.bf16 %v5477_v54 }
  0x8a   : > { %v1131_v40 = vsel %vm5852_vm13, %v1126_v52, %v1130_v0  ;;  %v855_v12 = vld [vmem:[#allocation2 + $0xac] sm:$0xf]  ;;  %v1215_v57 = vshrl.u32 %v854_v4, 16  ;;  %v1218_v59 = vshll.u32 %v854_v4, 16  ;;  %v419_v61 = vor.u32 %v417_v25, %v416_v24  ;;  %723 = vst [vmem:[#allocation2 + $0x18] sm:$0xf] %v722_v48 }
  0x8b   : > { %v1136_v45 = vrot.slane %v1135_v44, 4  ;;  %v1284_v51 = vunpack.c.l.b16 %v1131_v40  ;;  %v1224_v1 = vshll.u32 %v855_v12, 16  ;;  %v1228_v7 = vshrl.u32 %v855_v12, 16  ;;  %v756_v0 = vld [vmem:[#allocation2 + $0x54] sm:$0xf] }
  0x8c   : > { %v873_v13 = vld [vmem:[#allocation2 + $0xb0] sm:$0x1]  ;;  %v1217_v14 = vrot.slane %v1215_v57, 4  ;;  %v1220_v30 = vrot.slane %v1218_v59, 5  ;;  %v420_v15 = vsel %vm5783_vm8, %v412_v6, %v419_v61  ;;  %v421_v58 = vrot.slane %v416_v24, 4 }
  0x8d   : > { %v1141_v55 = vsel %vm5852_vm13, %v1136_v45, %v1140_v2  ;;  %v1226_v17 = vrot.slane %v1224_v1, 5  ;;  %v1230_v19 = vrot.slane %v1228_v7, 4  ;;  %v1234_v22 = vshll.u32 %v873_v13, 16  ;;  %724 = vst.msk [vmem:[#allocation2 + $0x1c] sm:$0xf] %vm329_vm2, %v420_v15 }
  0x8e   : > { %v1285_v16 = vunpack.c.l.b16 %v1141_v55  ;;  %v1221_v63 = vor.u32 %v1220_v30, %v1217_v14  ;;  %v726_v56 = vsel %vm5776_vm7, %v421_v58, %v725_v11  ;;  %v309_v46 = vpack.c.bf16 %v277_v53, %v277_v53  ;;  %v5481_v55 = vld [vmem:[%s5746_s7 + $0x70] sm:$0xff]  }
  0x8f   : > { %v1231_v26 = vor.u32 %v1230_v19, %v1226_v17  ;;  %v1236_v28 = vrot.slane %v1234_v22, 5  ;;  %727 = vst [vmem:[#allocation2 + $0x20] sm:$0x1] %v726_v56  ;;  %v285_v33 = vsub.f32 %v5446_v39, %v6228_v50  ;;  %v310_v43 = vpack.c.bf16 %v278_v8, %v278_v8 }
  0x90   : > { %v1306_v31 = vpack.c.b16 %v1285_v16, %v1284_v51  ;;  %v1222_v32 = vrot.slane %v1221_v63, 4  ;;  %v491_v37 = vshrl.u32 %v309_v46, 16  ;;  %v494_v38 = vshll.u32 %v309_v46, 16  ;;  %v760_v51 = vld [vmem:[#allocation2 + $0x5c] sm:$0x1] }
  0x91   : > { %v1232_v9 = vrot.slane %v1231_v26, 4  ;;  %v830_v34 = vld [vmem:[#allocation2 + $0x18] sm:$0xf]  ;;  %v286_v62 = vsub.f32 %v5447_v29, %v6228_v50  ;;  %v499_v54 = vshrl.u32 %v310_v43, 16  ;;  %v502_v24 = vshll.u32 %v310_v43, 16 }
  0x92   : > { %4968 = vmatmul.msk.bf16.gmra.mxu2 %vm1312_vm12, %v1306_v31  ;;  %v1227_v41 = vsel %vm5852_vm13, %v1222_v32, %v1226_v17  ;;  %v927_v35 = vshrl.u32 %v830_v34, 16  ;;  %v930_v47 = vshll.u32 %v830_v34, 16  ;;  %v493_v36 = vrot.slane %v491_v37, 7  ;;  %v5469_v17 = vld [vmem:[%s5746_s7 + $0x10] sm:$0xff]   ;;  %v784_v31 = vld [vmem:[#allocation2 + $0x84] sm:$0xf] }
  0x93   : > { %v1237_v2 = vsel %vm5852_vm13, %v1232_v9, %v1236_v28  ;;  %v1292_v42 = vunpack.c.l.b16 %v1227_v41  ;;  %v501_v40 = vrot.slane %v499_v54, 7  ;;  %v317_v12 = vpack.c.bf16 %v285_v33, %v285_v33 }
  0x94   : > { %v1293_v49 = vunpack.c.l.b16 %v1237_v2  ;;  %v6270_v60 = vld [vmem:[#allocation2 + $0x1c] sm:$0xf]  ;;  %v929_v6 = vrot.slane %v927_v35, 4  ;;  %v932_v52 = vrot.slane %v930_v47, 5  ;;  %v496_v44 = vor.u32 %v494_v38, %v493_v36  ;;  %v788_v47 = vld [vmem:[#allocation2 + $0x8c] sm:$0x1] }
  0x95   : > { %v936_v25 = vshll.u32 %v6270_v60, 16  ;;  %v940_v21 = vshrl.u32 %v6270_v60, 16  ;;  %v497_v4 = vrot.slane %v493_v36, 4  ;;  %v504_v7 = vor.u32 %v502_v24, %v501_v40 }
  0x96   : > { %v1310_v48 = vpack.c.b16 %v1293_v49, %v1292_v42  ;;  %v6274_v53 = vld [vmem:[#allocation2 + $0x20] sm:$0x1]  ;;  %v933_v39 = vor.u32 %v932_v52, %v929_v6  ;;  %v757_v45 = vsel %vm5792_vm9, %v496_v44, %v756_v0  ;;  %v506_v11 = vrot.slane %v501_v40, 4 }
  0x97   : > { %v938_v57 = vrot.slane %v936_v25, 5  ;;  %v942_v59 = vrot.slane %v940_v21, 4  ;;  %v946_v61 = vshll.u32 %v6274_v53, 16  ;;  %758 = vst [vmem:[#allocation2 + $0x54] sm:$0xf] %v757_v45  ;;  %v318_v13 = vpack.c.bf16 %v286_v62, %v286_v62 }
  0x98   : > { %4972 = vmatmul.msk.bf16.gmra.mxu3 %vm1312_vm12, %v1310_v48  ;;  %v934_v1 = vrot.slane %v933_v39, 4  ;;  %v559_v15 = vshrl.u32 %v317_v12, 16  ;;  %v562_v58 = vshll.u32 %v317_v12, 16  ;;  %v505_v22 = vsel %vm5783_vm8, %v497_v4, %v504_v7 }
  0x99   : > { %v943_v14 = vor.u32 %v942_v59, %v938_v57  ;;  %v948_v30 = vrot.slane %v946_v61, 5  ;;  %v761_v16 = vsel %vm5776_vm7, %v506_v11, %v760_v51  ;;  %v567_v63 = vshrl.u32 %v318_v13, 16  ;;  %759 = vst.msk [vmem:[#allocation2 + $0x58] sm:$0xf] %vm329_vm2, %v505_v22 }
  0x9a   : > { %v939_v19 = vsel %vm5852_vm13, %v934_v1, %v938_v57  ;;  %v561_v28 = vrot.slane %v559_v15, 7  ;;  %v570_v8 = vshll.u32 %v318_v13, 16  ;;  %762 = vst [vmem:[#allocation2 + $0x5c] sm:$0x1] %v761_v16  ;;  %v5462_v32 = vunpack.c.l.bf16 %v5481_v55 }
  0x9b   : > { %v944_v56 = vrot.slane %v943_v14, 4  ;;  %v1268_v26 = vunpack.c.l.b16 %v939_v19  ;;  %v569_v46 = vrot.slane %v567_v63, 7  ;;  %v5463_v29 = vunpack.c.h.bf16 %v5481_v55 }
  0x9c   : > { %v5414_v33 = vunpack.c.l.bf16 %v5469_v17  ;;  %v564_v34 = vor.u32 %v562_v58, %v561_v28  ;;  %v565_v43 = vrot.slane %v561_v28, 4  ;;  %v5415_v37 = vunpack.c.h.bf16 %v5469_v17 }
  0x9d   : > { %v949_v9 = vsel %vm5852_vm13, %v944_v56, %v948_v30  ;;  %v572_v41 = vor.u32 %v570_v8, %v569_v46  ;;  %v574_v35 = vrot.slane %v569_v46, 4  ;;  %v293_v62 = vsub.f32 %v5462_v32, %v6228_v50 }
  0x9e   : > { %v1269_v38 = vunpack.c.l.b16 %v949_v9  ;;  %v840_v2 = vld [vmem:[#allocation2 + $0x54] sm:$0xf]  ;;  %v785_v42 = vsel %vm5792_vm9, %v564_v34, %v784_v31  ;;  %v294_v36 = vsub.f32 %v5463_v29, %v6228_v50  ;;  %v269_v54 = vsub.f32 %v5414_v33, %v6228_v50 }
  0x9f   : > { %v1047_v49 = vshrl.u32 %v840_v2, 16  ;;  %v1050_v6 = vshll.u32 %v840_v2, 16  ;;  %v573_v52 = vsel %vm5783_vm8, %v565_v43, %v572_v41  ;;  %786 = vst [vmem:[#allocation2 + $0x84] sm:$0xf] %v785_v42  ;;  %v789_v24 = vsel %vm5776_vm7, %v574_v35, %v788_v47  ;;  %v812_v35 = vld [vmem:[#allocation2 + $0xb4] sm:$0xf] }
  0xa0   : > { %v1298_v0 = vpack.c.b16 %v1269_v38, %v1268_v26  ;;  %787 = vst.msk [vmem:[#allocation2 + $0x88] sm:$0xf] %vm329_vm2, %v573_v52  ;;  %v325_v25 = vpack.c.bf16 %v293_v62, %v293_v62  ;;  %v326_v21 = vpack.c.bf16 %v294_v36, %v294_v36  ;;  %v301_v44 = vpack.c.bf16 %v269_v54, %v269_v54  ;;  %v6302_v4 = vld [vmem:[#allocation2 + $0x58] sm:$0xf]  ;;  %v816_v36 = vld [vmem:[#allocation2 + $0xbc] sm:$0x1] }
  0xa1   : > { %v1049_v48 = vrot.slane %v1047_v49, 4  ;;  %v1052_v39 = vrot.slane %v1050_v6, 5  ;;  %790 = vst [vmem:[#allocation2 + $0x8c] sm:$0x1] %v789_v24  ;;  %v270_v40 = vsub.f32 %v5415_v37, %v6228_v50  ;;  %v6305_v12 = vld [vmem:[#allocation2 + $0x5c] sm:$0x1] }
  0xa2   : > { %4960 = vmatmul.msk.bf16.gmra.mxu0 %vm1312_vm12, %v1298_v0  ;;  %v1056_v57 = vshll.u32 %v6302_v4, 16  ;;  %v1060_v59 = vshrl.u32 %v6302_v4, 16  ;;  %v627_v61 = vshrl.u32 %v325_v25, 16  ;;  %v630_v45 = vshll.u32 %v325_v25, 16  ;;  %v728_v6 = vld [vmem:[#allocation2 + $0x24] sm:$0xf] }
  0xa3   : > { %v1053_v51 = vor.u32 %v1052_v39, %v1049_v48  ;;  %v1066_v1 = vshll.u32 %v6305_v12, 16  ;;  %v635_v7 = vshrl.u32 %v326_v21, 16  ;;  %v638_v11 = vshll.u32 %v326_v21, 16 }
  0xa4   : > { %v1058_v13 = vrot.slane %v1056_v57, 5  ;;  %v1062_v14 = vrot.slane %v1060_v59, 4  ;;  %v629_v30 = vrot.slane %v627_v61, 7  ;;  %v423_v15 = vshrl.u32 %v301_v44, 16 }
  0xa5   : > { %v1054_v58 = vrot.slane %v1053_v51, 4  ;;  %v1068_v55 = vrot.slane %v1066_v1, 5  ;;  %v637_v50 = vrot.slane %v635_v7, 7  ;;  %v302_v17 = vpack.c.bf16 %v270_v40, %v270_v40  ;;  %v5532_v7 = vld [vmem:[#allocation2 + $0x8] sm:$0x1] }
  0xa6   : > { %v1063_v19 = vor.u32 %v1062_v14, %v1058_v13  ;;  %v848_v22 = vld [vmem:[#allocation2 + $0x84] sm:$0xf]  ;;  %v632_v16 = vor.u32 %v630_v45, %v629_v30  ;;  %v633_v63 = vrot.slane %v629_v30, 4  ;;  %v426_v56 = vshll.u32 %v301_v44, 16  ;;  %v732_v30 = vld [vmem:[#allocation2 + $0x2c] sm:$0x1] }
  0xa7   : > { %v1059_v26 = vsel %vm5852_vm13, %v1054_v58, %v1058_v13  ;;  %v849_v28 = vld [vmem:[#allocation2 + $0x88] sm:$0xf]  ;;  %v1143_v8 = vshrl.u32 %v848_v22, 16  ;;  %v1146_v46 = vshll.u32 %v848_v22, 16  ;;  %v640_v31 = vor.u32 %v638_v11, %v637_v50  ;;  %v5533_v22 = vld [vmem:[#allocation2 + $0x4] sm:$0xf] }
  0xa8   : > { %v1064_v32 = vrot.slane %v1063_v19, 4  ;;  %v870_v29 = vld [vmem:[#allocation2 + $0x8c] sm:$0x1]  ;;  %v1152_v33 = vshll.u32 %v849_v28, 16  ;;  %v1156_v9 = vshrl.u32 %v849_v28, 16  ;;  %v425_v34 = vrot.slane %v423_v15, 7 }
  0xa9   : > { %v1278_v43 = vunpack.c.l.b16 %v1059_v26  ;;  %v1145_v37 = vrot.slane %v1143_v8, 4  ;;  %v1148_v38 = vrot.slane %v1146_v46, 5  ;;  %v1162_v41 = vshll.u32 %v870_v29, 16 }
  0xaa   : > { %v1069_v47 = vsel %vm5852_vm13, %v1064_v32, %v1068_v55  ;;  %v1154_v62 = vrot.slane %v1152_v33, 5  ;;  %v1158_v2 = vrot.slane %v1156_v9, 4  ;;  %v641_v42 = vsel %vm5783_vm8, %v633_v63, %v640_v31  ;;  %v5218_v63 = vld [vmem:[%s7404_s1 + $0xc] sm:$0x3] }
  0xab   : > { %v1279_v54 = vunpack.c.l.b16 %v1069_v47  ;;  %v1149_v0 = vor.u32 %v1148_v38, %v1145_v37  ;;  %v642_v49 = vrot.slane %v637_v50, 4  ;;  %815 = vst.msk [vmem:[#allocation2 + $0xb8] sm:$0xf] %vm329_vm2, %v641_v42  ;;  %v1164_v24 = vrot.slane %v1162_v41, 5  ;;  %v1677_v50 = vld [vmem:[#allocation2] sm:$0xe] }
  0xac   : > { %v1159_v52 = vor.u32 %v1158_v2, %v1154_v62  ;;  %v813_v25 = vsel %vm5792_vm9, %v632_v16, %v812_v35  ;;  %v428_v21 = vor.u32 %v426_v56, %v425_v34  ;;  %v431_v40 = vshrl.u32 %v302_v17, 16 }
  0xad   : > { %v1303_v44 = vpack.c.b16 %v1279_v54, %v1278_v43  ;;  %v1150_v48 = vrot.slane %v1149_v0, 4  ;;  %814 = vst [vmem:[#allocation2 + $0xb4] sm:$0xf] %v813_v25  ;;  %v817_v39 = vsel %vm5776_vm7, %v642_v49, %v816_v36  ;;  %v434_v59 = vshll.u32 %v302_v17, 16  ;;  %v2348_v17 = vld [vmem:[#allocation2 + $0xc] sm:$0xf] }
  0xae   : > { %v1160_v57 = vrot.slane %v1159_v52, 4  ;;  %818 = vst [vmem:[#allocation2 + $0xbc] sm:$0x1] %v817_v39  ;;  %v729_v61 = vsel %vm5792_vm9, %v428_v21, %v728_v6  ;;  %v429_v51 = vrot.slane %v425_v34, 4  ;;  %v433_v1 = vrot.slane %v431_v40, 7 }
  0xaf   : > { %4965 = vmatmul.msk.bf16.gmra.mxu1 %vm1312_vm12, %v1303_v44  ;;  %v1155_v45 = vsel %vm5852_vm13, %v1150_v48, %v1154_v62  ;;  %730 = vst [vmem:[#allocation2 + $0x24] sm:$0xf] %v729_v61  ;;  %v1733_v11 = vrot.slane %v5532_v7, 5  ;;  %v1730_v16 = vrot.slane %v5533_v22, 5  ;;  %v5054_v32 = vrot.slane %v1677_v50, 9 }
  0xb0   : > { %v1165_v13 = vsel %vm5852_vm13, %v1160_v57, %v1164_v24  ;;  %v1286_v14 = vunpack.c.l.b16 %v1155_v45  ;;  %v436_v58 = vor.u32 %v434_v59, %v433_v1  ;;  %v438_v55 = vrot.slane %v433_v1, 4  ;;  %v2349_v6 = vld [vmem:[#allocation2 + $0x10] sm:$0xf]  ;;  %v5355_v45 = vld [vmem:[#allocation2] sm:$0xff] }
  0xb1   : > { %v1287_v15 = vunpack.c.l.b16 %v1165_v13  ;;  %v3564_v29 = vand.u32 %v5218_v63, %v5735_v3  ;;  %v2397_v33 = vshrl.u32 %v2348_v17, 16  ;;  %v1732_v47 = vrot.slane %v1730_v16, 4  ;;  %v5299_v63 = vld [vmem:[%s7404_s1 + $0xe] sm:$0x3] }
  0xb2   : > { %v857_v19 = vld [vmem:[#allocation2 + $0xb8] sm:$0xf]  ;;  %v437_v8 = vsel %vm5783_vm8, %v429_v51, %v436_v58  ;;  %v733_v31 = vsel %vm5776_vm7, %v438_v55, %v732_v30  ;;  %v2400_v21 = vshll.u32 %v2348_v17, 16  ;;  %v1731_v48 = vsel %vm6340_vm0, %v5054_v32, %v1730_v16 }
  0xb3   : > { %v1307_v56 = vpack.c.b16 %v1287_v15, %v1286_v14  ;;  %v1248_v26 = vshll.u32 %v857_v19, 16  ;;  %v1252_v28 = vshrl.u32 %v857_v19, 16  ;;  %731 = vst.msk [vmem:[#allocation2 + $0x28] sm:$0xf] %vm329_vm2, %v437_v8  ;;  %3573 = vmatpush.bf16.msra.mxu2 %v3564_v29  ;;  %v1734_v39 = vsel %vm6340_vm0, %v1732_v47, %v1733_v11  ;;  %v5332_v8 = vld [vmem:[%s7404_s1 + $0x10] sm:$0x3] }
  0xb4   : > { %v856_v46 = vld [vmem:[#allocation2 + $0xb4] sm:$0xf]  ;;  %734 = vst [vmem:[#allocation2 + $0x2c] sm:$0x1] %v733_v31  ;;  %v2399_v40 = vrot.slane %v2397_v33, 4  ;;  %v2406_v51 = vshll.u32 %v2349_v6, 16  ;;  %v1842_v58 = vunpack.c.l.b16 %v1731_v48  ;;  %v1843_v55 = vunpack.c.l.b16 %v1734_v39 }
  0xb5   : > { %4969 = vmatmul.msk.bf16.gmra.mxu2 %vm1312_vm12, %v1307_v56  ;;  %v874_v9 = vld [vmem:[#allocation2 + $0xbc] sm:$0x1]  ;;  %v1239_v34 = vshrl.u32 %v856_v46, 16  ;;  %v1242_v43 = vshll.u32 %v856_v46, 16  ;;  %v1250_v37 = vrot.slane %v1248_v26, 5  ;;  %v1254_v38 = vrot.slane %v1252_v28, 4 }
  0xb6   : > { %v1258_v41 = vshll.u32 %v874_v9, 16  ;;  %v832_v35 = vld [vmem:[#allocation2 + $0x24] sm:$0xf]  ;;  %v2410_v1 = vshrl.u32 %v2349_v6, 16  ;;  %v2402_v50 = vrot.slane %v2400_v21, 5  ;;  %v2408_v26 = vrot.slane %v2406_v51, 5 }
  0xb7   : > { %v1241_v62 = vrot.slane %v1239_v34, 4  ;;  %v1244_v2 = vrot.slane %v1242_v43, 5  ;;  %v1255_v42 = vor.u32 %v1254_v38, %v1250_v37  ;;  %v951_v36 = vshrl.u32 %v832_v35, 16  ;;  %v5201_v28 = vld [vmem:[%s7404_s1 + $0xa] sm:$0x3] }
  0xb8   : > { %v1260_v0 = vrot.slane %v1258_v41, 5  ;;  %v954_v49 = vshll.u32 %v832_v35, 16  ;;  %v2412_v29 = vrot.slane %v2410_v1, 4  ;;  %v1874_v9 = vpack.c.b16 %v1843_v55, %v1842_v58  ;;  %v2350_v34 = vld [vmem:[#allocation2 + $0x14] sm:$0x1] }
  0xb9   : > { %v1245_v52 = vor.u32 %v1244_v2, %v1241_v62  ;;  %v1256_v24 = vrot.slane %v1255_v42, 4  ;;  %v953_v25 = vrot.slane %v951_v36, 4  ;;  %v3277_v38 = vand.u32 %v5201_v28, %v5735_v3  ;;  %v1678_v47 = vld [vmem:[#allocation2 + $0xc] sm:$0xe]  ;;  %v1679_v48 = vld [vmem:[#allocation2 + $0x18] sm:$0xe] }
  0xba   : > { %v956_v44 = vrot.slane %v954_v49, 5  ;;  %v6350_v61 = vld [vmem:[#allocation2 + $0x28] sm:$0xf]  ;;  %v4616_v41 = vand.u32 %v5332_v8, %v5735_v3  ;;  %v1737_v62 = vrot.slane %v6175_v18, 5  ;;  %v2403_v42 = vor.u32 %v2402_v50, %v2399_v40  ;;  %v2352_v51 = vld [vmem:[#allocation2 + $0x1c] sm:$0xf] }
  0xbb   : > { %v1246_v57 = vrot.slane %v1245_v52, 4  ;;  %v1261_v59 = vsel %vm5852_vm13, %v1256_v24, %v1260_v0  ;;  %v960_v14 = vshll.u32 %v6350_v61, 16  ;;  %v964_v30 = vshrl.u32 %v6350_v61, 16  ;;  %v6356_v11 = vld [vmem:[#allocation2 + $0x2c] sm:$0x1]  ;;  %3286 = vmatpush.bf16.msra.mxu1 %v3277_v38 }
  0xbc   : > { %v1295_v7 = vunpack.c.l.b16 %v1261_v59  ;;  %v957_v13 = vor.u32 %v956_v44, %v953_v25  ;;  %v970_v56 = vshll.u32 %v6356_v11, 16  ;;  %v2413_v36 = vor.u32 %v2412_v29, %v2408_v26  ;;  %4625 = vmatpush.bf16.msra.mxu0 %v4616_v41  ;;  %v2351_v44 = vld [vmem:[#allocation2 + $0x18] sm:$0xf]  ;;  %v5371_v50 = vld [vmem:[#allocation2 + $0xc] sm:$0xff] }
  0xbd   : > { %v1251_v15 = vsel %vm5852_vm13, %v1246_v57, %v1250_v37  ;;  %v962_v22 = vrot.slane %v960_v14, 5  ;;  %v966_v16 = vrot.slane %v964_v30, 4  ;;  %v4218_v37 = vand.u32 %v5299_v63, %v5735_v3 }
  0xbe   : > { %v1294_v17 = vunpack.c.l.b16 %v1251_v15  ;;  %v958_v19 = vrot.slane %v957_v13, 4  ;;  %v972_v33 = vrot.slane %v970_v56, 5  ;;  %v2416_v0 = vshll.u32 %v2350_v34, 16 }
  0xbf   : > { %5038 = vmatmul.msk.bf16.vlgmr.msrb.gmra.mxu1 %vm1312_vm12, %v5355_v45  ;;  %v967_v32 = vor.u32 %v966_v16, %v962_v22  ;;  %4227 = vmatpush.bf16.msra.mxu3 %v4218_v37  ;;  %v5055_v6 = vrot.slane %v1678_v47, 9  ;;  %v1739_v52 = vrot.slane %v1737_v62, 4  ;;  %v1740_v3 = vrot.slane %v6180_v5, 5  ;;  %v5356_v45 = vld [vmem:[#allocation2 + $0xc] sm:$0xff]  ;;  %v2355_v47 = vld [vmem:[#allocation2 + $0x28] sm:$0xf] }
  0xc0   : > { %v1311_v46 = vpack.c.b16 %v1295_v7, %v1294_v17  ;;  %v963_v31 = vsel %vm5852_vm13, %v958_v19, %v962_v22  ;;  %v2404_v25 = vrot.slane %v2403_v42, 4  ;;  %v2414_v21 = vrot.slane %v2413_v36, 4  ;;  %v5372_v42 = vld [vmem:[#allocation2 + $0x18] sm:$0xff] }
  0xc1   : > { %v968_v43 = vrot.slane %v967_v32, 4  ;;  %v1270_v35 = vunpack.c.l.b16 %v963_v31  ;;  %v2418_v18 = vrot.slane %v2416_v0, 5  ;;  %v1744_v39 = vrot.slane %v6270_v60, 5  ;;  %v2353_v32 = vld [vmem:[#allocation2 + $0x20] sm:$0x1] }
  0xc2   : > { %4973 = vmatmul.msk.bf16.gmra.mxu3 %vm1312_vm12, %v1311_v46  ;;  %v1738_v40 = vsel %vm6340_vm0, %v5055_v6, %v1737_v62  ;;  %v1741_v57 = vsel %vm6340_vm0, %v1739_v52, %v1740_v3  ;;  %v5056_v59 = vrot.slane %v1679_v48, 9  ;;  %v1747_v1 = vrot.slane %v6274_v53, 5 }
  0xc3   : > { %v973_v2 = vsel %vm5852_vm13, %v968_v43, %v972_v33  ;;  %v1746_v5 = vrot.slane %v1744_v39, 4  ;;  %v2409_v7 = vsel %vm5852_vm13, %v2404_v25, %v2408_v26  ;;  %v2419_v13 = vsel %vm5852_vm13, %v2414_v21, %v2418_v18  ;;  %v2354_v43 = vld [vmem:[#allocation2 + $0x24] sm:$0xf]  ;;  %v2356_v21 = vld [vmem:[#allocation2 + $0x2c] sm:$0x1] }
  0xc4   : > { %v1271_v49 = vunpack.c.l.b16 %v973_v2  ;;  %v2421_v14 = vshrl.u32 %v2351_v44, 16  ;;  %v1745_v60 = vsel %vm6340_vm0, %v5056_v59, %v1744_v39  ;;  %v1844_v30 = vunpack.c.l.b16 %v1738_v40  ;;  %v1680_v39 = vld [vmem:[#allocation2 + $0x24] sm:$0xe] }
  0xc5   : > { %5071 = vmatmul.msk.bf16.vlgmr.msrb.gmra.mxu2 %vm1312_vm12, %v1874_v9  ;;  %v1845_v15 = vunpack.c.l.b16 %v1741_v57  ;;  %v1748_v58 = vsel %vm6340_vm0, %v1746_v5, %v1747_v1  ;;  %v1846_v55 = vunpack.c.l.b16 %v1745_v60  ;;  %v2424_v17 = vshll.u32 %v2351_v44, 16 }
  0xc6   : > { %v1299_v24 = vpack.c.b16 %v1271_v49, %v1270_v35  ;;  %v2430_v19 = vshll.u32 %v2352_v51, 16  ;;  %v2434_v53 = vshrl.u32 %v2352_v51, 16  ;;  %v1847_v22 = vunpack.c.l.b16 %v1748_v58  ;;  %v5357_v35 = vld [vmem:[#allocation2 + $0x18] sm:$0xff]  ;;  %v2358_v58 = vld [vmem:[#allocation2 + $0x34] sm:$0xf] }
  0xc7   : > { %v2782_v63 = vunpack.c.l.b16 %v2409_v7  ;;  %v2783_v56 = vunpack.c.l.b16 %v2419_v13  ;;  %v1875_v26 = vpack.c.b16 %v1845_v15, %v1844_v30  ;;  %v2423_v28 = vrot.slane %v2421_v14, 4  ;;  %v2357_v30 = vld [vmem:[#allocation2 + $0x30] sm:$0xf]  ;;  %v5358_v15 = vld [vmem:[#allocation2 + $0x24] sm:$0xff] }
  0xc8   : > { %4961 = vmatmul.msk.bf16.gmra.mxu0 %vm1312_vm12, %v1299_v24  ;;  %v1876_v16 = vpack.c.b16 %v1847_v22, %v1846_v55  ;;  %v2426_v8 = vrot.slane %v2424_v17, 5  ;;  %v2432_v46 = vrot.slane %v2430_v19, 5  ;;  %v2436_v31 = vrot.slane %v2434_v53, 4  ;;  %v5373_v53 = vld [vmem:[#allocation2 + $0x24] sm:$0xff] }
  0xc9   : > { %v2814_v29 = vpack.c.b16 %v2783_v56, %v2782_v63  ;;  %v2440_v34 = vshll.u32 %v2353_v32, 16  ;;  %v2445_v62 = vshrl.u32 %v2354_v43, 16  ;;  %v2448_v2 = vshll.u32 %v2354_v43, 16  ;;  %v2359_v32 = vld [vmem:[#allocation2 + $0x38] sm:$0x1] }
  0xca   : > { %v2427_v33 = vor.u32 %v2426_v8, %v2423_v28  ;;  %v2437_v9 = vor.u32 %v2436_v31, %v2432_v46  ;;  %v2454_v49 = vshll.u32 %v2355_v47, 16  ;;  %v2458_v6 = vshrl.u32 %v2355_v47, 16  ;;  %v1681_v43 = vld [vmem:[#allocation2 + $0x30] sm:$0xe] }
  0xcb   : > { %v2442_v41 = vrot.slane %v2440_v34, 5  ;;  %v2447_v52 = vrot.slane %v2445_v62, 4  ;;  %v2450_v3 = vrot.slane %v2448_v2, 5  ;;  %v1751_v48 = vrot.slane %v6350_v61, 5  ;;  %v5535_v2 = vld [vmem:[#allocation2 + $0x38] sm:$0x1] }
  0xcc   : > { %v2428_v37 = vrot.slane %v2427_v33, 4  ;;  %v2438_v38 = vrot.slane %v2437_v9, 4  ;;  %v2456_v18 = vrot.slane %v2454_v49, 5  ;;  %v2460_v44 = vrot.slane %v2458_v6, 4  ;;  %v5534_v9 = vld [vmem:[#allocation2 + $0x34] sm:$0xf] }
  0xcd   : > { %v2451_v40 = vor.u32 %v2450_v3, %v2447_v52  ;;  %v2464_v59 = vshll.u32 %v2356_v21, 16  ;;  %v5057_v51 = vrot.slane %v1680_v39, 9  ;;  %v1753_v5 = vrot.slane %v1751_v48, 4  ;;  %v2361_v21 = vld [vmem:[#allocation2 + $0x40] sm:$0xf] }
  0xce   : > { %v2433_v36 = vsel %vm5852_vm13, %v2428_v37, %v2432_v46  ;;  %v2443_v0 = vsel %vm5852_vm13, %v2438_v38, %v2442_v41  ;;  %v1754_v1 = vrot.slane %v6356_v11, 5  ;;  %v2469_v11 = vshrl.u32 %v2357_v30, 16 }
  0xcf   : > { %5039 = vmatmul.msk.bf16.gmra.mxu1 %vm1312_vm12, %v5356_v45  ;;  %v2784_v24 = vunpack.c.l.b16 %v2433_v36  ;;  %v2785_v25 = vunpack.c.l.b16 %v2443_v0  ;;  %v2461_v45 = vor.u32 %v2460_v44, %v2456_v18  ;;  %v2452_v7 = vrot.slane %v2451_v40, 4  ;;  %v2360_v0 = vld [vmem:[#allocation2 + $0x3c] sm:$0xf] }
  0xd0   : > { %v2466_v14 = vrot.slane %v2464_v59, 5  ;;  %v1752_v60 = vsel %vm6340_vm0, %v5057_v51, %v1751_v48  ;;  %v1755_v61 = vsel %vm6340_vm0, %v1753_v5, %v1754_v1  ;;  %v2472_v19 = vshll.u32 %v2357_v30, 16 }
  0xd1   : > { %v2815_v57 = vpack.c.b16 %v2785_v25, %v2784_v24  ;;  %v2462_v13 = vrot.slane %v2461_v45, 4  ;;  %v2457_v55 = vsel %vm5852_vm13, %v2452_v7, %v2456_v18  ;;  %v1849_v17 = vunpack.c.l.b16 %v1755_v61  ;;  %v5359_v25 = vld [vmem:[#allocation2 + $0x30] sm:$0xff]  ;;  %v2362_v61 = vld [vmem:[#allocation2 + $0x44] sm:$0x1] }
  0xd2   : > { %5152 = vmatmul.msk.bf16.vlgmr.msrb.gmra.mxu3 %vm1312_vm12, %v5371_v50  ;;  %v1848_v50 = vunpack.c.l.b16 %v1752_v60  ;;  %v2482_v63 = vshrl.u32 %v2358_v58, 16  ;;  %v2786_v56 = vunpack.c.l.b16 %v2457_v55  ;;  %v2471_v46 = vrot.slane %v2469_v11, 4 }
  0xd3   : > { %v2467_v22 = vsel %vm5852_vm13, %v2462_v13, %v2466_v14  ;;  %v2474_v31 = vrot.slane %v2472_v19, 5  ;;  %v1758_v34 = vrot.slane %v5534_v9, 5  ;;  %v2488_v41 = vshll.u32 %v2359_v32, 16  ;;  %v6445_v32 = vpop.f32.mrf.mxu0 }
  0xd4   : > { %v2787_v28 = vunpack.c.l.b16 %v2467_v22  ;;  %v1877_v8 = vpack.c.b16 %v1849_v17, %v1848_v50  ;;  %v2484_v33 = vrot.slane %v2482_v63, 4  ;;  %v5058_v47 = vrot.slane %v1681_v43, 9  ;;  %v1682_v50 = vld [vmem:[#allocation2 + $0x3c] sm:$0xe]  ;;  %v2363_v43 = vld [vmem:[#allocation2 + $0x48] sm:$0xf] }
  0xd5   : > { %5072 = vmatmul.msk.bf16.gmra.mxu2 %vm1312_vm12, %v1875_v26  ;;  %v6418_v26 = vpop.f32.mrf.mxu1  ;;  %v2475_v38 = vor.u32 %v2474_v31, %v2471_v46  ;;  %v1760_v62 = vrot.slane %v1758_v34, 4  ;;  %v2490_v6 = vrot.slane %v2488_v41, 5  ;;  %v2493_v18 = vshrl.u32 %v2360_v0, 16 }
  0xd6   : > { %v2816_v37 = vpack.c.b16 %v2787_v28, %v2786_v56  ;;  %v1759_v52 = vsel %vm6340_vm0, %v5058_v47, %v1758_v34  ;;  %v2496_v44 = vshll.u32 %v2360_v0, 16  ;;  %v2502_v51 = vshll.u32 %v2361_v21, 16  ;;  %v5537_v28 = vld [vmem:[#allocation2 + $0x44] sm:$0x1] }
  0xd7   : > { %v2476_v36 = vrot.slane %v2475_v38, 4  ;;  %v1850_v39 = vunpack.c.l.b16 %v1759_v52  ;;  %v2506_v5 = vshrl.u32 %v2361_v21, 16  ;;  %v2495_v1 = vrot.slane %v2493_v18, 4  ;;  %v2364_v38 = vld [vmem:[#allocation2 + $0x4c] sm:$0xf] }
  0xd8   : > { %5169 = vmatmul.msk.bf16.vlgmr.msrb.gmra.mxu0 %vm1312_vm12, %v2814_v29  ;;  %v2498_v7 = vrot.slane %v2496_v44, 5  ;;  %v2504_v30 = vrot.slane %v2502_v51, 5  ;;  %v5059_v63 = vrot.slane %v1682_v50, 9  ;;  %v2526_v0 = vshll.u32 %v2364_v38, 16 }
  0xda   : > { %v2499_v17 = vor.u32 %v2498_v7, %v2495_v1 }
  0xdb   : > { %v6463_v1 = vpop.f32.mrf.mxu0 }
  0xdc   : > { %v2500_v46 = vrot.slane %v2499_v17, 4  ;;  %v2366_v17 = vld [vmem:[#allocation2 + $0x54] sm:$0xf] }
  0xdd   : > { %v6427_v24 = vpop.f32.mrf.mxu1 }
  0xde   : > { %v2505_v41 = vsel %vm5852_vm13, %v2500_v46, %v2504_v30  ;;  %v2541_v46 = vshrl.u32 %v2366_v17, 16 }
  0xdf   : > { %5040 = vmatmul.msk.bf16.gmra.mxu1 %vm1312_vm12, %v5357_v35  ;;  %v2790_v52 = vunpack.c.l.b16 %v2505_v41 }
  0xe2   : > { %5153 = vmatmul.msk.bf16.gmra.mxu3 %vm1312_vm12, %v5372_v42  ;;  %v1761_v42 = vrot.slane %v5535_v2, 5  ;;  %v2520_v2 = vshll.u32 %v2363_v43, 16 }
  0xe4   : > { %v1762_v3 = vsel %vm6340_vm0, %v1760_v62, %v1761_v42  ;;  %v2517_v62 = vshrl.u32 %v2363_v43, 16  ;;  %v5375_v42 = vld [vmem:[#allocation2 + $0x3c] sm:$0xff]  ;;  %v2522_v44 = vrot.slane %v2520_v2, 5 }
  0xe5   : > { %5073 = vmatmul.msk.bf16.gmra.mxu2 %vm1312_vm12, %v1876_v16  ;;  %v2478_v16 = vshll.u32 %v2358_v58, 16  ;;  %v1851_v40 = vunpack.c.l.b16 %v1762_v3  ;;  %v5536_v58 = vld [vmem:[#allocation2 + $0x40] sm:$0xf] }
  0xe6   : > { %v1765_v55 = vrot.slane %v5536_v58, 5  ;;  %v2519_v18 = vrot.slane %v2517_v62, 4  ;;  %v2543_v62 = vrot.slane %v2541_v46, 4  ;;  %v5377_v46 = vld [vmem:[#allocation2 + $0x54] sm:$0xff] }
  0xe7   : > { %v2480_v29 = vrot.slane %v2478_v16, 5  ;;  %v6429_v48 = vpop.f32.mrf.mxu2  ;;  %v1878_v60 = vpack.c.b16 %v1851_v40, %v1850_v39  ;;  %v2365_v39 = vld [vmem:[#allocation2 + $0x50] sm:$0x1]  ;;  %v2528_v40 = vrot.slane %v2526_v0, 5 }
  0xe8   : > { %5170 = vmatmul.msk.bf16.gmra.mxu0 %vm1312_vm12, %v2815_v57  ;;  %v5374_v57 = vld [vmem:[#allocation2 + $0x30] sm:$0xff]  ;;  %v1767_v56 = vrot.slane %v1765_v55, 4  ;;  %v1766_v9 = vsel %vm6340_vm0, %v5059_v63, %v1765_v55 }
  0xe9   : > { %v2485_v35 = vor.u32 %v2484_v33, %v2480_v29  ;;  %v2481_v59 = vsel %vm5852_vm13, %v2476_v36, %v2480_v29 }
  0xea   : > { %v2788_v13 = vunpack.c.l.b16 %v2481_v59  ;;  %v6443_v31 = vpop.f32.mrf.mxu3  ;;  %v5538_v59 = vld [vmem:[#allocation2 + $0x4c] sm:$0xf] }
  0xeb   : > { %v2486_v49 = vrot.slane %v2485_v35, 4  ;;  %v6437_v11 = vpop.f32.mrf.mxu1  ;;  %v1852_v35 = vunpack.c.l.b16 %v1766_v9 }
  0xed   : > { %v2491_v45 = vsel %vm5852_vm13, %v2486_v49, %v2490_v6  ;;  %v2530_v49 = vshrl.u32 %v2364_v38, 16 }
  0xee   : > { %v2789_v14 = vunpack.c.l.b16 %v2491_v45  ;;  %v1772_v45 = vrot.slane %v5538_v59, 5 }
  0xef   : > { %5041 = vmatmul.msk.bf16.gmra.mxu1 %vm1312_vm12, %v5358_v15  ;;  %v2508_v15 = vrot.slane %v2506_v5, 4  ;;  %v6440_v16 = vpop.f32.mrf.mxu2  ;;  %v1683_v5 = vld [vmem:[#allocation2 + $0x48] sm:$0xe] }
  0xf0   : > { %v2817_v19 = vpack.c.b16 %v2789_v14, %v2788_v13  ;;  %v2523_v13 = vor.u32 %v2522_v44, %v2519_v18  ;;  %v2536_v14 = vshll.u32 %v2365_v39, 16  ;;  %v1779_v18 = vrot.slane %v6302_v4, 5  ;;  %v1684_v44 = vld [vmem:[#allocation2 + $0x54] sm:$0xe] }
  0xf1   : > { %v2509_v22 = vor.u32 %v2508_v15, %v2504_v30  ;;  %v1774_v30 = vrot.slane %v1772_v45, 4  ;;  %v5539_v15 = vld [vmem:[#allocation2 + $0x50] sm:$0x1] }
  0xf2   : > { %5154 = vmatmul.msk.bf16.gmra.mxu3 %vm1312_vm12, %v5373_v53  ;;  %v2512_v53 = vshll.u32 %v2362_v61, 16  ;;  %v6461_v51 = vpop.f32.mrf.mxu3  ;;  %v5060_v61 = vrot.slane %v1683_v5, 9  ;;  %v1775_v58 = vrot.slane %v5539_v15, 5  ;;  %v2524_v50 = vrot.slane %v2523_v13, 4 }
  0xf3   : > { %v2510_v29 = vrot.slane %v2509_v22, 4  ;;  %v6455_v6 = vpop.f32.mrf.mxu1  ;;  %v5061_v5 = vrot.slane %v1684_v44, 9  ;;  %v1782_v13 = vrot.slane %v6305_v12, 5 }
  0xf4   : > { %v2514_v33 = vrot.slane %v2512_v53, 5  ;;  %v2538_v53 = vrot.slane %v2536_v14, 5  ;;  %v1773_v63 = vsel %vm6340_vm0, %v5060_v61, %v1772_v45  ;;  %v2529_v38 = vsel %vm5852_vm13, %v2524_v50, %v2528_v40  ;;  %v2369_v50 = vld [vmem:[#allocation2 + $0x60] sm:$0xf] }
  0xf5   : > { %5074 = vmatmul.msk.bf16.gmra.mxu2 %vm1312_vm12, %v1877_v8  ;;  %v1768_v8 = vrot.slane %v5537_v28, 5  ;;  %v5361_v28 = vld [vmem:[#allocation2 + $0x48] sm:$0xff]  ;;  %v1854_v9 = vunpack.c.l.b16 %v1773_v63  ;;  %v1780_v15 = vsel %vm6340_vm0, %v5061_v5, %v1779_v18 }
  0xf6   : > { %v2515_v36 = vsel %vm5852_vm13, %v2510_v29, %v2514_v33  ;;  %v2544_v29 = vshll.u32 %v2366_v17, 16  ;;  %v5362_v17 = vld [vmem:[#allocation2 + $0x54] sm:$0xff]  ;;  %v1856_v63 = vunpack.c.l.b16 %v1780_v15  ;;  %v2372_v15 = vld [vmem:[#allocation2 + $0x6c] sm:$0xf] }
  0xf7   : > { %v1769_v34 = vsel %vm6340_vm0, %v1767_v56, %v1768_v8  ;;  %v6458_v3 = vpop.f32.mrf.mxu2  ;;  %v1776_v56 = vsel %vm6340_vm0, %v1774_v30, %v1775_v58  ;;  %v2367_v8 = vld [vmem:[#allocation2 + $0x58] sm:$0xf] }
  0xf8   : > { %5171 = vmatmul.msk.bf16.gmra.mxu0 %vm1312_vm12, %v2816_v37  ;;  %v5360_v37 = vld [vmem:[#allocation2 + $0x3c] sm:$0xff]  ;;  %v1853_v47 = vunpack.c.l.b16 %v1769_v34  ;;  %v1855_v34 = vunpack.c.l.b16 %v1776_v56  ;;  %v6477_v43 = vpop.f32.mrf.mxu0  ;;  %v2546_v2 = vrot.slane %v2544_v29, 5 }
  0xfa   : > { %v1879_v21 = vpack.c.b16 %v1853_v47, %v1852_v35  ;;  %v2550_v35 = vshll.u32 %v2367_v8, 16  ;;  %v2554_v47 = vshrl.u32 %v2367_v8, 16  ;;  %v1880_v0 = vpack.c.b16 %v1855_v34, %v1854_v9 }
  0xfb   : > { %v6475_v33 = vpop.f32.mrf.mxu3  ;;  %v2547_v39 = vor.u32 %v2546_v2, %v2543_v62  ;;  %v2568_v8 = vshll.u32 %v2369_v50, 16 }
  0xfd   : > { %v2548_v61 = vrot.slane %v2547_v39, 4  ;;  %v2570_v2 = vrot.slane %v2568_v8, 5  ;;  %v5541_v39 = vld [vmem:[#allocation2 + $0x68] sm:$0x1] }
  0xff   : > { %5042 = vmatmul.msk.bf16.gmra.mxu1 %vm1312_vm12, %v5359_v25  ;;  %v2791_v25 = vunpack.c.l.b16 %v2515_v36  ;;  %v6469_v22 = vpop.f32.mrf.mxu2 }
 0x101   : > { %v2818_v7 = vpack.c.b16 %v2791_v25, %v2790_v52  ;;  %v2552_v52 = vrot.slane %v2550_v35, 5  ;;  %v2556_v25 = vrot.slane %v2554_v47, 4 }
 0x102   : > { %5155 = vmatmul.msk.bf16.gmra.mxu3 %vm1312_vm12, %v5374_v57  ;;  %v2532_v57 = vrot.slane %v2530_v49, 4  ;;  %v2368_v49 = vld [vmem:[#allocation2 + $0x5c] sm:$0x1] }
 0x103   : > { %v2560_v59 = vshll.u32 %v2368_v49, 16  ;;  %v2557_v45 = vor.u32 %v2556_v25, %v2552_v52  ;;  %v6492_v14 = vpop.f32.mrf.mxu3  ;;  %v2553_v12 = vsel %vm5852_vm13, %v2548_v61, %v2552_v52  ;;  %v5540_v49 = vld [vmem:[#allocation2 + $0x64] sm:$0xf]  ;;  %v2371_v25 = vld [vmem:[#allocation2 + $0x68] sm:$0x1] }
 0x104   : > { %v1786_v52 = vrot.slane %v5540_v49, 5 }
 0x105   : > { %5075 = vmatmul.msk.bf16.gmra.mxu2 %vm1312_vm12, %v1878_v60  ;;  %v2533_v60 = vor.u32 %v2532_v57, %v2528_v40  ;;  %v6466_v55 = vpop.f32.mrf.mxu1  ;;  %v2558_v4 = vrot.slane %v2557_v45, 4  ;;  %v2562_v30 = vrot.slane %v2560_v59, 5 }
 0x106   : > { %v1788_v61 = vrot.slane %v1786_v52, 4 }
 0x107   : > { %v2563_v29 = vsel %vm5852_vm13, %v2558_v4, %v2562_v30 }
 0x108   : > { %5172 = vmatmul.msk.bf16.gmra.mxu0 %vm1312_vm12, %v2817_v19  ;;  %v2534_v19 = vrot.slane %v2533_v60, 4  ;;  %v6494_v60 = vpop.f32.mrf.mxu0 }
 0x10a   : > { %v2539_v41 = vsel %vm5852_vm13, %v2534_v19, %v2538_v53  ;;  %v2370_v19 = vld [vmem:[#allocation2 + $0x64] sm:$0xf] }
 0x10b   : > { %v2793_v36 = vunpack.c.l.b16 %v2539_v41  ;;  %v2574_v34 = vshll.u32 %v2370_v19, 16  ;;  %v2795_v41 = vunpack.c.l.b16 %v2563_v29  ;;  %v2592_v29 = vshll.u32 %v2372_v15, 16 }
 0x10f   : > { %5043 = vmatmul.msk.bf16.gmra.mxu1 %vm1312_vm12, %v5360_v37  ;;  %v5376_v37 = vld [vmem:[#allocation2 + $0x48] sm:$0xff] }
 0x112   : > { %5156 = vmatmul.msk.bf16.gmra.mxu3 %vm1312_vm12, %v5375_v42  ;;  %v2792_v42 = vunpack.c.l.b16 %v2529_v38  ;;  %v2794_v38 = vunpack.c.l.b16 %v2553_v12 }
 0x114   : > { %v2819_v57 = vpack.c.b16 %v2793_v36, %v2792_v42  ;;  %v2576_v36 = vrot.slane %v2574_v34, 5  ;;  %v2820_v59 = vpack.c.b16 %v2795_v41, %v2794_v38 }
 0x115   : > { %5076 = vmatmul.msk.bf16.gmra.mxu2 %vm1312_vm12, %v1879_v21  ;;  %v6485_v21 = vpop.f32.mrf.mxu1  ;;  %v6488_v40 = vpop.f32.mrf.mxu2 }
 0x118   : > { %5173 = vmatmul.msk.bf16.gmra.mxu0 %vm1312_vm12, %v2818_v7  ;;  %v1781_v7 = vrot.slane %v1779_v18, 4  ;;  %v1685_v18 = vld [vmem:[#allocation2 + $0x60] sm:$0xe] }
 0x11a   : > { %v1783_v58 = vsel %vm6340_vm0, %v1781_v7, %v1782_v13  ;;  %v2584_v7 = vshll.u32 %v2371_v25, 16  ;;  %v5062_v13 = vrot.slane %v1685_v18, 9 }
 0x11b   : > { %v1857_v56 = vunpack.c.l.b16 %v1783_v58  ;;  %v6510_v35 = vpop.f32.mrf.mxu3  ;;  %v2373_v58 = vld [vmem:[#allocation2 + $0x70] sm:$0xf] }
 0x11c   : > { %v2598_v34 = vshll.u32 %v2373_v58, 16 }
 0x11d   : > { %v6507_v9 = vpop.f32.mrf.mxu2  ;;  %v1881_v47 = vpack.c.b16 %v1857_v56, %v1856_v63  ;;  %v5363_v56 = vld [vmem:[#allocation2 + $0x60] sm:$0xff] }
 0x11e   : > { %v2600_v25 = vrot.slane %v2598_v34, 5 }
 0x11f   : > { %5044 = vmatmul.msk.bf16.gmra.mxu1 %vm1312_vm12, %v5361_v28  ;;  %v2565_v28 = vshrl.u32 %v2369_v50, 16  ;;  %v6512_v42 = vpop.f32.mrf.mxu0 }
 0x121   : > { %v2567_v62 = vrot.slane %v2565_v28, 4 }
 0x122   : > { %5157 = vmatmul.msk.bf16.gmra.mxu3 %vm1312_vm12, %v5376_v37  ;;  %v2578_v37 = vshrl.u32 %v2370_v19, 16  ;;  %v1787_v19 = vsel %vm6340_vm0, %v5062_v13, %v1786_v52  ;;  %v2594_v52 = vrot.slane %v2592_v29, 5 }
 0x123   : > { %v2571_v45 = vor.u32 %v2570_v2, %v2567_v62  ;;  %v6525_v63 = vpop.f32.mrf.mxu3  ;;  %v1858_v38 = vunpack.c.l.b16 %v1787_v19 }
 0x125   : > { %5077 = vmatmul.msk.bf16.gmra.mxu2 %vm1312_vm12, %v1880_v0  ;;  %v2580_v0 = vrot.slane %v2578_v37, 4  ;;  %v2572_v30 = vrot.slane %v2571_v45, 4  ;;  %v2602_v37 = vshrl.u32 %v2373_v58, 16  ;;  %v2374_v45 = vld [vmem:[#allocation2 + $0x74] sm:$0x1] }
 0x127   : > { %v2581_v5 = vor.u32 %v2580_v0, %v2576_v36  ;;  %v6527_v28 = vpop.f32.mrf.mxu0  ;;  %v2577_v62 = vsel %vm5852_vm13, %v2572_v30, %v2576_v36  ;;  %v2604_v18 = vrot.slane %v2602_v37, 4  ;;  %v1686_v36 = vld [vmem:[#allocation2 + $0x6c] sm:$0xe]  ;;  %v2608_v30 = vshll.u32 %v2374_v45, 16 }
 0x128   : > { %5174 = vmatmul.msk.bf16.gmra.mxu0 %vm1312_vm12, %v2819_v57  ;;  %v1789_v57 = vrot.slane %v5541_v39, 5  ;;  %v2796_v39 = vunpack.c.l.b16 %v2577_v62 }
 0x129   : > { %v2582_v50 = vrot.slane %v2581_v5, 4  ;;  %v5542_v5 = vld [vmem:[#allocation2 + $0x70] sm:$0xf] }
 0x12a   : > { %v1790_v12 = vsel %vm6340_vm0, %v1788_v61, %v1789_v57  ;;  %v2605_v61 = vor.u32 %v2604_v18, %v2600_v25  ;;  %v2376_v18 = vld [vmem:[#allocation2 + $0x7c] sm:$0xf] }
 0x12b   : > { %v1859_v41 = vunpack.c.l.b16 %v1790_v12 }
 0x12c   : > { %v6503_v53 = vpop.f32.mrf.mxu1  ;;  %v2606_v37 = vrot.slane %v2605_v61, 4  ;;  %v2622_v61 = vshll.u32 %v2376_v18, 16 }
 0x12f   : > { %5045 = vmatmul.msk.bf16.gmra.mxu1 %vm1312_vm12, %v5362_v17  ;;  %v2586_v17 = vrot.slane %v2584_v7, 5  ;;  %v1793_v7 = vrot.slane %v5542_v5, 5 }
 0x131   : > { %v2587_v2 = vsel %vm5852_vm13, %v2582_v50, %v2586_v17  ;;  %v5543_v17 = vld [vmem:[#allocation2 + $0x74] sm:$0x1] }
 0x132   : > { %5158 = vmatmul.msk.bf16.gmra.mxu3 %vm1312_vm12, %v5377_v46  ;;  %v2589_v46 = vshrl.u32 %v2372_v15, 16  ;;  %v2797_v57 = vunpack.c.l.b16 %v2587_v2  ;;  %v1796_v19 = vrot.slane %v5543_v17, 5 }
 0x134   : > { %v6515_v44 = vpop.f32.mrf.mxu1  ;;  %v2591_v49 = vrot.slane %v2589_v46, 4  ;;  %v2821_v58 = vpack.c.b16 %v2797_v57, %v2796_v39  ;;  %v1795_v46 = vrot.slane %v1793_v7, 4 }
 0x135   : > { %5078 = vmatmul.msk.bf16.gmra.mxu2 %vm1312_vm12, %v1881_v47  ;;  %v5378_v47 = vld [vmem:[#allocation2 + $0x60] sm:$0xff] }
 0x136   : > { %v2595_v13 = vor.u32 %v2594_v52, %v2591_v49  ;;  %v1797_v2 = vsel %vm6340_vm0, %v1795_v46, %v1796_v19  ;;  %v2375_v49 = vld [vmem:[#allocation2 + $0x78] sm:$0xf]  ;;  %v5364_v52 = vld [vmem:[#allocation2 + $0x6c] sm:$0xff] }
 0x137   : > { %v1861_v45 = vunpack.c.l.b16 %v1797_v2  ;;  %v2613_v5 = vshrl.u32 %v2375_v49, 16 }
 0x138   : > { %v6518_v4 = vpop.f32.mrf.mxu2  ;;  %5175 = vmatmul.msk.bf16.gmra.mxu0 %vm1312_vm12, %v2820_v59  ;;  %v1882_v59 = vpack.c.b16 %v1859_v41, %v1858_v38  ;;  %v2596_v34 = vrot.slane %v2595_v13, 4  ;;  %v2610_v38 = vrot.slane %v2608_v30, 5  ;;  %v5379_v13 = vld [vmem:[#allocation2 + $0x6c] sm:$0xff]  ;;  %v2626_v30 = vshrl.u32 %v2376_v18, 16 }
 0x13a   : > { %v2601_v39 = vsel %vm5852_vm13, %v2596_v34, %v2600_v25 }
 0x13b   : > { %v2798_v25 = vunpack.c.l.b16 %v2601_v39 }
 0x13c   : > { %v1597_v8 = vpop.f32.mrf.mxu1 }
 0x13d   : > { %v1598_v29 = vadd.f32 %v1597_v8, %v6445_v32  ;;  %v2611_v32 = vsel %vm5852_vm13, %v2606_v37, %v2610_v38  ;;  %v2377_v37 = vld [vmem:[#allocation2 + $0x80] sm:$0x1]  ;;  %v2624_v38 = vrot.slane %v2622_v61, 5 }
 0x13e   : > { %v2799_v17 = vunpack.c.l.b16 %v2611_v32  ;;  %v2632_v32 = vshll.u32 %v2377_v37, 16 }
 0x13f   : > { %5046 = vmatmul.msk.bf16.gmra.mxu1 %vm1312_vm12, %v5363_v56  ;;  %v5063_v56 = vrot.slane %v1686_v36, 9  ;;  %v2616_v36 = vshll.u32 %v2375_v49, 16  ;;  %v1687_v49 = vld [vmem:[#allocation2 + $0x78] sm:$0xe] }
 0x140   : > { %v6534_v0 = vpop.f32.mrf.mxu2 }
 0x141   : > { %v1794_v62 = vsel %vm6340_vm0, %v5063_v56, %v1793_v7  ;;  %v2618_v34 = vrot.slane %v2616_v36, 5  ;;  %v5064_v36 = vrot.slane %v1687_v49, 9 }
 0x142   : > { %5159 = vmatmul.msk.bf16.gmra.mxu3 %vm1312_vm12, %v5378_v47 }
 0x144   : > { %v1599_v15 = vpop.f32.mrf.mxu1 }
 0x145   : > { %v6537_v50 = vpop.f32.mrf.mxu3  ;;  %5079 = vmatmul.msk.bf16.gmra.mxu2 %vm1312_vm12, %v1882_v59  ;;  %v6540_v12 = vpop.f32.mrf.mxu0  ;;  %v1860_v59 = vunpack.c.l.b16 %v1794_v62  ;;  %v5544_v62 = vld [vmem:[#allocation2 + $0x7c] sm:$0xf] }
 0x146   : > { %v1800_v2 = vrot.slane %v5544_v62, 5  ;;  %v2634_v62 = vrot.slane %v2632_v32, 5 }
 0x147   : > { %v1883_v46 = vpack.c.b16 %v1861_v45, %v1860_v59 }
 0x148   : > { %v1950_v41 = vpop.f32.mrf.mxu2  ;;  %5176 = vmatmul.msk.bf16.gmra.mxu0 %vm1312_vm12, %v2821_v58  ;;  %v1600_v58 = vadd.f32 %v1599_v15, %v6463_v1  ;;  %v2822_v15 = vpack.c.b16 %v2799_v17, %v2798_v25 }
 0x149   : > { %v2030_v47 = vadd.f32 %v1950_v41, %v1598_v29  ;;  %v2615_v29 = vrot.slane %v2613_v5, 4  ;;  %v2628_v41 = vrot.slane %v2626_v30, 4 }
 0x14b   : > { %v2619_v39 = vor.u32 %v2618_v34, %v2615_v29  ;;  %v2629_v5 = vor.u32 %v2628_v41, %v2624_v38  ;;  %v5365_v29 = vld [vmem:[#allocation2 + $0x78] sm:$0xff]  ;;  %v2379_v34 = vld [vmem:[#allocation2 + $0x88] sm:$0xf] }
 0x14c   : > { %v1602_v8 = vpop.f32.mrf.mxu1 }
 0x14d   : > { %v6552_v57 = vpop.f32.mrf.mxu3  ;;  %v6554_v7 = vpop.f32.mrf.mxu0  ;;  %v1603_v61 = vadd.f32 %v1602_v8, %v6477_v43  ;;  %v2630_v17 = vrot.slane %v2629_v5, 4  ;;  %v2650_v5 = vshrl.u32 %v2379_v34, 16 }
 0x14e   : > { %7420 = vst [vmem:[#allocation6_spill] sm:$0xff] %v6552_v57  ;;  %v5545_v57 = vld [vmem:[#allocation2 + $0x80] sm:$0x1] }
 0x14f   : > { %5047 = vmatmul.msk.bf16.gmra.mxu1 %vm1312_vm12, %v5364_v52  ;;  %v1803_v1 = vrot.slane %v5545_v57, 5  ;;  %v2620_v57 = vrot.slane %v2619_v39, 4 }
 0x150   : > { %v1952_v19 = vpop.f32.mrf.mxu2 }
 0x151   : > { %v2031_v56 = vadd.f32 %v1952_v19, %v1600_v58  ;;  %v2378_v58 = vld [vmem:[#allocation2 + $0x84] sm:$0xf]  ;;  %v2625_v49 = vsel %vm5852_vm13, %v2620_v57, %v2624_v38 }
 0x152   : > { %5160 = vmatmul.msk.bf16.gmra.mxu3 %vm1312_vm12, %v5379_v13  ;;  %v1802_v13 = vrot.slane %v1800_v2, 4  ;;  %v2637_v37 = vshrl.u32 %v2378_v58, 16  ;;  %v2640_v43 = vshll.u32 %v2378_v58, 16 }
 0x154   : > { %v1604_v18 = vpop.f32.mrf.mxu1 }
 0x155   : > { %v2236_v52 = vpop.f32.mrf.mxu3  ;;  %5080 = vmatmul.msk.bf16.gmra.mxu2 %vm1312_vm12, %v1883_v46  ;;  %v2890_v59 = vpop.f32.mrf.mxu0  ;;  %v1801_v46 = vsel %vm6340_vm0, %v5064_v36, %v1800_v2  ;;  %v2635_v2 = vsel %vm5852_vm13, %v2630_v17, %v2634_v62  ;;  %v1605_v36 = vadd.f32 %v1604_v18, %v6494_v60  ;;  %v2652_v17 = vrot.slane %v2650_v5, 4  ;;  %v5546_v62 = vld [vmem:[#allocation2 + $0x88] sm:$0xf]  ;;  %v1688_v60 = vld [vmem:[#allocation2 + $0x84] sm:$0xe] }
 0x156   : > { %v2316_v45 = vadd.f32 %v2236_v52, %v2030_v47  ;;  %v1804_v47 = vsel %vm6340_vm0, %v1802_v13, %v1803_v1  ;;  %v1862_v52 = vunpack.c.l.b16 %v1801_v46  ;;  %v2646_v1 = vshll.u32 %v2379_v34, 16 }
 0x157   : > { %v1863_v39 = vunpack.c.l.b16 %v1804_v47  ;;  %v2639_v13 = vrot.slane %v2637_v37, 4  ;;  %v2801_v58 = vunpack.c.l.b16 %v2635_v2  ;;  %v1807_v34 = vrot.slane %v5546_v62, 5 }
 0x158   : > { %v1955_v30 = vpop.f32.mrf.mxu2  ;;  %v6561_v19 = vadd.f32 %v2890_v59, %v2316_v45  ;;  %5177 = vmatmul.msk.bf16.gmra.mxu0 %vm1312_vm12, %v2822_v15  ;;  %v5380_v45 = vld [vmem:[#allocation2 + $0x78] sm:$0xff]  ;;  %v2648_v47 = vrot.slane %v2646_v1, 5 }
 0x159   : > { %v2032_v25 = vadd.f32 %v1955_v30, %v1603_v61  ;;  %v2642_v61 = vrot.slane %v2640_v43, 5  ;;  %v2800_v30 = vunpack.c.l.b16 %v2625_v49  ;;  %v1884_v57 = vpack.c.b16 %v1863_v39, %v1862_v52 }
 0x15a   : > { %v1809_v2 = vrot.slane %v1807_v34, 4 }
 0x15b   : > { %v2823_v43 = vpack.c.b16 %v2801_v58, %v2800_v30  ;;  %v2382_v30 = vld [vmem:[#allocation2 + $0x94] sm:$0xf] }
 0x15c   : > { %v1607_v8 = vpop.f32.mrf.mxu1 }
 0x15d   : > { %v2238_v41 = vpop.f32.mrf.mxu3  ;;  %v1608_v15 = vadd.f32 %v1607_v8, %v6512_v42  ;;  %v2892_v32 = vpop.f32.mrf.mxu0  ;;  %v2643_v8 = vor.u32 %v2642_v61, %v2639_v13  ;;  %v2381_v61 = vld [vmem:[#allocation2 + $0x90] sm:$0xf] }
 0x15e   : > { %v2317_v59 = vadd.f32 %v2238_v41, %v2031_v56  ;;  %v2380_v56 = vld [vmem:[#allocation2 + $0x8c] sm:$0x1]  ;;  %v2661_v62 = vshrl.u32 %v2381_v61, 16 }
 0x15f   : > { %5048 = vmatmul.msk.bf16.gmra.mxu1 %vm1312_vm12, %v5365_v29  ;;  %v5547_v29 = vld [vmem:[#allocation2 + $0x8c] sm:$0x1]  ;;  %v2656_v49 = vshll.u32 %v2380_v56, 16  ;;  %v2644_v1 = vrot.slane %v2643_v8, 4  ;;  %v5366_v56 = vld [vmem:[#allocation2 + $0x84] sm:$0xff]  ;;  %v2664_v8 = vshll.u32 %v2381_v61, 16 }
 0x160   : > { %v1957_v38 = vpop.f32.mrf.mxu2  ;;  %v6575_v46 = vadd.f32 %v2892_v32, %v2317_v59  ;;  %v1810_v37 = vrot.slane %v5547_v29, 5  ;;  %v2653_v59 = vor.u32 %v2652_v17, %v2648_v47 }
 0x161   : > { %v2033_v42 = vadd.f32 %v1957_v38, %v1605_v36  ;;  %v2658_v58 = vrot.slane %v2656_v49, 5 }
 0x162   : > { %5161 = vmatmul.msk.bf16.gmra.mxu3 %vm1312_vm12, %v5380_v45  ;;  %v5065_v45 = vrot.slane %v1688_v60, 9  ;;  %v2654_v38 = vrot.slane %v2653_v59, 4  ;;  %v2670_v60 = vshll.u32 %v2382_v30, 16  ;;  %v2663_v59 = vrot.slane %v2661_v62, 4 }
 0x164   : > { %v1609_v18 = vpop.f32.mrf.mxu1 }
 0x165   : > { %v2241_v41 = vpop.f32.mrf.mxu3  ;;  %5081 = vmatmul.msk.bf16.gmra.mxu2 %vm1312_vm12, %v1884_v57  ;;  %v1610_v52 = vadd.f32 %v1609_v18, %v6527_v28  ;;  %v2895_v39 = vpop.f32.mrf.mxu0  ;;  %v1808_v57 = vsel %vm6340_vm0, %v5065_v45, %v1807_v34  ;;  %v1811_v28 = vsel %vm6340_vm0, %v1809_v2, %v1810_v37  ;;  %v2674_v18 = vshrl.u32 %v2382_v30, 16  ;;  %v5381_v34 = vld [vmem:[#allocation2 + $0x84] sm:$0xff] }
 0x166   : > { %v2318_v32 = vadd.f32 %v2241_v41, %v2032_v25  ;;  %v2649_v25 = vsel %vm5852_vm13, %v2644_v1, %v2648_v47  ;;  %v1865_v41 = vunpack.c.l.b16 %v1811_v28  ;;  %v2659_v37 = vsel %vm5852_vm13, %v2654_v38, %v2658_v58 }
 0x167   : > { %v2666_v45 = vrot.slane %v2664_v8, 5  ;;  %v2672_v2 = vrot.slane %v2670_v60, 5  ;;  %v2676_v1 = vrot.slane %v2674_v18, 4 }
 0x168   : > { %v1960_v5 = vpop.f32.mrf.mxu2  ;;  %v6580_v36 = vadd.f32 %v2895_v39, %v2318_v32  ;;  %5178 = vmatmul.msk.bf16.gmra.mxu0 %vm1312_vm12, %v2823_v43  ;;  %v1864_v43 = vunpack.c.l.b16 %v1808_v57  ;;  %v2802_v32 = vunpack.c.l.b16 %v2649_v25 }
 0x169   : > { %v2034_v13 = vadd.f32 %v1960_v5, %v1608_v15  ;;  %v2803_v5 = vunpack.c.l.b16 %v2659_v37  ;;  %v2667_v38 = vor.u32 %v2666_v45, %v2663_v59  ;;  %v2677_v58 = vor.u32 %v2676_v1, %v2672_v2  ;;  %v2385_v45 = vld [vmem:[#allocation2 + $0xa0] sm:$0xf] }
 0x16a   : > { %7421 = vst [vmem:[#allocation7_spill] sm:$0xff] %v6580_v36  ;;  %v1885_v30 = vpack.c.b16 %v1865_v41, %v1864_v43 }
 0x16b   : > { %v2678_v37 = vrot.slane %v2677_v58, 4 }
 0x16c   : > { %v1612_v17 = vpop.f32.mrf.mxu1 }
 0x16d   : > { %v2243_v15 = vpop.f32.mrf.mxu3  ;;  %v1613_v29 = vadd.f32 %v1612_v17, %v6540_v12  ;;  %v2897_v49 = vpop.f32.mrf.mxu0  ;;  %v2383_v12 = vld [vmem:[#allocation2 + $0x98] sm:$0x1]  ;;  %v1689_v17 = vld [vmem:[#allocation2 + $0x90] sm:$0xe] }
 0x16e   : > { %v2319_v39 = vadd.f32 %v2243_v15, %v2033_v42  ;;  %v5548_v42 = vld [vmem:[#allocation2 + $0x94] sm:$0xf]  ;;  %v2680_v25 = vshll.u32 %v2383_v12, 16  ;;  %v2824_v15 = vpack.c.b16 %v2803_v5, %v2802_v32  ;;  %v5066_v41 = vrot.slane %v1689_v17, 9 }
 0x16f   : > { %5049 = vmatmul.msk.bf16.gmra.mxu1 %vm1312_vm12, %v5366_v56  ;;  %v1814_v28 = vrot.slane %v5548_v42, 5  ;;  %v5367_v12 = vld [vmem:[#allocation2 + $0x90] sm:$0xff]  ;;  %v2694_v42 = vshll.u32 %v2385_v45, 16  ;;  %v2698_v17 = vshrl.u32 %v2385_v45, 16 }
 0x170   : > { %v1962_v47 = vpop.f32.mrf.mxu2  ;;  %v6593_v57 = vadd.f32 %v2897_v49, %v2319_v39  ;;  %v2384_v39 = vld [vmem:[#allocation2 + $0x9c] sm:$0xf] }
 0x171   : > { %v2035_v61 = vadd.f32 %v1962_v47, %v1610_v52  ;;  %v5549_v52 = vld [vmem:[#allocation2 + $0x98] sm:$0x1]  ;;  %v1816_v49 = vrot.slane %v1814_v28, 4  ;;  %v2682_v47 = vrot.slane %v2680_v25, 5  ;;  %v2685_v5 = vshrl.u32 %v2384_v39, 16 }
 0x172   : > { %7422 = vst [vmem:[#allocation8_spill] sm:$0xff] %v6593_v57  ;;  %5162 = vmatmul.msk.bf16.gmra.mxu3 %vm1312_vm12, %v5381_v34  ;;  %v1817_v60 = vrot.slane %v5549_v52, 5  ;;  %v2668_v34 = vrot.slane %v2667_v38, 4 }
 0x173   : > { %v2683_v58 = vsel %vm5852_vm13, %v2678_v37, %v2682_v47 }
 0x174   : > { %v1614_v56 = vpop.f32.mrf.mxu1  ;;  %v2673_v38 = vsel %vm5852_vm13, %v2668_v34, %v2672_v2 }
 0x175   : > { %v2246_v62 = vpop.f32.mrf.mxu3  ;;  %5082 = vmatmul.msk.bf16.gmra.mxu2 %vm1312_vm12, %v1885_v30  ;;  %v1615_v8 = vadd.f32 %v1614_v56, %v6554_v7  ;;  %v2900_v18 = vpop.f32.mrf.mxu0  ;;  %v2688_v30 = vshll.u32 %v2384_v39, 16  ;;  %v1815_v7 = vsel %vm6340_vm0, %v5066_v41, %v1814_v28  ;;  %v2696_v41 = vrot.slane %v2694_v42, 5 }
 0x176   : > { %v2320_v43 = vadd.f32 %v2246_v62, %v2034_v13  ;;  %v1818_v13 = vsel %vm6340_vm0, %v1816_v49, %v1817_v60  ;;  %v2687_v62 = vrot.slane %v2685_v5, 4  ;;  %v2386_v60 = vld [vmem:[#allocation2 + $0xa4] sm:$0x1]  ;;  %v2700_v49 = vrot.slane %v2698_v17, 4 }
 0x177   : > { %v2690_v52 = vrot.slane %v2688_v30, 5  ;;  %v2804_v39 = vunpack.c.l.b16 %v2673_v38  ;;  %v2704_v5 = vshll.u32 %v2386_v60, 16  ;;  %v5550_v30 = vld [vmem:[#allocation2 + $0xa0] sm:$0xf] }
 0x178   : > { %v1965_v59 = vpop.f32.mrf.mxu2  ;;  %v6598_v1 = vadd.f32 %v2900_v18, %v2320_v43  ;;  %5179 = vmatmul.msk.bf16.gmra.mxu0 %vm1312_vm12, %v2824_v15  ;;  %v1867_v15 = vunpack.c.l.b16 %v1818_v13  ;;  %v5382_v43 = vld [vmem:[#allocation2 + $0x90] sm:$0xff]  ;;  %v1690_v13 = vld [vmem:[#allocation2 + $0x9c] sm:$0xe] }
 0x179   : > { %v2036_v32 = vadd.f32 %v1965_v59, %v1613_v29  ;;  %v1866_v29 = vunpack.c.l.b16 %v1815_v7  ;;  %v2805_v59 = vunpack.c.l.b16 %v2683_v58  ;;  %v2691_v37 = vor.u32 %v2690_v52, %v2687_v62  ;;  %v2387_v58 = vld [vmem:[#allocation2 + $0xa8] sm:$0xf] }
 0x17a   : > { %7423 = vst [vmem:[#allocation9_spill] sm:$0xff] %v6598_v1  ;;  %v1821_v7 = vrot.slane %v5550_v30, 5  ;;  %v2706_v62 = vrot.slane %v2704_v5, 5  ;;  %v5067_v52 = vrot.slane %v1690_v13, 9 }
 0x17b   : > { %v1886_v45 = vpack.c.b16 %v1867_v15, %v1866_v29  ;;  %v2825_v17 = vpack.c.b16 %v2805_v59, %v2804_v39  ;;  %v2712_v39 = vshll.u32 %v2387_v58, 16 }
 0x17c   : > { %v1617_v25 = vpop.f32.mrf.mxu1 }
 0x17d   : > { %v2248_v56 = vpop.f32.mrf.mxu3  ;;  %v2902_v18 = vpop.f32.mrf.mxu0 }
 0x17e   : > { %v2321_v28 = vadd.f32 %v2248_v56, %v2035_v61  ;;  %v2701_v61 = vor.u32 %v2700_v49, %v2696_v41  ;;  %v5551_v56 = vld [vmem:[#allocation2 + $0xa4] sm:$0x1] }
 0x17f   : > { %5050 = vmatmul.msk.bf16.gmra.mxu1 %vm1312_vm12, %v5367_v12  ;;  %v1824_v42 = vrot.slane %v5551_v56, 5  ;;  %v2709_v56 = vshrl.u32 %v2387_v58, 16 }
 0x180   : > { %v1967_v2 = vpop.f32.mrf.mxu2  ;;  %v6610_v47 = vadd.f32 %v2902_v18, %v2321_v28  ;;  %v1823_v18 = vrot.slane %v1821_v7, 4  ;;  %v5482_v28 = vld [vmem:[%s5746_s7 + $0x78] sm:$0xff]   ;;  %v2702_v60 = vrot.slane %v2701_v61, 4  ;;  %s5610_s7 = scalar_lea.hbm %s7407_s4, 256 }
 0x181   : > { %v2037_v34 = vadd.f32 %v1967_v2, %v1615_v8  ;;  %v2692_v8 = vrot.slane %v2691_v37, 4  ;;  %v5466_v49 = vunpack.c.l.bf16 %v5482_v28  ;;  %v5467_v2 = vunpack.c.h.bf16 %v5482_v28  ;;  %p5612_p1 = scmp.lt.s32.totalorder %s5610_s7, %s5606_s11 }
 0x182   : > { %7424 = vst [vmem:[#allocation10_spill] sm:$0xff] %v6610_v47  ;;  %5163 = vmatmul.msk.bf16.gmra.mxu3 %vm1312_vm12, %v5382_v43  ;;  %v1618_v43 = vadd.f32 %v1617_v25, %v6418_v26  ;;  %v2388_v47 = vld [vmem:[#allocation2 + $0xac] sm:$0xf]  ;;  %v1822_v26 = vsel %vm6340_vm0, %v5067_v52, %v1821_v7  ;;  %v1825_v25 = vsel %vm6340_vm0, %v1823_v18, %v1824_v42  ;;  %v2714_v28 = vrot.slane %v2712_v39, 5  ;;  %v5383_v18 = vld [vmem:[#allocation2 + $0x9c] sm:$0xff] }
 0x183   : > { %v2697_v61 = vsel %vm5852_vm13, %v2692_v8, %v2696_v41  ;;  %v2707_v13 = vsel %vm5852_vm13, %v2702_v60, %v2706_v62  ;;  %v1869_v7 = vunpack.c.l.b16 %v1825_v25  ;;  %v2389_v60 = vld [vmem:[#allocation2 + $0xb0] sm:$0x1]  ;;  %p5613_p2 = por %p5612_p1, %p5611_p0 }
 0x184   : > { %v1619_v12 = vpop.f32.mrf.mxu1  ;;  %v2807_v41 = vunpack.c.l.b16 %v2707_v13 }
 0x185   : > { %v2251_v38 = vpop.f32.mrf.mxu3  ;;  %5083 = vmatmul.msk.bf16.gmra.mxu2 %vm1312_vm12, %v1886_v45  ;;  %v2905_v29 = vpop.f32.mrf.mxu0  ;;  %v1620_v8 = vadd.f32 %v1619_v12, %v6427_v24  ;;  %p5614_p3 = pnand %p5613_p2, %p5609_p13 }
 0x186   : > { %v2322_v15 = vadd.f32 %v2251_v38, %v2036_v32  ;;  %v5552_v32 = vld [vmem:[%s7406_s3] ss:$0 sm:$0xff]  ;;  %v2718_v38 = vshll.u32 %v2388_v47, 16 }
 0x187   : > { %v295_v37 = vsub.f32 %v5466_v49, %v5552_v32  ;;  %v296_v5 = vsub.f32 %v5467_v2, %v5552_v32 }
 0x188   : > { %v1970_v30 = vpop.f32.mrf.mxu2  ;;  %v6616_v59 = vadd.f32 %v2905_v29, %v2322_v15  ;;  %5180 = vmatmul.msk.bf16.gmra.mxu0 %vm1312_vm12, %v2825_v17  ;;  %v5368_v17 = vld [vmem:[#allocation2 + $0x9c] sm:$0xff]  ;;  %v2711_v15 = vrot.slane %v2709_v56, 4  ;;  %v6632_v56 = vrot.slane %v2718_v38, 5 }
 0x189   : > { %v2038_v45 = vadd.f32 %v1970_v30, %v1618_v43  ;;  %v327_v58 = vpack.c.bf16 %v295_v37, %v295_v37  ;;  %v2722_v43 = vshrl.u32 %v2388_v47, 16  ;;  %v328_v49 = vpack.c.bf16 %v296_v5, %v296_v5 }
 0x18a   : > { %7425 = vst [vmem:[#allocation11_spill] sm:$0xff] %v6616_v59  ;;  %v1868_v30 = vunpack.c.l.b16 %v1822_v26  ;;  %v2806_v59 = vunpack.c.l.b16 %v2697_v61  ;;  %v2715_v37 = vor.u32 %v2714_v28, %v2711_v15  ;;  %v5553_v61 = vld [vmem:[#allocation2 + $0xac] sm:$0xf]  ;;  %v819_v28 = vld [vmem:[#allocation2 + $0xc0] sm:$0xf] }
 0x18b   : > { %v644_v52 = vshrl.u32 %v327_v58, 16  ;;  %v2724_v47 = vrot.slane %v2722_v43, 4  ;;  %v652_v39 = vshrl.u32 %v328_v49, 16  ;;  %v647_v1 = vshll.u32 %v327_v58, 16  ;;  %v5554_v43 = vld [vmem:[#allocation2 + $0xb0] sm:$0x1] }
 0x18c   : > { %v1622_v29 = vpop.f32.mrf.mxu1  ;;  %v1887_v26 = vpack.c.b16 %v1869_v7, %v1868_v30  ;;  %v1828_v13 = vrot.slane %v5553_v61, 5  ;;  %v655_v38 = vshll.u32 %v328_v49, 16  ;;  %v1831_v36 = vrot.slane %v5554_v43, 5  ;;  %v823_v61 = vld [vmem:[#allocation2 + $0xc8] sm:$0x1] }
 0x18d   : > { %v2253_v2 = vpop.f32.mrf.mxu3  ;;  %v2907_v32 = vpop.f32.mrf.mxu0  ;;  %v646_v25 = vrot.slane %v644_v52, 7  ;;  %v2725_v12 = vor.u32 %v2724_v47, %v6632_v56  ;;  %v654_v15 = vrot.slane %v652_v39, 7  ;;  %v2716_v58 = vrot.slane %v2715_v37, 4 }
 0x18e   : > { %v2323_v42 = vadd.f32 %v2253_v2, %v2037_v34  ;;  %v1691_v34 = vld [vmem:[#allocation2 + $0xa8] sm:$0xe]  ;;  %v2728_v2 = vshll.u32 %v2389_v60, 16  ;;  %v1623_v47 = vadd.f32 %v1622_v29, %v6437_v11  ;;  %v2390_v29 = vld [vmem:[#allocation2 + $0xb4] sm:$0xf] }
 0x18f   : > { %5051 = vmatmul.msk.bf16.gmra.mxu1 %vm1312_vm12, %v5368_v17  ;;  %v649_v24 = vor.u32 %v647_v1, %v646_v25  ;;  %v650_v57 = vrot.slane %v646_v25, 4  ;;  %v5068_v7 = vrot.slane %v1691_v34, 9  ;;  %v657_v60 = vor.u32 %v655_v38, %v654_v15  ;;  %v2391_v34 = vld [vmem:[#allocation2 + $0xb8] sm:$0xf] }
 0x190   : > { %v1972_v62 = vpop.f32.mrf.mxu2  ;;  %v659_v1 = vrot.slane %v654_v15, 4  ;;  %v2730_v25 = vrot.slane %v2728_v2, 5  ;;  %v6640_v39 = vadd.f32 %v2907_v32, %v2323_v42  ;;  %v2721_v20 = vsel %vm5852_vm13, %v2716_v58, %v6632_v56 }
 0x191   : > { %v2039_v5 = vadd.f32 %v1972_v62, %v1620_v8  ;;  %v2826_v8 = vpack.c.b16 %v2807_v41, %v2806_v59  ;;  %v1830_v62 = vrot.slane %v1828_v13, 4  ;;  %v820_v49 = vsel %vm5792_vm9, %v649_v24, %v819_v28 }
 0x192   : > { %5164 = vmatmul.msk.bf16.gmra.mxu3 %vm1312_vm12, %v5383_v18  ;;  %v2726_v59 = vrot.slane %v2725_v12, 4  ;;  %v658_v37 = vsel %vm5783_vm8, %v650_v57, %v657_v60  ;;  %821 = vst [vmem:[#allocation2 + $0xc0] sm:$0xf] %v820_v49  ;;  %v1829_v27 = vsel %vm6340_vm0, %v5068_v7, %v1828_v13  ;;  %v5369_v57 = vld [vmem:[#allocation2 + $0xa8] sm:$0xff]  ;;  %v2733_v42 = vshrl.u32 %v2390_v29, 16 }
 0x193   : > { %822 = vst.msk [vmem:[#allocation2 + $0xc4] sm:$0xf] %vm329_vm2, %v658_v37  ;;  %v1832_v23 = vsel %vm6340_vm0, %v1830_v62, %v1831_v36  ;;  %v2736_v2 = vshll.u32 %v2390_v29, 16  ;;  %v2742_v24 = vshll.u32 %v2391_v34, 16  ;;  %v1870_v38 = vunpack.c.l.b16 %v1829_v27  ;;  %v5384_v36 = vld [vmem:[#allocation2 + $0xa8] sm:$0xff] }
 0x194   : > { %v1624_v17 = vpop.f32.mrf.mxu1  ;;  %v2731_v15 = vsel %vm5852_vm13, %v2726_v59, %v2730_v25  ;;  %v1871_v28 = vunpack.c.l.b16 %v1832_v23  ;;  %v2746_v13 = vshrl.u32 %v2391_v34, 16  ;;  %v2392_v25 = vld [vmem:[#allocation2 + $0xbc] sm:$0x1]  ;;  %v1692_v59 = vld [vmem:[#allocation2 + $0xb4] sm:$0xe] }
 0x195   : > { %v2256_v30 = vpop.f32.mrf.mxu3  ;;  %5084 = vmatmul.msk.bf16.gmra.mxu2 %vm1312_vm12, %v1887_v26  ;;  %v2910_v52 = vpop.f32.mrf.mxu0  ;;  %v1625_v7 = vadd.f32 %v1624_v17, %v6455_v6  ;;  %v2809_v56 = vunpack.c.l.b16 %v2731_v15  ;;  %v2744_v62 = vrot.slane %v2742_v24, 5  ;;  %v2752_v29 = vshll.u32 %v2392_v25, 16  ;;  %v5556_v34 = vld [vmem:[#allocation2 + $0xbc] sm:$0x1]  ;;  %v5557_v24 = vld [vmem:[#allocation2 + $0x10] sm:$0xf] }
 0x196   : > { %v2324_v18 = vadd.f32 %v2256_v30, %v2038_v45  ;;  %v824_v45 = vsel %vm5776_vm7, %v659_v1, %v823_v61  ;;  %v2808_v30 = vunpack.c.l.b16 %v2721_v20  ;;  %v1888_v1 = vpack.c.b16 %v1871_v28, %v1870_v38 }
 0x197   : > { %825 = vst [vmem:[#allocation2 + $0xc8] sm:$0x1] %v824_v45  ;;  %v2748_v61 = vrot.slane %v2746_v13, 4  ;;  %v1838_v27 = vrot.slane %v5556_v34, 5  ;;  %v5069_v20 = vrot.slane %v1692_v59, 9 }
 0x198   : > { %v1975_v41 = vpop.f32.mrf.mxu2  ;;  %v6646_v26 = vadd.f32 %v2910_v52, %v2324_v18  ;;  %5181 = vmatmul.msk.bf16.gmra.mxu0 %vm1312_vm12, %v2826_v8  ;;  %v2735_v52 = vrot.slane %v2733_v42, 4  ;;  %v2738_v18 = vrot.slane %v2736_v2, 5  ;;  %v2827_v17 = vpack.c.b16 %v2809_v56, %v2808_v30  ;;  %v5558_v59 = vld [vmem:[#allocation2 + $0x14] sm:$0x1] }
 0x199   : > { %v2040_v11 = vadd.f32 %v1975_v41, %v1623_v47  ;;  %v2749_v45 = vor.u32 %v2748_v61, %v2744_v62 }
 0x19a   : > { %v2739_v41 = vor.u32 %v2738_v18, %v2735_v52 }
 0x19b   : > { %v2750_v13 = vrot.slane %v2749_v45, 4 }
 0x19c   : > { %v1627_v32 = vpop.f32.mrf.mxu1  ;;  %v2740_v15 = vrot.slane %v2739_v41, 4 }
 0x19d   : > { %v2258_v12 = vpop.f32.mrf.mxu3  ;;  %v2912_v43 = vpop.f32.mrf.mxu0  ;;  %v1628_v2 = vadd.f32 %v1627_v32, %v6466_v55  ;;  %v2394_v55 = vld [vmem:[#allocation2 + $0xc4] sm:$0xf] }
 0x19e   : > { %v2325_v8 = vadd.f32 %v2258_v12, %v2039_v5  ;;  %v5555_v5 = vld [vmem:[#allocation2 + $0xb8] sm:$0xf]  ;;  %v3068_v12 = vrot.slane %v5557_v24, 5  ;;  %v2745_v56 = vsel %vm5852_vm13, %v2740_v15, %v2744_v62  ;;  %v2766_v45 = vshll.u32 %v2394_v55, 16  ;;  %v3002_v62 = vld [vmem:[#allocation2 + $0xc] sm:$0xe] }
 0x19f   : > { %5052 = vmatmul.msk.bf16.gmra.mxu1 %vm1312_vm12, %v5369_v57  ;;  %v1835_v49 = vrot.slane %v5555_v5, 5 }
 0x1a0   : > { %v1977_v58 = vpop.f32.mrf.mxu2  ;;  %v6661_v47 = vadd.f32 %v2912_v43, %v2325_v8  ;;  %v2754_v43 = vrot.slane %v2752_v29, 5  ;;  %v3070_v32 = vrot.slane %v3068_v12, 4  ;;  %v2770_v29 = vshrl.u32 %v2394_v55, 16  ;;  %v6686_v55 = vld [vmem:[#allocation2 + $0x1c] sm:$0xf] }
 0x1a1   : > { %v2041_v60 = vadd.f32 %v1977_v58, %v1625_v7  ;;  %v1837_v42 = vrot.slane %v1835_v49, 4  ;;  %v1836_v30 = vsel %vm6340_vm0, %v5069_v20, %v1835_v49  ;;  %v5370_v7 = vld [vmem:[#allocation2 + $0xb4] sm:$0xff]  ;;  %v3071_v49 = vrot.slane %v5558_v59, 5 }
 0x1a2   : > { %5165 = vmatmul.msk.bf16.gmra.mxu3 %vm1312_vm12, %v5384_v36  ;;  %v2393_v36 = vld [vmem:[#allocation2 + $0xc0] sm:$0xf]  ;;  %v1872_v61 = vunpack.c.l.b16 %v1836_v30 }
 0x1a3   : > { %v2757_v52 = vshrl.u32 %v2393_v36, 16  ;;  %v2760_v5 = vshll.u32 %v2393_v36, 16 }
 0x1a4   : > { %v1629_v6 = vpop.f32.mrf.mxu1 }
 0x1a5   : > { %v2261_v37 = vpop.f32.mrf.mxu3  ;;  %5085 = vmatmul.msk.bf16.gmra.mxu2 %vm1312_vm12, %v1888_v1  ;;  %v2915_v23 = vpop.f32.mrf.mxu0  ;;  %v2755_v1 = vsel %vm5852_vm13, %v2750_v13, %v2754_v43  ;;  %v1630_v34 = vadd.f32 %v1629_v6, %v6485_v21  ;;  %v2759_v20 = vrot.slane %v2757_v52, 4  ;;  %v2762_v15 = vrot.slane %v2760_v5, 5 }
 0x1a6   : > { %v2326_v57 = vadd.f32 %v2261_v37, %v2040_v11  ;;  %v1839_v11 = vsel %vm6340_vm0, %v1837_v42, %v1838_v27  ;;  %v5385_v37 = vld [vmem:[#allocation2 + $0xb4] sm:$0xff]  ;;  %v2810_v27 = vunpack.c.l.b16 %v2745_v56  ;;  %v5185_v42 = vrot.slane %v3002_v62, 9 }
 0x1a7   : > { %v1873_v25 = vunpack.c.l.b16 %v1839_v11  ;;  %v2768_v13 = vrot.slane %v2766_v45, 5  ;;  %v2772_v43 = vrot.slane %v2770_v29, 4  ;;  %v3072_v6 = vsel %vm6340_vm0, %v3070_v32, %v3071_v49  ;;  %v3687_v11 = vld [vmem:[#allocation2 + $0x18] sm:$0xf] }
 0x1a8   : > { %v1980_v38 = vpop.f32.mrf.mxu2  ;;  %v6666_v28 = vadd.f32 %v2915_v23, %v2326_v57  ;;  %5182 = vmatmul.msk.bf16.gmra.mxu0 %vm1312_vm12, %v2827_v17  ;;  %v2811_v23 = vunpack.c.l.b16 %v2755_v1  ;;  %v3069_v21 = vsel %vm6340_vm0, %v5185_v42, %v3068_v12  ;;  %v3181_v30 = vunpack.c.l.b16 %v3072_v6 }
 0x1a9   : > { %v2042_v8 = vadd.f32 %v1980_v38, %v1628_v2  ;;  %v1889_v24 = vpack.c.b16 %v1873_v25, %v1872_v61  ;;  %v3180_v36 = vunpack.c.l.b16 %v3069_v21  ;;  %v2773_v59 = vor.u32 %v2772_v43, %v2768_v13  ;;  %v5386_v43 = vld [vmem:[#allocation2 + $0xc0] sm:$0xff] }
 0x1aa   : > { %v2828_v56 = vpack.c.b16 %v2811_v23, %v2810_v27  ;;  %v3736_v12 = vshrl.u32 %v3687_v11, 16  ;;  %v3745_v49 = vshll.u32 %v6686_v55, 16 }
 0x1ab   : > { %v3212_v61 = vpack.c.b16 %v3181_v30, %v3180_v36  ;;  %v2774_v62 = vrot.slane %v2773_v59, 4  ;;  %v5559_v36 = vld [vmem:[#allocation2 + $0x1c] sm:$0xf] }
 0x1ac   : > { %v1632_v58 = vpop.f32.mrf.mxu1  ;;  %v3738_v23 = vrot.slane %v3736_v12, 4  ;;  %v3075_v30 = vrot.slane %v5559_v36, 5 }
 0x1ad   : > { %v2263_v18 = vpop.f32.mrf.mxu3  ;;  %v2917_v41 = vpop.f32.mrf.mxu0  ;;  %v1633_v32 = vadd.f32 %v1632_v58, %v6503_v53  ;;  %v6697_v53 = vld [vmem:[#allocation2 + $0x20] sm:$0x1] }
 0x1ae   : > { %v2327_v17 = vadd.f32 %v2263_v18, %v2041_v60  ;;  %v2395_v60 = vld [vmem:[#allocation2 + $0xc8] sm:$0x1]  ;;  %v2763_v18 = vor.u32 %v2762_v15, %v2759_v20 }
 0x1af   : > { %5053 = vmatmul.msk.bf16.gmra.mxu1 %vm1312_vm12, %v5370_v7  ;;  %v2776_v1 = vshll.u32 %v2395_v60, 16 }
 0x1b0   : > { %v1982_v57 = vpop.f32.mrf.mxu2  ;;  %v6679_v38 = vadd.f32 %v2917_v41, %v2327_v17  ;;  %v3739_v41 = vshll.u32 %v3687_v11, 16  ;;  %v3749_v17 = vshrl.u32 %v6686_v55, 16  ;;  %v2764_v29 = vrot.slane %v2763_v18, 4  ;;  %v3003_v18 = vld [vmem:[#allocation2 + $0x18] sm:$0xe] }
 0x1b1   : > { %v2043_v2 = vadd.f32 %v1982_v57, %v1630_v34  ;;  %v2778_v27 = vrot.slane %v2776_v1, 5  ;;  %v6695_v57 = vrot.slane %v3745_v49, 5  ;;  %v5560_v1 = vld [vmem:[#allocation2 + $0x20] sm:$0x1]  ;;  %v3690_v49 = vld [vmem:[#allocation2 + $0x24] sm:$0xf] }
 0x1b2   : > { %5166 = vmatmul.msk.bf16.gmra.mxu3 %vm1312_vm12, %v5385_v37  ;;  %v3751_v20 = vrot.slane %v3749_v17, 4 }
 0x1b3   : > { %v2779_v21 = vsel %vm5852_vm13, %v2774_v62, %v2778_v27  ;;  %v4407_v62 = vrot.slane %v6686_v55, 5 }
 0x1b4   : > { %v1634_v7 = vpop.f32.mrf.mxu1  ;;  %v2813_v12 = vunpack.c.l.b16 %v2779_v21 }
 0x1b5   : > { %v2266_v52 = vpop.f32.mrf.mxu3  ;;  %5086 = vmatmul.msk.bf16.gmra.mxu2 %vm1312_vm12, %v1889_v24  ;;  %v2920_v25 = vpop.f32.mrf.mxu0  ;;  %v2769_v24 = vsel %vm5852_vm13, %v2764_v29, %v2768_v13  ;;  %v1635_v11 = vadd.f32 %v1634_v7, %v6515_v44  ;;  %v3078_v13 = vrot.slane %v5560_v1, 5  ;;  %v6710_v7 = vld [vmem:[#allocation2 + $0x28] sm:$0xf]  ;;  %v4341_v29 = vld [vmem:[#allocation2 + $0x18] sm:$0xe] }
 0x1b6   : > { %v2328_v5 = vadd.f32 %v2266_v52, %v2042_v8  ;;  %v3741_v8 = vrot.slane %v3739_v41, 5  ;;  %v3755_v52 = vshll.u32 %v6697_v53, 16  ;;  %v2812_v59 = vunpack.c.l.b16 %v2769_v24 }
 0x1b7   : > { %v5316_v36 = vrot.slane %v4341_v29, 9 }
 0x1b8   : > { %v1985_v37 = vpop.f32.mrf.mxu2  ;;  %v6692_v45 = vadd.f32 %v2920_v25, %v2328_v5  ;;  %5183 = vmatmul.msk.bf16.gmra.mxu0 %vm1312_vm12, %v2828_v56  ;;  %v3742_v6 = vor.u32 %v3741_v8, %v3738_v23  ;;  %v3752_v56 = vor.u32 %v3751_v20, %v6695_v57  ;;  %v3077_v5 = vrot.slane %v3075_v30, 4 }
 0x1b9   : > { %v2044_v34 = vadd.f32 %v1985_v37, %v1633_v32  ;;  %v5387_v32 = vld [vmem:[#allocation2 + $0x18] sm:$0xff]  ;;  %v3757_v37 = vrot.slane %v3755_v52, 5  ;;  %v3760_v20 = vshrl.u32 %v3690_v49, 16  ;;  %v2829_v24 = vpack.c.b16 %v2813_v12, %v2812_v59 }
 0x1ba   : > { %v3743_v44 = vrot.slane %v3742_v6, 4  ;;  %v3079_v8 = vsel %vm6340_vm0, %v3077_v5, %v3078_v13 }
 0x1bb   : > { %v3183_v52 = vunpack.c.l.b16 %v3079_v8  ;;  %v3762_v13 = vrot.slane %v3760_v20, 4 }
 0x1bc   : > { %v1637_v42 = vpop.f32.mrf.mxu1  ;;  %v3748_v55 = vsel %vm5852_vm13, %v3743_v44, %v6695_v57 }
 0x1bd   : > { %v2268_v58 = vpop.f32.mrf.mxu3  ;;  %v2922_v15 = vpop.f32.mrf.mxu0  ;;  %v4121_v12 = vunpack.c.l.b16 %v3748_v55 }
 0x1be   : > { %v2329_v60 = vadd.f32 %v2268_v58, %v2043_v2  ;;  %v5186_v2 = vrot.slane %v3003_v18, 9  ;;  %v3763_v58 = vshll.u32 %v3690_v49, 16  ;;  %v4409_v18 = vrot.slane %v4407_v62, 4 }
 0x1bf   : > { %5202 = vmatmul.msk.bf16.vlgmr.msra.gmra.mxu1 %vm1312_vm12, %v3212_v61  ;;  %v3753_v61 = vrot.slane %v3752_v56, 4  ;;  %v4408_v49 = vsel %vm6340_vm0, %v5316_v36, %v4407_v62  ;;  %v3004_v62 = vld [vmem:[#allocation2 + $0x24] sm:$0xe] }
 0x1c0   : > { %v1987_v25 = vpop.f32.mrf.mxu2  ;;  %v6707_v17 = vadd.f32 %v2922_v15, %v2329_v60  ;;  %v3076_v23 = vsel %vm6340_vm0, %v5186_v2, %v3075_v30  ;;  %v3769_v60 = vshll.u32 %v6710_v7, 16  ;;  %v1638_v30 = vadd.f32 %v1637_v42, %v6429_v48  ;;  %v6730_v42 = vld [vmem:[#allocation2 + $0x2c] sm:$0x1] }
 0x1c1   : > { %v2045_v41 = vadd.f32 %v1987_v25, %v1635_v11  ;;  %v3758_v11 = vsel %vm5852_vm13, %v3753_v61, %v3757_v37  ;;  %v3182_v56 = vunpack.c.l.b16 %v3076_v23  ;;  %v3765_v25 = vrot.slane %v3763_v58, 5 }
 0x1c2   : > { %5167 = vmatmul.msk.bf16.gmra.mxu3 %vm1312_vm12, %v5386_v43  ;;  %v3773_v43 = vshrl.u32 %v6710_v7, 16  ;;  %v3771_v57 = vrot.slane %v3769_v60, 5  ;;  %v4122_v48 = vunpack.c.l.b16 %v3758_v11  ;;  %v5562_v60 = vld [vmem:[#allocation2 + $0x2c] sm:$0x1]  ;;  %v5187_v11 = vrot.slane %v3004_v62, 9 }
 0x1c3   : > { %v3766_v61 = vor.u32 %v3765_v25, %v3762_v13  ;;  %v3693_v25 = vld [vmem:[#allocation2 + $0x30] sm:$0xf] }
 0x1c4   : > { %v1639_v27 = vpop.f32.mrf.mxu1  ;;  %v3775_v59 = vrot.slane %v3773_v43, 4  ;;  %v4153_v58 = vpack.c.b16 %v4122_v48, %v4121_v12  ;;  %v3085_v43 = vrot.slane %v5562_v60, 5 }
 0x1c5   : > { %v2271_v15 = vpop.f32.mrf.mxu3  ;;  %5283 = vmatmul.msk.bf16.vlgmr.msra.gmra.mxu2 %vm1312_vm12, %v5387_v32  ;;  %v2925_v21 = vpop.f32.mrf.mxu0  ;;  %v3213_v32 = vpack.c.b16 %v3183_v52, %v3182_v56 }
 0x1c6   : > { %v2330_v6 = vadd.f32 %v2271_v15, %v2044_v34  ;;  %v4410_v34 = vrot.slane %v6697_v53, 5  ;;  %v3776_v23 = vor.u32 %v3775_v59, %v3771_v57  ;;  %v3779_v53 = vshll.u32 %v6730_v42, 16 }
 0x1c8   : > { %v1990_v1 = vpop.f32.mrf.mxu2  ;;  %v6726_v2 = vadd.f32 %v2925_v21, %v2330_v6  ;;  %5184 = vmatmul.msk.bf16.gmra.mxu0 %vm1312_vm12, %v2829_v24  ;;  %v4411_v29 = vsel %vm6340_vm0, %v4409_v18, %v4410_v34  ;;  %v5561_v24 = vld [vmem:[#allocation2 + $0x28] sm:$0xf]  ;;  %v4519_v21 = vunpack.c.l.b16 %v4408_v49  ;;  %v1640_v6 = vadd.f32 %v1639_v27, %v6440_v16  ;;  %v6742_v34 = vld [vmem:[#allocation2 + $0x34] sm:$0xf] }
 0x1c9   : > { %v2046_v5 = vadd.f32 %v1990_v1, %v1638_v30  ;;  %v3082_v15 = vrot.slane %v5561_v24, 5  ;;  %v4520_v55 = vunpack.c.l.b16 %v4411_v29  ;;  %v3767_v30 = vrot.slane %v3766_v61, 4  ;;  %v5388_v18 = vld [vmem:[#allocation2 + $0x24] sm:$0xff] }
 0x1ca   : > { %v3777_v1 = vrot.slane %v3776_v23, 4  ;;  %v4414_v61 = vrot.slane %v6710_v7, 5  ;;  %v4342_v23 = vld [vmem:[#allocation2 + $0x24] sm:$0xe]  ;;  %v3797_v60 = vshrl.u32 %v6742_v34, 16 }
 0x1cb   : > { %v3084_v56 = vrot.slane %v3082_v15, 4  ;;  %v3083_v27 = vsel %vm6340_vm0, %v5187_v11, %v3082_v15  ;;  %v4551_v12 = vpack.c.b16 %v4520_v55, %v4519_v21  ;;  %v4417_v55 = vrot.slane %v6730_v42, 5 }
 0x1cc   : > { %v1642_v44 = vpop.f32.mrf.mxu1  ;;  %v3184_v24 = vunpack.c.l.b16 %v3083_v27  ;;  %v4416_v62 = vrot.slane %v4414_v61, 4 }
 0x1cd   : > { %v2273_v37 = vpop.f32.mrf.mxu3  ;;  %v2927_v8 = vpop.f32.mrf.mxu0  ;;  %v3086_v59 = vsel %vm6340_vm0, %v3084_v56, %v3085_v43 }
 0x1ce   : > { %v2331_v20 = vadd.f32 %v2273_v37, %v2045_v41  ;;  %v3781_v41 = vrot.slane %v3779_v53, 5  ;;  %v3784_v53 = vshrl.u32 %v3693_v25, 16  ;;  %v3185_v15 = vunpack.c.l.b16 %v3086_v59 }
 0x1cf   : > { %5203 = vmatmul.msk.bf16.gmra.mxu1 %vm1312_vm12, %v3213_v32  ;;  %v3772_v32 = vsel %vm5852_vm13, %v3767_v30, %v3771_v57 }
 0x1d0   : > { %v1992_v36 = vpop.f32.mrf.mxu2  ;;  %v6739_v13 = vadd.f32 %v2927_v8, %v2331_v20  ;;  %v3782_v49 = vsel %vm5852_vm13, %v3777_v1, %v3781_v41  ;;  %v3787_v8 = vshll.u32 %v3693_v25, 16  ;;  %v3793_v20 = vshll.u32 %v6742_v34, 16 }
 0x1d1   : > { %v2047_v52 = vadd.f32 %v1992_v36, %v1640_v6  ;;  %v4123_v21 = vunpack.c.l.b16 %v3772_v32  ;;  %v4124_v7 = vunpack.c.l.b16 %v3782_v49  ;;  %v5317_v6 = vrot.slane %v4342_v23, 9  ;;  %v3005_v23 = vld [vmem:[#allocation2 + $0x30] sm:$0xe] }
 0x1d2   : > { %5300 = vmatmul.msk.bf16.vlgmr.msra.gmra.mxu3 %vm1312_vm12, %v4153_v58  ;;  %v1643_v58 = vadd.f32 %v1642_v44, %v6458_v3  ;;  %v3786_v36 = vrot.slane %v3784_v53, 4  ;;  %v3789_v30 = vrot.slane %v3787_v8, 5  ;;  %v3214_v11 = vpack.c.b16 %v3185_v15, %v3184_v24  ;;  %v5564_v53 = vld [vmem:[#allocation2 + $0x38] sm:$0x1] }
 0x1d3   : > { %v6761_v3 = vrot.slane %v3793_v20, 5  ;;  %v3799_v44 = vrot.slane %v3797_v60, 4  ;;  %v4154_v41 = vpack.c.b16 %v4124_v7, %v4123_v21  ;;  %v4415_v25 = vsel %vm6340_vm0, %v5317_v6, %v4414_v61  ;;  %v5389_v60 = vld [vmem:[#allocation2 + $0x30] sm:$0xff] }
 0x1d4   : > { %v1644_v16 = vpop.f32.mrf.mxu1  ;;  %v3790_v42 = vor.u32 %v3789_v30, %v3786_v36  ;;  %v3092_v8 = vrot.slane %v5564_v53, 5  ;;  %v5188_v20 = vrot.slane %v3005_v23, 9 }
 0x1d5   : > { %v2276_v48 = vpop.f32.mrf.mxu3  ;;  %5284 = vmatmul.msk.bf16.gmra.mxu2 %vm1312_vm12, %v5388_v18  ;;  %v2930_v37 = vpop.f32.mrf.mxu0  ;;  %v6763_v18 = vld [vmem:[#allocation2 + $0x38] sm:$0x1]  ;;  %v1645_v49 = vadd.f32 %v1644_v16, %v6469_v22  ;;  %v6776_v16 = vld [vmem:[#allocation2 + $0x40] sm:$0xf] }
 0x1d6   : > { %v2332_v29 = vadd.f32 %v2276_v48, %v2046_v5  ;;  %v5563_v48 = vld [vmem:[#allocation2 + $0x34] sm:$0xf]  ;;  %v3791_v22 = vrot.slane %v3790_v42, 4 }
 0x1d7   : > { %v3089_v32 = vrot.slane %v5563_v48, 5 }
 0x1d8   : > { %v1995_v43 = vpop.f32.mrf.mxu2  ;;  %v6757_v57 = vadd.f32 %v2930_v37, %v2332_v29  ;;  %5333 = vmatmul.msk.bf16.vlgmr.msra.gmra.mxu0 %vm1312_vm12, %v4551_v12  ;;  %v4418_v12 = vsel %vm6340_vm0, %v4416_v62, %v4417_v55  ;;  %v3800_v37 = vor.u32 %v3799_v44, %v6761_v3  ;;  %v3803_v29 = vshll.u32 %v6763_v18, 16  ;;  %v4343_v62 = vld [vmem:[#allocation2 + $0x30] sm:$0xe] }
 0x1d9   : > { %v2048_v5 = vadd.f32 %v1995_v43, %v1643_v58  ;;  %v4521_v58 = vunpack.c.l.b16 %v4415_v25  ;;  %v4522_v24 = vunpack.c.l.b16 %v4418_v12  ;;  %v3696_v43 = vld [vmem:[#allocation2 + $0x3c] sm:$0xf]  ;;  %v4421_v55 = vrot.slane %v6742_v34, 5 }
 0x1da   : > { %v3801_v7 = vrot.slane %v3800_v37, 4  ;;  %v3805_v6 = vrot.slane %v3803_v29, 5  ;;  %v3090_v30 = vsel %vm6340_vm0, %v5188_v20, %v3089_v32  ;;  %v3808_v44 = vshrl.u32 %v3696_v43, 16 }
 0x1db   : > { %v4552_v25 = vpack.c.b16 %v4522_v24, %v4521_v58  ;;  %v3796_v34 = vsel %vm5852_vm13, %v3791_v22, %v6761_v3  ;;  %v5318_v48 = vrot.slane %v4343_v62, 9  ;;  %v3186_v37 = vunpack.c.l.b16 %v3090_v30 }
 0x1dc   : > { %v1647_v56 = vpop.f32.mrf.mxu1  ;;  %v4423_v23 = vrot.slane %v4421_v55, 4  ;;  %v4125_v24 = vunpack.c.l.b16 %v3796_v34 }
 0x1dd   : > { %v2278_v1 = vpop.f32.mrf.mxu3  ;;  %v2932_v27 = vpop.f32.mrf.mxu0 }
 0x1de   : > { %v2333_v59 = vadd.f32 %v2278_v1, %v2047_v52  ;;  %v3091_v52 = vrot.slane %v3089_v32, 4  ;;  %v3811_v1 = vshll.u32 %v3696_v43, 16  ;;  %v1648_v32 = vadd.f32 %v1647_v56, %v6488_v40  ;;  %v6796_v56 = vld [vmem:[#allocation2 + $0x44] sm:$0x1] }
 0x1df   : > { %5204 = vmatmul.msk.bf16.gmra.mxu1 %vm1312_vm12, %v3214_v11  ;;  %v4422_v43 = vsel %vm6340_vm0, %v5318_v48, %v4421_v55  ;;  %v3006_v55 = vld [vmem:[#allocation2 + $0x3c] sm:$0xe] }
 0x1e0   : > { %v1997_v61 = vpop.f32.mrf.mxu2  ;;  %v6773_v21 = vadd.f32 %v2932_v27, %v2333_v59  ;;  %v3093_v11 = vsel %vm6340_vm0, %v3091_v52, %v3092_v8  ;;  %v3821_v59 = vshrl.u32 %v6776_v16, 16  ;;  %v3810_v8 = vrot.slane %v3808_v44, 4 }
 0x1e1   : > { %v2049_v15 = vadd.f32 %v1997_v61, %v1645_v49  ;;  %v3806_v49 = vsel %vm5852_vm13, %v3801_v7, %v3805_v6  ;;  %v3187_v29 = vunpack.c.l.b16 %v3093_v11  ;;  %v3813_v61 = vrot.slane %v3811_v1, 5 }
 0x1e2   : > { %5301 = vmatmul.msk.bf16.gmra.mxu3 %vm1312_vm12, %v4154_v41  ;;  %v3817_v41 = vshll.u32 %v6776_v16, 16  ;;  %v3823_v58 = vrot.slane %v3821_v59, 4  ;;  %v4126_v40 = vunpack.c.l.b16 %v3806_v49  ;;  %v5189_v49 = vrot.slane %v3006_v55, 9 }
 0x1e3   : > { %v3814_v7 = vor.u32 %v3813_v61, %v3810_v8  ;;  %v3699_v61 = vld [vmem:[#allocation2 + $0x48] sm:$0xf] }
 0x1e4   : > { %v1649_v36 = vpop.f32.mrf.mxu1  ;;  %v3819_v3 = vrot.slane %v3817_v41, 5  ;;  %v4155_v1 = vpack.c.b16 %v4126_v40, %v4125_v24  ;;  %v5566_v41 = vld [vmem:[#allocation2 + $0x44] sm:$0x1] }
 0x1e5   : > { %v2281_v27 = vpop.f32.mrf.mxu3  ;;  %5285 = vmatmul.msk.bf16.gmra.mxu2 %vm1312_vm12, %v5389_v60  ;;  %v2935_v12 = vpop.f32.mrf.mxu0  ;;  %v3215_v60 = vpack.c.b16 %v3187_v29, %v3186_v37  ;;  %v3099_v59 = vrot.slane %v5566_v41, 5 }
 0x1e6   : > { %v2334_v42 = vadd.f32 %v2281_v27, %v2048_v5  ;;  %v4424_v5 = vrot.slane %v6763_v18, 5  ;;  %v3824_v30 = vor.u32 %v3823_v58, %v3819_v3  ;;  %v3827_v18 = vshll.u32 %v6796_v56, 16 }
 0x1e8   : > { %v2000_v53 = vpop.f32.mrf.mxu2  ;;  %v6792_v20 = vadd.f32 %v2935_v12, %v2334_v42  ;;  %5334 = vmatmul.msk.bf16.gmra.mxu0 %vm1312_vm12, %v4552_v25  ;;  %v4425_v62 = vsel %vm6340_vm0, %v4423_v23, %v4424_v5  ;;  %v5565_v25 = vld [vmem:[#allocation2 + $0x40] sm:$0xf]  ;;  %v4523_v12 = vunpack.c.l.b16 %v4422_v43  ;;  %v1650_v42 = vadd.f32 %v1649_v36, %v6507_v9  ;;  %v6808_v5 = vld [vmem:[#allocation2 + $0x4c] sm:$0xf] }
 0x1e9   : > { %v2050_v52 = vadd.f32 %v2000_v53, %v1648_v32  ;;  %v3096_v27 = vrot.slane %v5565_v25, 5  ;;  %v4524_v34 = vunpack.c.l.b16 %v4425_v62  ;;  %v3815_v32 = vrot.slane %v3814_v7, 4  ;;  %v5390_v23 = vld [vmem:[#allocation2 + $0x3c] sm:$0xff] }
 0x1ea   : > { %v3825_v53 = vrot.slane %v3824_v30, 4  ;;  %v4428_v7 = vrot.slane %v6776_v16, 5  ;;  %v4344_v30 = vld [vmem:[#allocation2 + $0x3c] sm:$0xe]  ;;  %v3845_v41 = vshrl.u32 %v6808_v5, 16 }
 0x1eb   : > { %v3098_v37 = vrot.slane %v3096_v27, 4  ;;  %v3097_v36 = vsel %vm6340_vm0, %v5189_v49, %v3096_v27  ;;  %v4553_v24 = vpack.c.b16 %v4524_v34, %v4523_v12  ;;  %v4431_v34 = vrot.slane %v6796_v56, 5 }
 0x1ec   : > { %v1652_v22 = vpop.f32.mrf.mxu1  ;;  %v3188_v25 = vunpack.c.l.b16 %v3097_v36  ;;  %v4430_v55 = vrot.slane %v4428_v7, 4 }
 0x1ed   : > { %v2283_v6 = vpop.f32.mrf.mxu3  ;;  %v2937_v11 = vpop.f32.mrf.mxu0  ;;  %v3100_v58 = vsel %vm6340_vm0, %v3098_v37, %v3099_v59 }
 0x1ee   : > { %v2335_v44 = vadd.f32 %v2283_v6, %v2049_v15  ;;  %v3829_v15 = vrot.slane %v3827_v18, 5  ;;  %v3832_v18 = vshrl.u32 %v3699_v61, 16  ;;  %v3189_v27 = vunpack.c.l.b16 %v3100_v58 }
 0x1ef   : > { %5205 = vmatmul.msk.bf16.gmra.mxu1 %vm1312_vm12, %v3215_v60  ;;  %v3820_v60 = vsel %vm5852_vm13, %v3815_v32, %v3819_v3 }
 0x1f0   : > { %v2002_v48 = vpop.f32.mrf.mxu2  ;;  %v6805_v8 = vadd.f32 %v2937_v11, %v2335_v44  ;;  %v3830_v43 = vsel %vm5852_vm13, %v3825_v53, %v3829_v15  ;;  %v3835_v11 = vshll.u32 %v3699_v61, 16  ;;  %v3841_v44 = vshll.u32 %v6808_v5, 16 }
 0x1f1   : > { %v2051_v29 = vadd.f32 %v2002_v48, %v1650_v42  ;;  %v4127_v12 = vunpack.c.l.b16 %v3820_v60  ;;  %v4128_v16 = vunpack.c.l.b16 %v3830_v43  ;;  %v5319_v42 = vrot.slane %v4344_v30, 9  ;;  %v3007_v30 = vld [vmem:[#allocation2 + $0x48] sm:$0xe] }
 0x1f2   : > { %5302 = vmatmul.msk.bf16.gmra.mxu3 %vm1312_vm12, %v4155_v1  ;;  %v1653_v1 = vadd.f32 %v1652_v22, %v6518_v4  ;;  %v3834_v48 = vrot.slane %v3832_v18, 4  ;;  %v3837_v32 = vrot.slane %v3835_v11, 5  ;;  %v3216_v49 = vpack.c.b16 %v3189_v27, %v3188_v25  ;;  %v5568_v18 = vld [vmem:[#allocation2 + $0x50] sm:$0x1] }
 0x1f3   : > { %v6827_v4 = vrot.slane %v3841_v44, 5  ;;  %v3847_v22 = vrot.slane %v3845_v41, 4  ;;  %v4156_v15 = vpack.c.b16 %v4128_v16, %v4127_v12  ;;  %v4429_v61 = vsel %vm6340_vm0, %v5319_v42, %v4428_v7  ;;  %v5391_v41 = vld [vmem:[#allocation2 + $0x48] sm:$0xff] }
 0x1f4   : > { %v1654_v9 = vpop.f32.mrf.mxu1  ;;  %v3838_v56 = vor.u32 %v3837_v32, %v3834_v48  ;;  %v3106_v11 = vrot.slane %v5568_v18, 5  ;;  %v5190_v44 = vrot.slane %v3007_v30, 9 }
 0x1f5   : > { %v2286_v40 = vpop.f32.mrf.mxu3  ;;  %5286 = vmatmul.msk.bf16.gmra.mxu2 %vm1312_vm12, %v5390_v23  ;;  %v2940_v6 = vpop.f32.mrf.mxu0  ;;  %v6829_v23 = vld [vmem:[#allocation2 + $0x50] sm:$0x1]  ;;  %v1655_v43 = vadd.f32 %v1654_v9, %v6534_v0  ;;  %v6842_v9 = vld [vmem:[#allocation2 + $0x58] sm:$0xf] }
 0x1f6   : > { %v2336_v62 = vadd.f32 %v2286_v40, %v2050_v52  ;;  %v5567_v40 = vld [vmem:[#allocation2 + $0x4c] sm:$0xf]  ;;  %v3839_v0 = vrot.slane %v3838_v56, 4 }
 0x1f7   : > { %v3103_v60 = vrot.slane %v5567_v40, 5 }
 0x1f8   : > { %v2005_v59 = vpop.f32.mrf.mxu2  ;;  %v6823_v3 = vadd.f32 %v2940_v6, %v2336_v62  ;;  %5335 = vmatmul.msk.bf16.gmra.mxu0 %vm1312_vm12, %v4553_v24  ;;  %v4432_v24 = vsel %vm6340_vm0, %v4430_v55, %v4431_v34  ;;  %v3848_v6 = vor.u32 %v3847_v22, %v6827_v4  ;;  %v3851_v62 = vshll.u32 %v6829_v23, 16  ;;  %v4345_v55 = vld [vmem:[#allocation2 + $0x48] sm:$0xe] }
 0x1f9   : > { %v2052_v52 = vadd.f32 %v2005_v59, %v1653_v1  ;;  %v4525_v1 = vunpack.c.l.b16 %v4429_v61  ;;  %v4526_v25 = vunpack.c.l.b16 %v4432_v24  ;;  %v3702_v59 = vld [vmem:[#allocation2 + $0x54] sm:$0xf]  ;;  %v4435_v34 = vrot.slane %v6808_v5, 5 }
 0x1fa   : > { %v3849_v16 = vrot.slane %v3848_v6, 4  ;;  %v3853_v42 = vrot.slane %v3851_v62, 5  ;;  %v3104_v32 = vsel %vm6340_vm0, %v5190_v44, %v3103_v60  ;;  %v3856_v22 = vshrl.u32 %v3702_v59, 16 }
 0x1fb   : > { %v4554_v61 = vpack.c.b16 %v4526_v25, %v4525_v1  ;;  %v3844_v5 = vsel %vm5852_vm13, %v3839_v0, %v6827_v4  ;;  %v5320_v40 = vrot.slane %v4345_v55, 9  ;;  %v3190_v6 = vunpack.c.l.b16 %v3104_v32 }
 0x1fc   : > { %v1657_v37 = vpop.f32.mrf.mxu1  ;;  %v4437_v30 = vrot.slane %v4435_v34, 4  ;;  %v4129_v25 = vunpack.c.l.b16 %v3844_v5 }
 0x1fd   : > { %v2288_v53 = vpop.f32.mrf.mxu3  ;;  %v2942_v36 = vpop.f32.mrf.mxu0 }
 0x1fe   : > { %v2337_v58 = vadd.f32 %v2288_v53, %v2051_v29  ;;  %v3105_v29 = vrot.slane %v3103_v60, 4  ;;  %v3859_v53 = vshll.u32 %v3702_v59, 16  ;;  %v1658_v60 = vadd.f32 %v1657_v37, %v6443_v31  ;;  %v6862_v37 = vld [vmem:[#allocation2 + $0x5c] sm:$0x1] }
 0x1ff   : > { %5206 = vmatmul.msk.bf16.gmra.mxu1 %vm1312_vm12, %v3216_v49  ;;  %v4436_v59 = vsel %vm6340_vm0, %v5320_v40, %v4435_v34  ;;  %v3008_v34 = vld [vmem:[#allocation2 + $0x54] sm:$0xe] }
 0x200   : > { %v2007_v7 = vpop.f32.mrf.mxu2  ;;  %v6839_v12 = vadd.f32 %v2942_v36, %v2337_v58  ;;  %v3107_v49 = vsel %vm6340_vm0, %v3105_v29, %v3106_v11  ;;  %v3869_v58 = vshrl.u32 %v6842_v9, 16  ;;  %v3858_v11 = vrot.slane %v3856_v22, 4 }
 0x201   : > { %v2053_v27 = vadd.f32 %v2007_v7, %v1655_v43  ;;  %v3854_v43 = vsel %vm5852_vm13, %v3849_v16, %v3853_v42  ;;  %v3191_v62 = vunpack.c.l.b16 %v3107_v49  ;;  %v3861_v7 = vrot.slane %v3859_v53, 5 }
 0x202   : > { %5303 = vmatmul.msk.bf16.gmra.mxu3 %vm1312_vm12, %v4156_v15  ;;  %v3865_v15 = vshll.u32 %v6842_v9, 16  ;;  %v3871_v1 = vrot.slane %v3869_v58, 4  ;;  %v4130_v31 = vunpack.c.l.b16 %v3854_v43  ;;  %v5191_v43 = vrot.slane %v3008_v34, 9 }
 0x203   : > { %v3862_v16 = vor.u32 %v3861_v7, %v3858_v11  ;;  %v3705_v7 = vld [vmem:[#allocation2 + $0x60] sm:$0xf] }
 0x204   : > { %v1659_v48 = vpop.f32.mrf.mxu1  ;;  %v3867_v4 = vrot.slane %v3865_v15, 5  ;;  %v4157_v53 = vpack.c.b16 %v4130_v31, %v4129_v25  ;;  %v5570_v15 = vld [vmem:[#allocation2 + $0x5c] sm:$0x1] }
 0x205   : > { %v2291_v36 = vpop.f32.mrf.mxu3  ;;  %5287 = vmatmul.msk.bf16.gmra.mxu2 %vm1312_vm12, %v5391_v41  ;;  %v2945_v24 = vpop.f32.mrf.mxu0  ;;  %v3217_v41 = vpack.c.b16 %v3191_v62, %v3190_v6  ;;  %v3113_v58 = vrot.slane %v5570_v15, 5 }
 0x206   : > { %v2338_v56 = vadd.f32 %v2291_v36, %v2052_v52  ;;  %v4438_v52 = vrot.slane %v6829_v23, 5  ;;  %v3872_v32 = vor.u32 %v3871_v1, %v3867_v4  ;;  %v3875_v23 = vshll.u32 %v6862_v37, 16 }
 0x207   : > { %v4442_v1 = vrot.slane %v6842_v9, 5 }
 0x208   : > { %v2010_v18 = vpop.f32.mrf.mxu2  ;;  %v6858_v44 = vadd.f32 %v2945_v24, %v2338_v56  ;;  %5336 = vmatmul.msk.bf16.gmra.mxu0 %vm1312_vm12, %v4554_v61  ;;  %v4439_v55 = vsel %vm6340_vm0, %v4437_v30, %v4438_v52  ;;  %v5569_v61 = vld [vmem:[#allocation2 + $0x58] sm:$0xf]  ;;  %v4527_v24 = vunpack.c.l.b16 %v4436_v59  ;;  %v1660_v56 = vadd.f32 %v1659_v48, %v6461_v51  ;;  %v6874_v52 = vld [vmem:[#allocation2 + $0x64] sm:$0xf]  ;;  %v4346_v48 = vld [vmem:[#allocation2 + $0x54] sm:$0xe] }
 0x209   : > { %v2054_v29 = vadd.f32 %v2010_v18, %v1658_v60  ;;  %v3110_v36 = vrot.slane %v5569_v61, 5  ;;  %v4528_v5 = vunpack.c.l.b16 %v4439_v55  ;;  %v3863_v60 = vrot.slane %v3862_v16, 4  ;;  %v5392_v30 = vld [vmem:[#allocation2 + $0x54] sm:$0xff] }
 0x20a   : > { %v3873_v18 = vrot.slane %v3872_v32, 4  ;;  %v3880_v55 = vshrl.u32 %v3705_v7, 16  ;;  %v3883_v32 = vshll.u32 %v3705_v7, 16  ;;  %v5321_v61 = vrot.slane %v4346_v48, 9 }
 0x20b   : > { %v3112_v6 = vrot.slane %v3110_v36, 4  ;;  %v4555_v51 = vpack.c.b16 %v4528_v5, %v4527_v24  ;;  %v3111_v31 = vsel %vm6340_vm0, %v5191_v43, %v3110_v36  ;;  %v3868_v16 = vsel %vm5852_vm13, %v3863_v60, %v3867_v4 }
 0x20c   : > { %v1662_v0 = vpop.f32.mrf.mxu1  ;;  %v3192_v36 = vunpack.c.l.b16 %v3111_v31  ;;  %v4445_v5 = vrot.slane %v6862_v37, 5  ;;  %v3885_v60 = vrot.slane %v3883_v32, 5  ;;  %v4443_v7 = vsel %vm6340_vm0, %v5321_v61, %v4442_v1  ;;  %v3009_v32 = vld [vmem:[#allocation2 + $0x60] sm:$0xe] }
 0x20d   : > { %v2293_v42 = vpop.f32.mrf.mxu3  ;;  %v2947_v49 = vpop.f32.mrf.mxu0 }
 0x20e   : > { %v2339_v22 = vadd.f32 %v2293_v42, %v2053_v27  ;;  %v3877_v27 = vrot.slane %v3875_v23, 5 }
 0x20f   : > { %5207 = vmatmul.msk.bf16.gmra.mxu1 %vm1312_vm12, %v3217_v41  ;;  %v3114_v41 = vsel %vm6340_vm0, %v3112_v6, %v3113_v58  ;;  %v4131_v58 = vunpack.c.l.b16 %v3868_v16  ;;  %v5571_v16 = vld [vmem:[#allocation2 + $0x64] sm:$0xf] }
 0x210   : > { %v2012_v40 = vpop.f32.mrf.mxu2  ;;  %v6871_v11 = vadd.f32 %v2947_v49, %v2339_v22  ;;  %v3878_v42 = vsel %vm5852_vm13, %v3873_v18, %v3877_v27  ;;  %v3889_v49 = vshll.u32 %v6874_v52, 16  ;;  %v3893_v22 = vshrl.u32 %v6874_v52, 16 }
 0x211   : > { %v2055_v62 = vadd.f32 %v2012_v40, %v1660_v56  ;;  %v3193_v15 = vunpack.c.l.b16 %v3114_v41  ;;  %v4132_v24 = vunpack.c.l.b16 %v3878_v42  ;;  %v4444_v56 = vrot.slane %v4442_v1, 4 }
 0x212   : > { %5304 = vmatmul.msk.bf16.gmra.mxu3 %vm1312_vm12, %v4157_v53  ;;  %v1663_v53 = vadd.f32 %v1662_v0, %v6475_v33  ;;  %v3882_v40 = vrot.slane %v3880_v55, 4  ;;  %v6893_v43 = vrot.slane %v3889_v49, 5  ;;  %v3895_v6 = vrot.slane %v3893_v22, 4  ;;  %v6895_v0 = vld [vmem:[#allocation2 + $0x68] sm:$0x1] }
 0x213   : > { %v3218_v33 = vpack.c.b16 %v3193_v15, %v3192_v36  ;;  %v4158_v27 = vpack.c.b16 %v4132_v24, %v4131_v58  ;;  %v3117_v42 = vrot.slane %v5571_v16, 5  ;;  %v5192_v49 = vrot.slane %v3009_v32, 9  ;;  %v3708_v15 = vld [vmem:[#allocation2 + $0x6c] sm:$0xf] }
 0x214   : > { %v1664_v25 = vpop.f32.mrf.mxu1  ;;  %v3886_v48 = vor.u32 %v3885_v60, %v3882_v40  ;;  %v3896_v41 = vor.u32 %v3895_v6, %v6893_v43 }
 0x215   : > { %v2296_v59 = vpop.f32.mrf.mxu3  ;;  %5288 = vmatmul.msk.bf16.gmra.mxu2 %vm1312_vm12, %v5392_v30  ;;  %v2950_v23 = vpop.f32.mrf.mxu0  ;;  %v1665_v55 = vadd.f32 %v1664_v25, %v6492_v14  ;;  %v3119_v22 = vrot.slane %v3117_v42, 4  ;;  %v6908_v25 = vld [vmem:[#allocation2 + $0x70] sm:$0xf]  ;;  %v3118_v60 = vsel %vm6340_vm0, %v5192_v49, %v3117_v42 }
 0x216   : > { %v2340_v9 = vadd.f32 %v2296_v59, %v2054_v29  ;;  %v3899_v59 = vshll.u32 %v6895_v0, 16  ;;  %v3887_v24 = vrot.slane %v3886_v48, 4  ;;  %v3917_v48 = vshrl.u32 %v6908_v25, 16 }
 0x218   : > { %v2015_v4 = vpop.f32.mrf.mxu2  ;;  %v6889_v34 = vadd.f32 %v2950_v23, %v2340_v9  ;;  %5337 = vmatmul.msk.bf16.gmra.mxu0 %vm1312_vm12, %v4555_v51  ;;  %v4446_v51 = vsel %vm6340_vm0, %v4444_v56, %v4445_v5  ;;  %v5572_v23 = vld [vmem:[#allocation2 + $0x68] sm:$0x1]  ;;  %v3897_v56 = vrot.slane %v3896_v41, 4  ;;  %v3901_v14 = vrot.slane %v3899_v59, 5 }
 0x219   : > { %v2056_v29 = vadd.f32 %v2015_v4, %v1663_v53  ;;  %v3120_v9 = vrot.slane %v5572_v23, 5  ;;  %v4529_v53 = vunpack.c.l.b16 %v4443_v7  ;;  %v4530_v61 = vunpack.c.l.b16 %v4446_v51  ;;  %v4347_v4 = vld [vmem:[#allocation2 + $0x60] sm:$0xe] }
 0x21a   : > { %v4449_v5 = vrot.slane %v6874_v52, 5  ;;  %v3892_v52 = vsel %vm5852_vm13, %v3887_v24, %v6893_v43  ;;  %v3902_v41 = vsel %vm5852_vm13, %v3897_v56, %v3901_v14  ;;  %v5322_v59 = vrot.slane %v4347_v4, 9 }
 0x21b   : > { %v3121_v6 = vsel %vm6340_vm0, %v3119_v22, %v3120_v9  ;;  %v4556_v7 = vpack.c.b16 %v4530_v61, %v4529_v53  ;;  %v4452_v23 = vrot.slane %v6895_v0, 5  ;;  %v3919_v53 = vrot.slane %v3917_v48, 4 }
 0x21c   : > { %v1667_v30 = vpop.f32.mrf.mxu1  ;;  %v4451_v42 = vrot.slane %v4449_v5, 4  ;;  %v3195_v32 = vunpack.c.l.b16 %v3121_v6  ;;  %v4133_v61 = vunpack.c.l.b16 %v3892_v52 }
 0x21d   : > { %v2298_v18 = vpop.f32.mrf.mxu3  ;;  %v2952_v37 = vpop.f32.mrf.mxu0  ;;  %v1668_v16 = vadd.f32 %v1667_v30, %v6510_v35  ;;  %v4450_v30 = vsel %vm6340_vm0, %v5322_v59, %v4449_v5  ;;  %v3010_v5 = vld [vmem:[#allocation2 + $0x6c] sm:$0xe] }
 0x21e   : > { %v2341_v31 = vadd.f32 %v2298_v18, %v2055_v62  ;;  %v5393_v62 = vld [vmem:[#allocation2 + $0x60] sm:$0xff]  ;;  %v3907_v18 = vshll.u32 %v3708_v15, 16  ;;  %v4453_v0 = vsel %vm6340_vm0, %v4451_v42, %v4452_v23 }
 0x21f   : > { %5208 = vmatmul.msk.bf16.gmra.mxu1 %vm1312_vm12, %v3218_v33  ;;  %v3904_v33 = vshrl.u32 %v3708_v15, 16  ;;  %v6928_v15 = vld [vmem:[#allocation2 + $0x74] sm:$0x1]  ;;  %v4532_v48 = vunpack.c.l.b16 %v4453_v0 }
 0x220   : > { %v2017_v1 = vpop.f32.mrf.mxu2  ;;  %v6905_v58 = vadd.f32 %v2952_v37, %v2341_v31  ;;  %v3909_v49 = vrot.slane %v3907_v18, 5 }
 0x221   : > { %v2057_v36 = vadd.f32 %v2017_v1, %v1665_v55  ;;  %v3194_v55 = vunpack.c.l.b16 %v3118_v60  ;;  %v3906_v1 = vrot.slane %v3904_v33, 4  ;;  %v3923_v60 = vshll.u32 %v6928_v15, 16 }
 0x222   : > { %5305 = vmatmul.msk.bf16.gmra.mxu3 %vm1312_vm12, %v4158_v27  ;;  %v3913_v27 = vshll.u32 %v6908_v25, 16 }
 0x223   : > { %v3219_v35 = vpack.c.b16 %v3195_v32, %v3194_v55  ;;  %v3910_v56 = vor.u32 %v3909_v49, %v3906_v1  ;;  %v5394_v32 = vld [vmem:[#allocation2 + $0x6c] sm:$0xff]  ;;  %v6938_v49 = vld [vmem:[#allocation2 + $0x7c] sm:$0xf] }
 0x224   : > { %v1669_v40 = vpop.f32.mrf.mxu1  ;;  %v3915_v43 = vrot.slane %v3913_v27, 5  ;;  %v4531_v27 = vunpack.c.l.b16 %v4450_v30 }
 0x225   : > { %v2301_v51 = vpop.f32.mrf.mxu3  ;;  %5289 = vmatmul.msk.bf16.gmra.mxu2 %vm1312_vm12, %v5393_v62  ;;  %v2955_v37 = vpop.f32.mrf.mxu0  ;;  %v4134_v62 = vunpack.c.l.b16 %v3902_v41  ;;  %v3911_v52 = vrot.slane %v3910_v56, 4  ;;  %v5193_v41 = vrot.slane %v3010_v5, 9 }
 0x226   : > { %v2342_v31 = vadd.f32 %v2301_v51, %v2056_v29  ;;  %v3920_v4 = vor.u32 %v3919_v53, %v3915_v43  ;;  %v4557_v1 = vpack.c.b16 %v4532_v48, %v4531_v27  ;;  %v4456_v53 = vrot.slane %v6908_v25, 5 }
 0x227   : > { %v4159_v18 = vpack.c.b16 %v4134_v62, %v4133_v61  ;;  %v3937_v25 = vshll.u32 %v6938_v49, 16 }
 0x228   : > { %v2020_v9 = vpop.f32.mrf.mxu2  ;;  %v6925_v22 = vadd.f32 %v2955_v37, %v2342_v31  ;;  %5338 = vmatmul.msk.bf16.gmra.mxu0 %vm1312_vm12, %v4556_v7  ;;  %v5573_v7 = vld [vmem:[#allocation2 + $0x70] sm:$0xf]  ;;  %v1670_v37 = vadd.f32 %v1669_v40, %v6525_v63  ;;  %v3921_v23 = vrot.slane %v3920_v4, 4  ;;  %v3916_v63 = vsel %vm5852_vm13, %v3911_v52, %v3915_v43  ;;  %v4348_v40 = vld [vmem:[#allocation2 + $0x6c] sm:$0xe] }
 0x229   : > { %v2058_v29 = vadd.f32 %v2020_v9, %v1668_v16  ;;  %v3124_v51 = vrot.slane %v5573_v7, 5  ;;  %v5574_v16 = vld [vmem:[#allocation2 + $0x74] sm:$0x1]  ;;  %v3711_v9 = vld [vmem:[#allocation2 + $0x78] sm:$0xf] }
 0x22a   : > { %v3127_v42 = vrot.slane %v5574_v16, 5  ;;  %v3928_v56 = vshrl.u32 %v3711_v9, 16  ;;  %v3939_v16 = vrot.slane %v3937_v25, 5 }
 0x22b   : > { %v3126_v59 = vrot.slane %v3124_v51, 4  ;;  %v3125_v62 = vsel %vm6340_vm0, %v5193_v41, %v3124_v51  ;;  %v5323_v51 = vrot.slane %v4348_v40, 9 }
 0x22c   : > { %v1672_v24 = vpop.f32.mrf.mxu1  ;;  %v3196_v27 = vunpack.c.l.b16 %v3125_v62 }
 0x22d   : > { %v2303_v14 = vpop.f32.mrf.mxu3  ;;  %v2957_v6 = vpop.f32.mrf.mxu0  ;;  %v1673_v7 = vadd.f32 %v1672_v24, %v6537_v50  ;;  %v6959_v50 = vld [vmem:[#allocation2 + $0x80] sm:$0x1] }
 0x22e   : > { %v2343_v33 = vadd.f32 %v2303_v14, %v2057_v36  ;;  %v3925_v36 = vrot.slane %v3923_v60, 5  ;;  %v3931_v14 = vshll.u32 %v3711_v9, 16  ;;  %v4457_v9 = vsel %vm6340_vm0, %v5323_v51, %v4456_v53 }
 0x22f   : > { %5209 = vmatmul.msk.bf16.gmra.mxu1 %vm1312_vm12, %v3219_v35  ;;  %v3128_v35 = vsel %vm6340_vm0, %v3126_v59, %v3127_v42  ;;  %v4533_v51 = vunpack.c.l.b16 %v4457_v9  ;;  %v4349_v9 = vld [vmem:[#allocation2 + $0x78] sm:$0xe] }
 0x230   : > { %v2022_v31 = vpop.f32.mrf.mxu2  ;;  %v3926_v0 = vsel %vm5852_vm13, %v3921_v23, %v3925_v36  ;;  %v6950_v4 = vadd.f32 %v2957_v6, %v2343_v33  ;;  %v3197_v48 = vunpack.c.l.b16 %v3128_v35  ;;  %v4459_v6 = vrot.slane %v6928_v15, 5 }
 0x231   : > { %v2059_v55 = vadd.f32 %v2022_v31, %v1670_v37  ;;  %v4135_v37 = vunpack.c.l.b16 %v3916_v63  ;;  %v4136_v5 = vunpack.c.l.b16 %v3926_v0  ;;  %v4458_v31 = vrot.slane %v4456_v53, 4  ;;  %v5576_v53 = vld [vmem:[#allocation2 + $0x80] sm:$0x1] }
 0x232   : > { %5306 = vmatmul.msk.bf16.gmra.mxu3 %vm1312_vm12, %v4159_v18  ;;  %v3941_v18 = vshrl.u32 %v6938_v49, 16  ;;  %v3930_v33 = vrot.slane %v3928_v56, 4  ;;  %v3933_v59 = vrot.slane %v3931_v14, 5  ;;  %v3947_v35 = vshll.u32 %v6959_v50, 16  ;;  %v7426_v56 = vld [vmem:[#allocation6_spill] sm:$0xff] }
 0x233   : > { %v4160_v36 = vpack.c.b16 %v4136_v5, %v4135_v37  ;;  %v5395_v37 = vld [vmem:[#allocation2 + $0x78] sm:$0xff] }
 0x234   : > { %v1674_v61 = vpop.f32.mrf.mxu1  ;;  %v3943_v42 = vrot.slane %v3941_v18, 4  ;;  %v3934_v63 = vor.u32 %v3933_v59, %v3930_v33 }
 0x235   : > { %v2306_v30 = vpop.f32.mrf.mxu3  ;;  %5290 = vmatmul.msk.bf16.gmra.mxu2 %vm1312_vm12, %v5394_v32  ;;  %v2960_v43 = vpop.f32.mrf.mxu0  ;;  %v3220_v32 = vpack.c.b16 %v3197_v48, %v3196_v27  ;;  %v1675_v14 = vadd.f32 %v1674_v61, %v7426_v56  ;;  %v4463_v61 = vrot.slane %v6938_v49, 5 }
 0x236   : > { %v2344_v60 = vadd.f32 %v2306_v30, %v2058_v29  ;;  %v3944_v62 = vor.u32 %v3943_v42, %v3939_v16  ;;  %v5575_v30 = vld [vmem:[#allocation2 + $0x7c] sm:$0xf]  ;;  %v6978_v42 = vld [vmem:[#allocation2 + $0x88] sm:$0xf] }
 0x237   : > { %v3131_v0 = vrot.slane %v5575_v30, 5 }
 0x238   : > { %v2025_v52 = vpop.f32.mrf.mxu2  ;;  %v6955_v41 = vadd.f32 %v2960_v43, %v2344_v60  ;;  %5339 = vmatmul.msk.bf16.gmra.mxu0 %vm1312_vm12, %v4557_v1  ;;  %v4460_v1 = vsel %vm6340_vm0, %v4458_v31, %v4459_v6  ;;  %v3011_v43 = vld [vmem:[#allocation2 + $0x78] sm:$0xe]  ;;  %v3945_v5 = vrot.slane %v3944_v62, 4  ;;  %v3949_v31 = vrot.slane %v3947_v35, 5 }
 0x239   : > { %v2060_v29 = vadd.f32 %v2025_v52, %v1673_v7  ;;  %v5194_v25 = vrot.slane %v3011_v43, 9  ;;  %v3133_v18 = vrot.slane %v3131_v0, 4  ;;  %v3134_v7 = vrot.slane %v5576_v53, 5  ;;  %v3714_v52 = vld [vmem:[#allocation2 + $0x84] sm:$0xf] }
 0x23a   : > { %v4534_v27 = vunpack.c.l.b16 %v4460_v1  ;;  %v3950_v62 = vsel %vm5852_vm13, %v3945_v5, %v3949_v31  ;;  %v3952_v35 = vshrl.u32 %v3714_v52, 16  ;;  %v3955_v30 = vshll.u32 %v3714_v52, 16  ;;  %v7001_v31 = vld [vmem:[#allocation2 + $0x8c] sm:$0x1] }
 0x23b   : > { %v3132_v33 = vsel %vm6340_vm0, %v5194_v25, %v3131_v0  ;;  %v3135_v59 = vsel %vm6340_vm0, %v3133_v18, %v3134_v7  ;;  %v3965_v43 = vshrl.u32 %v6978_v42, 16  ;;  %v4465_v25 = vrot.slane %v4463_v61, 4 }
 0x23c   : > { %v6961_v24 = vpop.f32.mrf.mxu1  ;;  %v3198_v0 = vunpack.c.l.b16 %v3132_v33  ;;  %v3199_v56 = vunpack.c.l.b16 %v3135_v59  ;;  %v3954_v53 = vrot.slane %v3952_v35, 4  ;;  %v3957_v7 = vrot.slane %v3955_v30, 5  ;;  %v3012_v35 = vld [vmem:[#allocation2 + $0x84] sm:$0xe] }
 0x23d   : > { %v2308_v23 = vpop.f32.mrf.mxu3  ;;  %v2962_v15 = vpop.f32.mrf.mxu0  ;;  %v3368_v30 = vadd.f32 %v6961_v24, %v6561_v19  ;;  %v4470_v19 = vrot.slane %v6978_v42, 5 }
 0x23e   : > { %v2345_v40 = vadd.f32 %v2308_v23, %v2059_v55  ;;  %v3935_v55 = vrot.slane %v3934_v63, 4 }
 0x23f   : > { %5210 = vmatmul.msk.bf16.gmra.mxu1 %vm1312_vm12, %v3220_v32  ;;  %v4558_v32 = vpack.c.b16 %v4534_v27, %v4533_v51  ;;  %v3221_v51 = vpack.c.b16 %v3199_v56, %v3198_v0  ;;  %v5195_v56 = vrot.slane %v3012_v35, 9 }
 0x240   : > { %v2027_v60 = vpop.f32.mrf.mxu2  ;;  %v6983_v1 = vadd.f32 %v2962_v15, %v2345_v40  ;;  %v4138_v40 = vunpack.c.l.b16 %v3950_v62  ;;  %v3971_v62 = vshll.u32 %v7001_v31, 16 }
 0x241   : > { %v2061_v48 = vadd.f32 %v2027_v60, %v1675_v14  ;;  %v3961_v14 = vshll.u32 %v6978_v42, 16  ;;  %v5324_v60 = vrot.slane %v4349_v9, 9 }
 0x242   : > { %5307 = vmatmul.msk.bf16.gmra.mxu3 %vm1312_vm12, %v4160_v36  ;;  %v3940_v36 = vsel %vm5852_vm13, %v3935_v55, %v3939_v16  ;;  %v4466_v16 = vrot.slane %v6959_v50, 5 }
 0x243   : > { %v6993_v27 = vrot.slane %v3961_v14, 5  ;;  %v4464_v55 = vsel %vm6340_vm0, %v5324_v60, %v4463_v61  ;;  %v5396_v60 = vld [vmem:[#allocation2 + $0x84] sm:$0xff] }
 0x244   : > { %v6972_v6 = vpop.f32.mrf.mxu1  ;;  %v4467_v5 = vsel %vm6340_vm0, %v4465_v25, %v4466_v16  ;;  %v3717_v25 = vld [vmem:[#allocation2 + $0x90] sm:$0xf] }
 0x245   : > { %v2311_v23 = vpop.f32.mrf.mxu3  ;;  %5291 = vmatmul.msk.bf16.gmra.mxu2 %vm1312_vm12, %v5395_v37  ;;  %v2965_v49 = vpop.f32.mrf.mxu0  ;;  %v3967_v37 = vrot.slane %v3965_v43, 4 }
 0x246   : > { %v2346_v63 = vadd.f32 %v2311_v23, %v2060_v29  ;;  %v4137_v29 = vunpack.c.l.b16 %v3940_v36  ;;  %v3958_v23 = vor.u32 %v3957_v7, %v3954_v53  ;;  %v5577_v36 = vld [vmem:[#allocation2 + $0x88] sm:$0xf] }
 0x247   : > { %v3138_v9 = vrot.slane %v5577_v36, 5  ;;  %v3968_v61 = vor.u32 %v3967_v37, %v6993_v27  ;;  %v4350_v37 = vld [vmem:[#allocation2 + $0x84] sm:$0xe] }
 0x248   : > { %v3575_v18 = vpop.f32.mrf.mxu2  ;;  %v6990_v15 = vadd.f32 %v2965_v49, %v2346_v63  ;;  %5340 = vmatmul.msk.bf16.gmra.mxu0 %vm1312_vm12, %v4558_v32  ;;  %v4161_v32 = vpack.c.b16 %v4138_v40, %v4137_v29  ;;  %v4535_v49 = vunpack.c.l.b16 %v4464_v55  ;;  %v4536_v63 = vunpack.c.l.b16 %v4467_v5  ;;  %v7009_v40 = vld [vmem:[#allocation2 + $0x94] sm:$0xf] }
 0x249   : > { %v3140_v14 = vrot.slane %v3138_v9, 4  ;;  %v3655_v16 = vadd.f32 %v3575_v18, %v3368_v30  ;;  %v3959_v29 = vrot.slane %v3958_v23, 4  ;;  %v3969_v7 = vrot.slane %v3968_v61, 4 }
 0x24a   : > { %v4559_v53 = vpack.c.b16 %v4536_v63, %v4535_v49  ;;  %v3139_v55 = vsel %vm6340_vm0, %v5195_v56, %v3138_v9  ;;  %v3985_v23 = vshll.u32 %v7009_v40, 16  ;;  %v3989_v36 = vshrl.u32 %v7009_v40, 16  ;;  %v7026_v9 = vld [vmem:[%s7405_s2] ss:$0 sm:$0xff] }
 0x24b   : > { %v3964_v61 = vsel %vm5852_vm13, %v3959_v29, %v6993_v27  ;;  %v5325_v35 = vrot.slane %v4350_v37, 9  ;;  %v3200_v30 = vunpack.c.l.b16 %v3139_v55  ;;  %v3369_v56 = vadd.f32 %v6972_v6, %v6575_v46  ;;  %v7043_v55 = vld [vmem:[#allocation2 + $0x98] sm:$0x1] }
 0x24c   : > { %v6999_v50 = vpop.f32.mrf.mxu1 }
 0x24d   : > { %v2313_v52 = vpop.f32.mrf.mxu3  ;;  %v2967_v33 = vpop.f32.mrf.mxu0 }
 0x24e   : > { %v2347_v59 = vadd.f32 %v2313_v52, %v2061_v48  ;;  %v5578_v48 = vld [vmem:[#allocation2 + $0x8c] sm:$0x1]  ;;  %v3976_v52 = vshrl.u32 %v3717_v25, 16 }
 0x24f   : > { %5211 = vmatmul.msk.bf16.gmra.mxu1 %vm1312_vm12, %v3221_v51  ;;  %v3141_v43 = vrot.slane %v5578_v48, 5  ;;  %v3973_v51 = vrot.slane %v3971_v62, 5  ;;  %v4473_v48 = vrot.slane %v7001_v31, 5  ;;  %v4471_v31 = vsel %vm6340_vm0, %v5325_v35, %v4470_v19 }
 0x250   : > { %v3577_v0 = vpop.f32.mrf.mxu2  ;;  %v7021_v49 = vadd.f32 %v2967_v33, %v2347_v59  ;;  %v4537_v35 = vunpack.c.l.b16 %v4471_v31  ;;  %v7062_v31 = vld [vmem:[#allocation2 + $0xa0] sm:$0xf] }
 0x251   : > { %v3142_v5 = vsel %vm6340_vm0, %v3140_v14, %v3141_v43  ;;  %v3974_v62 = vsel %vm5852_vm13, %v3969_v7, %v3973_v51  ;;  %v4472_v14 = vrot.slane %v4470_v19, 4  ;;  %v3656_v7 = vadd.f32 %v3577_v0, %v3369_v56  ;;  %v3720_v56 = vld [vmem:[#allocation2 + $0x9c] sm:$0xf] }
 0x252   : > { %5308 = vmatmul.msk.bf16.gmra.mxu3 %vm1312_vm12, %v4161_v32  ;;  %v3979_v32 = vshll.u32 %v3717_v25, 16  ;;  %v3201_v33 = vunpack.c.l.b16 %v3142_v5  ;;  %v7038_v25 = vrot.slane %v3985_v23, 5  ;;  %v4139_v51 = vunpack.c.l.b16 %v3964_v61  ;;  %v5579_v61 = vld [vmem:[#allocation2 + $0x94] sm:$0xf] }
 0x253   : > { %v4140_v37 = vunpack.c.l.b16 %v3974_v62  ;;  %v3995_v0 = vshll.u32 %v7043_v55, 16  ;;  %v3145_v62 = vrot.slane %v5579_v61, 5  ;;  %v4477_v61 = vrot.slane %v7009_v40, 5 }
 0x254   : > { %v7012_v24 = vpop.f32.mrf.mxu1  ;;  %v3981_v27 = vrot.slane %v3979_v32, 5  ;;  %v3222_v46 = vpack.c.b16 %v3201_v33, %v3200_v30  ;;  %v7427_v30 = vld [vmem:[#allocation7_spill] sm:$0xff]  ;;  %v4009_v40 = vshll.u32 %v7062_v31, 16 }
 0x255   : > { %v4229_v18 = vpop.f32.mrf.mxu3  ;;  %5292 = vmatmul.msk.bf16.gmra.mxu2 %vm1312_vm12, %v5396_v60  ;;  %v4627_v42 = vpop.f32.mrf.mxu0  ;;  %v3978_v60 = vrot.slane %v3976_v52, 4  ;;  %v3370_v19 = vadd.f32 %v6999_v50, %v7427_v30 }
 0x256   : > { %v4309_v63 = vadd.f32 %v4229_v18, %v3655_v16  ;;  %v3991_v16 = vrot.slane %v3989_v36, 4 }
 0x257   : > { %v3982_v18 = vor.u32 %v3981_v27, %v3978_v60  ;;  %v3147_v27 = vrot.slane %v3145_v62, 4 }
 0x258   : > { %v4707_v59 = vadd.f32 %v4627_v42, %v4309_v63  ;;  %v3580_v43 = vpop.f32.mrf.mxu2  ;;  %5341 = vmatmul.msk.bf16.gmra.mxu0 %vm1312_vm12, %v4559_v53  ;;  %v4474_v53 = vsel %vm6340_vm0, %v4472_v14, %v4473_v48  ;;  %v3992_v32 = vor.u32 %v3991_v16, %v7038_v25  ;;  %v4162_v63 = vpack.c.b16 %v4140_v37, %v4139_v51  ;;  %v5580_v16 = vld [vmem:[#allocation2 + $0x98] sm:$0x1] }
 0x259   : > { %v4538_v33 = vunpack.c.l.b16 %v4474_v53  ;;  %v3983_v51 = vrot.slane %v3982_v18, 4  ;;  %v3997_v37 = vrot.slane %v3995_v0, 5  ;;  %v4000_v53 = vshrl.u32 %v3720_v56, 16 }
 0x25a   : > { %v4743_v29 = vadd.f32 %v7026_v9, %v4707_v59  ;;  %v3013_v59 = vld [vmem:[#allocation2 + $0x90] sm:$0xe]  ;;  %v3993_v50 = vrot.slane %v3992_v32, 4 }
 0x25b   : > { %v5196_v60 = vrot.slane %v3013_v59, 9  ;;  %v4002_v59 = vrot.slane %v4000_v53, 4 }
 0x25c   : > { %v4775_v6 = vmax.f32 %v4743_v29, 0.0  ;;  %v7049_v5 = vpop.f32.mrf.mxu1  ;;  %v3148_v29 = vrot.slane %v5580_v16, 5 }
 0x25d   : > { %v4231_v52 = vpop.f32.mrf.mxu3  ;;  %v4629_v36 = vpop.f32.mrf.mxu0  ;;  %v3146_v18 = vsel %vm6340_vm0, %v5196_v60, %v3145_v62 }
 0x25e   : > { %v4807_v23 = vpack.c.bf16 %v4775_v6, %v4775_v6  ;;  %v4310_v42 = vadd.f32 %v4231_v52, %v3656_v7  ;;  %v5397_v7 = vld [vmem:[#allocation2 + $0x90] sm:$0xff]  ;;  %v4003_v52 = vshll.u32 %v3720_v56, 16  ;;  %v3149_v32 = vsel %vm6340_vm0, %v3147_v27, %v3148_v29  ;;  %v7428_v29 = vld [vmem:[#allocation8_spill] sm:$0xff] }
 0x25f   : > { %5212 = vmatmul.msk.bf16.gmra.mxu1 %vm1312_vm12, %v3222_v46  ;;  %v3657_v46 = vadd.f32 %v3580_v43, %v3370_v19  ;;  %v3988_v43 = vsel %vm5852_vm13, %v3983_v51, %v7038_v25  ;;  %v4013_v19 = vshrl.u32 %v7062_v31, 16  ;;  %v3202_v60 = vunpack.c.l.b16 %v3146_v18 }
 0x260   : > { %4840 = vst.msk [vmem:[%s7056_s23] sm:$0xf] %vm4839_vm1, %v4807_v23  ;;  %v4708_v14 = vadd.f32 %v4629_v36, %v4310_v42  ;;  %v3582_v48 = vpop.f32.mrf.mxu2  ;;  %v4560_v23 = vpack.c.b16 %v4538_v33, %v4537_v35  ;;  %v4351_v42 = vld [vmem:[#allocation2 + $0x90] sm:$0xe]  ;;  %v4005_v56 = vrot.slane %v4003_v52, 5  ;;  %v3203_v27 = vunpack.c.l.b16 %v3149_v32 }
 0x261   : > { %v3371_v25 = vadd.f32 %v7012_v24, %v7428_v29  ;;  %v4480_v51 = vrot.slane %v7043_v55, 5  ;;  %v4015_v53 = vrot.slane %v4013_v19, 4  ;;  %v3723_v29 = vld [vmem:[#allocation2 + $0xa8] sm:$0xf] }
 0x262   : > { %v4744_v6 = vadd.f32 %v7026_v9, %v4708_v14  ;;  %5309 = vmatmul.msk.bf16.gmra.mxu3 %vm1312_vm12, %v4162_v63  ;;  %v3998_v63 = vsel %vm5852_vm13, %v3993_v50, %v3997_v37  ;;  %v5326_v14 = vrot.slane %v4351_v42, 9  ;;  %v4141_v37 = vunpack.c.l.b16 %v3988_v43  ;;  %v7088_v42 = vld [vmem:[#allocation2 + $0xa4] sm:$0x1] }
 0x263   : > { %v4006_v18 = vor.u32 %v4005_v56, %v4002_v59  ;;  %v3223_v32 = vpack.c.b16 %v3203_v27, %v3202_v60  ;;  %v5581_v59 = vld [vmem:[#allocation2 + $0xa0] sm:$0xf]  ;;  %v7429_v60 = vld [vmem:[#allocation9_spill] sm:$0xff] }
 0x264   : > { %v4776_v36 = vmax.f32 %v4744_v6, 0.0  ;;  %v7065_v30 = vpop.f32.mrf.mxu1  ;;  %v4142_v6 = vunpack.c.l.b16 %v3998_v63  ;;  %v4478_v24 = vsel %vm6340_vm0, %v5326_v14, %v4477_v61  ;;  %v3152_v56 = vrot.slane %v5581_v59, 5 }
 0x265   : > { %v4234_v0 = vpop.f32.mrf.mxu3  ;;  %5293 = vmatmul.msk.bf16.gmra.mxu2 %vm1312_vm12, %v5397_v7  ;;  %v4632_v62 = vpop.f32.mrf.mxu0  ;;  %v4479_v7 = vrot.slane %v4477_v61, 4  ;;  %v3372_v61 = vadd.f32 %v7049_v5, %v7429_v60  ;;  %v4539_v14 = vunpack.c.l.b16 %v4478_v24  ;;  %v4352_v5 = vld [vmem:[#allocation2 + $0x9c] sm:$0xe]  ;;  %v4484_v24 = vrot.slane %v7062_v31, 5 }
 0x266   : > { %v4808_v35 = vpack.c.bf16 %v4776_v36, %v4776_v36  ;;  %v4311_v33 = vadd.f32 %v4234_v0, %v3657_v46  ;;  %v7085_v46 = vrot.slane %v4009_v40, 5  ;;  %v3658_v36 = vadd.f32 %v3582_v48, %v3371_v25  ;;  %v7101_v25 = vld [vmem:[#allocation2 + $0xac] sm:$0xf] }
 0x267   : > { %v4481_v55 = vsel %vm6340_vm0, %v4479_v7, %v4480_v51  ;;  %v4163_v63 = vpack.c.b16 %v4142_v6, %v4141_v37  ;;  %v4019_v48 = vshll.u32 %v7088_v42, 16  ;;  %v3154_v6 = vrot.slane %v3152_v56, 4 }
 0x268   : > { %4841 = vst.msk [vmem:[%s7056_s23 + $0x4] sm:$0xf] %vm4839_vm1, %v4808_v35  ;;  %v4709_v16 = vadd.f32 %v4632_v62, %v4311_v33  ;;  %v3585_v50 = vpop.f32.mrf.mxu2  ;;  %5342 = vmatmul.msk.bf16.gmra.mxu0 %vm1312_vm12, %v4560_v23  ;;  %v4016_v40 = vor.u32 %v4015_v53, %v7085_v46  ;;  %v4007_v33 = vrot.slane %v4006_v18, 4  ;;  %v4540_v27 = vunpack.c.l.b16 %v4481_v55  ;;  %v5582_v53 = vld [vmem:[#allocation2 + $0xa4] sm:$0x1] }
 0x269   : > { %v3659_v55 = vadd.f32 %v3585_v50, %v3372_v61  ;;  %v4027_v59 = vshll.u32 %v3723_v29, 16  ;;  %v4486_v61 = vrot.slane %v4484_v24, 4 }
 0x26a   : > { %v4745_v52 = vadd.f32 %v7026_v9, %v4709_v16  ;;  %v3014_v16 = vld [vmem:[#allocation2 + $0x9c] sm:$0xe]  ;;  %v4017_v18 = vrot.slane %v4016_v40, 4  ;;  %v4012_v50 = vsel %vm5852_vm13, %v4007_v33, %v7085_v46 }
 0x26b   : > { %v5197_v37 = vrot.slane %v3014_v16, 9  ;;  %v5327_v16 = vrot.slane %v4352_v5, 9  ;;  %v7430_v46 = vld [vmem:[#allocation10_spill] sm:$0xff] }
 0x26c   : > { %v4777_v0 = vmax.f32 %v4745_v52, 0.0  ;;  %v7094_v23 = vpop.f32.mrf.mxu1  ;;  %v3155_v52 = vrot.slane %v5582_v53, 5  ;;  %v3373_v33 = vadd.f32 %v7065_v30, %v7430_v46 }
 0x26d   : > { %v4236_v43 = vpop.f32.mrf.mxu3  ;;  %v4634_v35 = vpop.f32.mrf.mxu0  ;;  %v3153_v40 = vsel %vm6340_vm0, %v5197_v37, %v3152_v56  ;;  %v4029_v37 = vrot.slane %v4027_v59, 5 }
 0x26e   : > { %v4809_v19 = vpack.c.bf16 %v4777_v0, %v4777_v0  ;;  %v4312_v62 = vadd.f32 %v4236_v43, %v3658_v36  ;;  %v5398_v36 = vld [vmem:[#allocation2 + $0x9c] sm:$0xff]  ;;  %v4021_v0 = vrot.slane %v4019_v48, 5  ;;  %v4024_v43 = vshrl.u32 %v3723_v29, 16 }
 0x26f   : > { %5213 = vmatmul.msk.bf16.gmra.mxu1 %vm1312_vm12, %v3223_v32  ;;  %v3156_v31 = vsel %vm6340_vm0, %v3154_v6, %v3155_v52  ;;  %v3204_v6 = vunpack.c.l.b16 %v3153_v40 }
 0x270   : > { %4842 = vst.msk [vmem:[%s7056_s23 + $0x8] sm:$0xf] %vm4839_vm1, %v4809_v19  ;;  %v4710_v7 = vadd.f32 %v4634_v35, %v4312_v62  ;;  %v3587_v51 = vpop.f32.mrf.mxu2  ;;  %v4561_v19 = vpack.c.b16 %v4540_v27, %v4539_v14  ;;  %v4033_v35 = vshll.u32 %v7101_v25, 16  ;;  %v4037_v62 = vshrl.u32 %v7101_v25, 16 }
 0x271   : > { %v4022_v48 = vsel %vm5852_vm13, %v4017_v18, %v4021_v0  ;;  %v4487_v14 = vrot.slane %v7088_v42, 5  ;;  %v3205_v52 = vunpack.c.l.b16 %v3156_v31  ;;  %v7129_v0 = vld [vmem:[#allocation2 + $0xb0] sm:$0x1]  ;;  %v4143_v42 = vunpack.c.l.b16 %v4012_v50 }
 0x272   : > { %v4746_v32 = vadd.f32 %v7026_v9, %v4710_v7  ;;  %5310 = vmatmul.msk.bf16.gmra.mxu3 %vm1312_vm12, %v4163_v63  ;;  %v4026_v7 = vrot.slane %v4024_v43, 4  ;;  %v7123_v5 = vrot.slane %v4033_v35, 5  ;;  %v3660_v59 = vadd.f32 %v3587_v51, %v3373_v33 }
 0x273   : > { %v4485_v35 = vsel %vm6340_vm0, %v5327_v16, %v4484_v24  ;;  %v4043_v31 = vshll.u32 %v7129_v0, 16  ;;  %v5583_v16 = vld [vmem:[#allocation2 + $0xac] sm:$0xf] }
 0x274   : > { %v4778_v60 = vmax.f32 %v4746_v32, 0.0  ;;  %v7110_v53 = vpop.f32.mrf.mxu1  ;;  %v4030_v40 = vor.u32 %v4029_v37, %v4026_v7 }
 0x275   : > { %v4239_v63 = vpop.f32.mrf.mxu3  ;;  %5294 = vmatmul.msk.bf16.gmra.mxu2 %vm1312_vm12, %v5398_v36  ;;  %v4637_v29 = vpop.f32.mrf.mxu0  ;;  %v4039_v36 = vrot.slane %v4037_v62, 4  ;;  %v4488_v62 = vsel %vm6340_vm0, %v4486_v61, %v4487_v14  ;;  %v7431_v61 = vld [vmem:[#allocation11_spill] sm:$0xff] }
 0x276   : > { %v4810_v27 = vpack.c.bf16 %v4778_v60, %v4778_v60  ;;  %v4313_v56 = vadd.f32 %v4239_v63, %v3659_v55  ;;  %v4144_v55 = vunpack.c.l.b16 %v4022_v48  ;;  %v3224_v60 = vpack.c.b16 %v3205_v52, %v3204_v6  ;;  %v3015_v52 = vld [vmem:[#allocation2 + $0xa8] sm:$0xe] }
 0x277   : > { %v4040_v30 = vor.u32 %v4039_v36, %v7123_v5  ;;  %v4541_v48 = vunpack.c.l.b16 %v4485_v35  ;;  %v4542_v24 = vunpack.c.l.b16 %v4488_v62  ;;  %v3374_v14 = vadd.f32 %v7094_v23, %v7431_v61  ;;  %v3726_v62 = vld [vmem:[#allocation2 + $0xb4] sm:$0xf] }
 0x278   : > { %4843 = vst.msk [vmem:[%s7056_s23 + $0xc] sm:$0xf] %vm4839_vm1, %v4810_v27  ;;  %v4711_v32 = vadd.f32 %v4637_v29, %v4313_v56  ;;  %v3590_v18 = vpop.f32.mrf.mxu2  ;;  %5343 = vmatmul.msk.bf16.gmra.mxu0 %vm1312_vm12, %v4561_v19  ;;  %v4164_v50 = vpack.c.b16 %v4144_v55, %v4143_v42  ;;  %v4031_v7 = vrot.slane %v4030_v40, 4  ;;  %v4045_v6 = vrot.slane %v4043_v31, 5  ;;  %v5584_v55 = vld [vmem:[#allocation2 + $0xb0] sm:$0x1] }
 0x279   : > { %v4041_v37 = vrot.slane %v4040_v30, 4  ;;  %v5198_v33 = vrot.slane %v3015_v52, 9  ;;  %v3661_v23 = vadd.f32 %v3590_v18, %v3374_v14  ;;  %v4562_v40 = vpack.c.b16 %v4542_v24, %v4541_v48 }
 0x27a   : > { %v4747_v43 = vadd.f32 %v7026_v9, %v4711_v32  ;;  %v3159_v32 = vrot.slane %v5583_v16, 5  ;;  %v4036_v30 = vsel %vm5852_vm13, %v4031_v7, %v7123_v5  ;;  %v4048_v5 = vshrl.u32 %v3726_v62, 16 }
 0x27b   : > { %v4046_v31 = vsel %vm5852_vm13, %v4041_v37, %v4045_v6  ;;  %v4145_v37 = vunpack.c.l.b16 %v4036_v30 }
 0x27c   : > { %v4779_v63 = vmax.f32 %v4747_v43, 0.0  ;;  %v7139_v27 = vpop.f32.mrf.mxu1  ;;  %v3161_v42 = vrot.slane %v3159_v32, 4  ;;  %v3162_v43 = vrot.slane %v5584_v55, 5  ;;  %v3160_v18 = vsel %vm6340_vm0, %v5198_v33, %v3159_v32 }
 0x27d   : > { %v4241_v19 = vpop.f32.mrf.mxu3  ;;  %v4639_v29 = vpop.f32.mrf.mxu0  ;;  %v4146_v6 = vunpack.c.l.b16 %v4046_v31  ;;  %v3206_v32 = vunpack.c.l.b16 %v3160_v18  ;;  %v3375_v33 = vadd.f32 %v7110_v53, %v6640_v39  ;;  %v4494_v55 = vrot.slane %v7129_v0, 5 }
 0x27e   : > { %v4811_v51 = vpack.c.bf16 %v4779_v63, %v4779_v63  ;;  %v4314_v56 = vadd.f32 %v4241_v19, %v3660_v59  ;;  %v5399_v59 = vld [vmem:[#allocation2 + $0xa8] sm:$0xff] }
 0x27f   : > { %5214 = vmatmul.msk.bf16.gmra.mxu1 %vm1312_vm12, %v3224_v60  ;;  %v7148_v60 = vld [vmem:[#allocation2 + $0xb8] sm:$0xf]  ;;  %v4353_v63 = vld [vmem:[#allocation2 + $0xa8] sm:$0xe] }
 0x280   : > { %4844 = vst.msk [vmem:[%s7056_s23 + $0x10] sm:$0xf] %vm4839_vm1, %v4811_v51  ;;  %v4712_v36 = vadd.f32 %v4639_v29, %v4314_v56  ;;  %v3592_v46 = vpop.f32.mrf.mxu2  ;;  %v4491_v51 = vrot.slane %v7101_v25, 5  ;;  %v4051_v56 = vshll.u32 %v3726_v62, 16  ;;  %v4057_v24 = vshll.u32 %v7148_v60, 16 }
 0x281   : > { %v4061_v16 = vshrl.u32 %v7148_v60, 16  ;;  %v5328_v7 = vrot.slane %v4353_v63, 9  ;;  %v3662_v31 = vadd.f32 %v3592_v46, %v3375_v33 }
 0x282   : > { %v4748_v35 = vadd.f32 %v7026_v9, %v4712_v36  ;;  %5311 = vmatmul.msk.bf16.gmra.mxu3 %vm1312_vm12, %v4164_v50  ;;  %v3163_v50 = vsel %vm6340_vm0, %v3161_v42, %v3162_v43  ;;  %v4493_v42 = vrot.slane %v4491_v51, 4 }
 0x283   : > { %v3207_v52 = vunpack.c.l.b16 %v3163_v50  ;;  %v4063_v62 = vrot.slane %v4061_v16, 4  ;;  %v4165_v50 = vpack.c.b16 %v4146_v6, %v4145_v37  ;;  %v4492_v0 = vsel %vm6340_vm0, %v5328_v7, %v4491_v51  ;;  %v3016_v37 = vld [vmem:[#allocation2 + $0xb4] sm:$0xe]  ;;  %v3729_v51 = vld [vmem:[#allocation2 + $0xc0] sm:$0xf] }
 0x284   : > { %v4780_v19 = vmax.f32 %v4748_v35, 0.0  ;;  %v7156_v29 = vpop.f32.mrf.mxu1  ;;  %v4053_v35 = vrot.slane %v4051_v56, 5 }
 0x285   : > { %v4244_v48 = vpop.f32.mrf.mxu3  ;;  %5295 = vmatmul.msk.bf16.gmra.mxu2 %vm1312_vm12, %v5399_v59  ;;  %v4642_v25 = vpop.f32.mrf.mxu0  ;;  %v4050_v59 = vrot.slane %v4048_v5, 4  ;;  %v3225_v63 = vpack.c.b16 %v3207_v52, %v3206_v32  ;;  %v5199_v32 = vrot.slane %v3016_v37, 9 }
 0x286   : > { %v4812_v61 = vpack.c.bf16 %v4780_v19, %v4780_v19  ;;  %v4315_v14 = vadd.f32 %v4244_v48, %v3661_v23  ;;  %v7171_v23 = vrot.slane %v4057_v24, 5  ;;  %v7174_v19 = vld [vmem:[#allocation2 + $0xbc] sm:$0x1] }
 0x287   : > { %v4054_v48 = vor.u32 %v4053_v35, %v4050_v59  ;;  %v4067_v16 = vshll.u32 %v7174_v19, 16  ;;  %v5400_v59 = vld [vmem:[#allocation2 + $0xb4] sm:$0xff] }
 0x288   : > { %4845 = vst.msk [vmem:[%s7056_s23 + $0x14] sm:$0xf] %vm4839_vm1, %v4812_v61  ;;  %v4713_v36 = vadd.f32 %v4642_v25, %v4315_v14  ;;  %v3595_v43 = vpop.f32.mrf.mxu2  ;;  %5344 = vmatmul.msk.bf16.gmra.mxu0 %vm1312_vm12, %v4562_v40  ;;  %v4495_v40 = vsel %vm6340_vm0, %v4493_v42, %v4494_v55  ;;  %v4064_v5 = vor.u32 %v4063_v62, %v7171_v23  ;;  %v5585_v61 = vld [vmem:[#allocation2 + $0xb8] sm:$0xf]  ;;  %v4543_v42 = vunpack.c.l.b16 %v4492_v0 }
 0x289   : > { %v3166_v25 = vrot.slane %v5585_v61, 5  ;;  %v3376_v14 = vadd.f32 %v7139_v27, %v6646_v26  ;;  %v4544_v55 = vunpack.c.l.b16 %v4495_v40  ;;  %v4055_v35 = vrot.slane %v4054_v48, 4 }
 0x28a   : > { %v4749_v30 = vadd.f32 %v7026_v9, %v4713_v36  ;;  %v5586_v36 = vld [vmem:[#allocation2 + $0xbc] sm:$0x1]  ;;  %v4065_v27 = vrot.slane %v4064_v5, 4 }
 0x28b   : > { %v3168_v52 = vrot.slane %v3166_v25, 4  ;;  %v3169_v33 = vrot.slane %v5586_v36, 5  ;;  %v3663_v26 = vadd.f32 %v3595_v43, %v3376_v14  ;;  %v3167_v0 = vsel %vm6340_vm0, %v5199_v32, %v3166_v25 }
 0x28c   : > { %v4781_v18 = vmax.f32 %v4749_v30, 0.0  ;;  %v7176_v39 = vpop.f32.mrf.mxu1  ;;  %v4069_v30 = vrot.slane %v4067_v16, 5  ;;  %v4563_v43 = vpack.c.b16 %v4544_v55, %v4543_v42  ;;  %v4060_v25 = vsel %vm5852_vm13, %v4055_v35, %v7171_v23 }
 0x28d   : > { %v4246_v53 = vpop.f32.mrf.mxu3  ;;  %v4644_v46 = vpop.f32.mrf.mxu0  ;;  %v3170_v40 = vsel %vm6340_vm0, %v3168_v52, %v3169_v33  ;;  %v3377_v33 = vadd.f32 %v7156_v29, %v6661_v47  ;;  %v4501_v55 = vrot.slane %v7174_v19, 5 }
 0x28e   : > { %v4813_v56 = vpack.c.bf16 %v4781_v18, %v4781_v18  ;;  %v4316_v24 = vadd.f32 %v4246_v53, %v3662_v31  ;;  %v4354_v31 = vld [vmem:[#allocation2 + $0xb4] sm:$0xe]  ;;  %v4072_v18 = vshrl.u32 %v3729_v51, 16  ;;  %v4075_v53 = vshll.u32 %v3729_v51, 16 }
 0x28f   : > { %5215 = vmatmul.msk.bf16.gmra.mxu1 %vm1312_vm12, %v3225_v63  ;;  %v7191_v63 = vld [vmem:[#allocation2 + $0xc4] sm:$0xf]  ;;  %v5329_v48 = vrot.slane %v4354_v31, 9  ;;  %v4070_v37 = vsel %vm5852_vm13, %v4065_v27, %v4069_v30  ;;  %v3208_v51 = vunpack.c.l.b16 %v3167_v0  ;;  %v4147_v27 = vunpack.c.l.b16 %v4060_v25  ;;  %v7217_v31 = vld [vmem:[#allocation2 + $0xc8] sm:$0x1] }
 0x290   : > { %4846 = vst.msk [vmem:[%s7056_s23 + $0x18] sm:$0xf] %vm4839_vm1, %v4813_v56  ;;  %v4714_v7 = vadd.f32 %v4644_v46, %v4316_v24  ;;  %v3597_v6 = vpop.f32.mrf.mxu2  ;;  %v4498_v46 = vrot.slane %v7148_v60, 5  ;;  %v4081_v5 = vshll.u32 %v7191_v63, 16  ;;  %v4085_v16 = vshrl.u32 %v7191_v63, 16 }
 0x291   : > { %v4074_v32 = vrot.slane %v4072_v18, 4  ;;  %v4077_v52 = vrot.slane %v4075_v53, 5  ;;  %v4148_v30 = vunpack.c.l.b16 %v4070_v37  ;;  %v3017_v37 = vld [vmem:[#allocation2 + $0xc0] sm:$0xe] }
 0x292   : > { %v4750_v62 = vadd.f32 %v7026_v9, %v4714_v7  ;;  %5312 = vmatmul.msk.bf16.gmra.mxu3 %vm1312_vm12, %v4165_v50  ;;  %v3209_v7 = vunpack.c.l.b16 %v3170_v40  ;;  %v4500_v42 = vrot.slane %v4498_v46, 4  ;;  %v7214_v23 = vrot.slane %v4081_v5, 5 }
 0x293   : > { %v4087_v35 = vrot.slane %v4085_v16, 4  ;;  %v4078_v53 = vor.u32 %v4077_v52, %v4074_v32  ;;  %v4499_v47 = vsel %vm6340_vm0, %v5329_v48, %v4498_v46  ;;  %v4166_v16 = vpack.c.b16 %v4148_v30, %v4147_v27  ;;  %v7234_v27 = vld [vmem:[#allocation2 + $0xd0] sm:$0xf] }
 0x294   : > { %v4782_v56 = vmax.f32 %v4750_v62, 0.0  ;;  %v7194_v24 = vpop.f32.mrf.mxu1  ;;  %v3226_v18 = vpack.c.b16 %v3209_v7, %v3208_v51  ;;  %v4502_v29 = vsel %vm6340_vm0, %v4500_v42, %v4501_v55  ;;  %v3378_v46 = vadd.f32 %v7176_v39, %v6666_v28  ;;  %v5401_v42 = vld [vmem:[#allocation2 + $0xc0] sm:$0xff]  ;;  %v3732_v39 = vld [vmem:[#allocation2 + $0xcc] sm:$0xf] }
 0x295   : > { %v4249_v50 = vpop.f32.mrf.mxu3  ;;  %5296 = vmatmul.msk.bf16.gmra.mxu2 %vm1312_vm12, %v5400_v59  ;;  %v4647_v60 = vpop.f32.mrf.mxu0  ;;  %v4088_v40 = vor.u32 %v4087_v35, %v7214_v23  ;;  %v4545_v48 = vunpack.c.l.b16 %v4499_v47  ;;  %v4079_v25 = vrot.slane %v4078_v53, 4  ;;  %v5200_v32 = vrot.slane %v3017_v37, 9  ;;  %v4355_v53 = vld [vmem:[#allocation2 + $0xc0] sm:$0xe] }
 0x296   : > { %v4814_v61 = vpack.c.bf16 %v4782_v56, %v4782_v56  ;;  %v4317_v14 = vadd.f32 %v4249_v50, %v3663_v26  ;;  %v3664_v26 = vadd.f32 %v3597_v6, %v3377_v33  ;;  %v4091_v6 = vshll.u32 %v7217_v31, 16 }
 0x297   : > { %v4089_v55 = vrot.slane %v4088_v40, 4  ;;  %v4505_v40 = vrot.slane %v7191_v63, 5 }
 0x298   : > { %4847 = vst.msk [vmem:[%s7056_s23 + $0x1c] sm:$0xf] %vm4839_vm1, %v4814_v61  ;;  %v4715_v36 = vadd.f32 %v4647_v60, %v4317_v14  ;;  %v3600_v59 = vpop.f32.mrf.mxu2  ;;  %5345 = vmatmul.msk.bf16.gmra.mxu0 %vm1312_vm12, %v4563_v43  ;;  %v5587_v61 = vld [vmem:[#allocation2 + $0xc4] sm:$0xf]  ;;  %v4546_v14 = vunpack.c.l.b16 %v4502_v29  ;;  %v4093_v35 = vrot.slane %v4091_v6, 5  ;;  %v4096_v6 = vshrl.u32 %v3732_v39, 16 }
 0x299   : > { %v3173_v60 = vrot.slane %v5587_v61, 5  ;;  %v3665_v28 = vadd.f32 %v3600_v59, %v3378_v46  ;;  %v4109_v61 = vshrl.u32 %v7234_v27, 16 }
 0x29a   : > { %v4751_v62 = vadd.f32 %v7026_v9, %v4715_v36  ;;  %v5588_v36 = vld [vmem:[#allocation2 + $0xc8] sm:$0x1] }
 0x29b   : > { %v3175_v52 = vrot.slane %v3173_v60, 4  ;;  %v3176_v33 = vrot.slane %v5588_v36, 5  ;;  %v3174_v47 = vsel %vm6340_vm0, %v5200_v32, %v3173_v60  ;;  %v5330_v60 = vrot.slane %v4355_v53, 9 }
 0x29c   : > { %v4783_v56 = vmax.f32 %v4751_v62, 0.0  ;;  %v7223_v19 = vpop.f32.mrf.mxu1  ;;  %v3210_v46 = vunpack.c.l.b16 %v3174_v47  ;;  %v4507_v32 = vrot.slane %v4505_v40, 4  ;;  %v4098_v36 = vrot.slane %v4096_v6, 4 }
 0x29d   : > { %v4251_v0 = vpop.f32.mrf.mxu3  ;;  %v4649_v50 = vpop.f32.mrf.mxu0  ;;  %v3177_v29 = vsel %vm6340_vm0, %v3175_v52, %v3176_v33  ;;  %v4508_v52 = vrot.slane %v7217_v31, 5 }
 0x29e   : > { %v4815_v43 = vpack.c.bf16 %v4783_v56, %v4783_v56  ;;  %v4318_v5 = vadd.f32 %v4251_v0, %v3664_v26  ;;  %v4564_v26 = vpack.c.b16 %v4546_v14, %v4545_v48  ;;  %v4094_v0 = vsel %vm5852_vm13, %v4089_v55, %v4093_v35 }
 0x29f   : > { %5216 = vmatmul.msk.bf16.gmra.mxu1 %vm1312_vm12, %v3226_v18  ;;  %v4084_v18 = vsel %vm5852_vm13, %v4079_v25, %v7214_v23  ;;  %v4099_v23 = vshll.u32 %v3732_v39, 16  ;;  %v3211_v48 = vunpack.c.l.b16 %v3177_v29  ;;  %v3379_v25 = vadd.f32 %v7194_v24, %v6679_v38  ;;  %v3734_v39 = vld [vmem:[#allocation2 + $0xd4] sm:$0x1] }
 0x2a0   : > { %4848 = vst.msk [vmem:[%s7056_s23 + $0x20] sm:$0xf] %vm4839_vm1, %v4815_v43  ;;  %v4716_v51 = vadd.f32 %v4649_v50, %v4318_v5  ;;  %v3602_v7 = vpop.f32.mrf.mxu2  ;;  %v4149_v37 = vunpack.c.l.b16 %v4084_v18  ;;  %v4150_v63 = vunpack.c.l.b16 %v4094_v0  ;;  %v4509_v31 = vsel %vm6340_vm0, %v4507_v32, %v4508_v52 }
 0x2a1   : > { %v4101_v33 = vrot.slane %v4099_v23, 5  ;;  %v3666_v55 = vadd.f32 %v3602_v7, %v3379_v25  ;;  %v4115_v0 = vshll.u32 %v3734_v39, 16  ;;  %v3380_v23 = vadd.f32 %v7223_v19, %v6692_v45 }
 0x2a2   : > { %v4752_v62 = vadd.f32 %v7026_v9, %v4716_v51  ;;  %5313 = vmatmul.msk.bf16.gmra.mxu3 %vm1312_vm12, %v4166_v16  ;;  %v4105_v16 = vshll.u32 %v7234_v27, 16  ;;  %v4167_v18 = vpack.c.b16 %v4150_v63, %v4149_v37 }
 0x2a3   : > { %v4102_v53 = vor.u32 %v4101_v33, %v4098_v36  ;;  %v4356_v33 = vld [vmem:[#allocation2 + $0xcc] sm:$0xe] }
 0x2a4   : > { %v4784_v30 = vmax.f32 %v4752_v62, 0.0  ;;  %v7239_v56 = vpop.f32.mrf.mxu1  ;;  %v4107_v35 = vrot.slane %v4105_v16, 5  ;;  %v4111_v62 = vrot.slane %v4109_v61, 4 }
 0x2a5   : > { %v4254_v59 = vpop.f32.mrf.mxu3  ;;  %5297 = vmatmul.msk.bf16.gmra.mxu2 %vm1312_vm12, %v5401_v42  ;;  %v4652_v50 = vpop.f32.mrf.mxu0  ;;  %v4103_v16 = vrot.slane %v4102_v53, 4 }
 0x2a6   : > { %v4816_v43 = vpack.c.bf16 %v4784_v30, %v4784_v30  ;;  %v4319_v5 = vadd.f32 %v4254_v59, %v3665_v28  ;;  %v3227_v28 = vpack.c.b16 %v3211_v48, %v3210_v46  ;;  %v4112_v7 = vor.u32 %v4111_v62, %v4107_v35 }
 0x2a7   : > { %v4117_v48 = vrot.slane %v4115_v0, 5  ;;  %v4108_v45 = vsel %vm5852_vm13, %v4103_v16, %v4107_v35 }
 0x2a8   : > { %4849 = vst.msk [vmem:[%s7056_s23 + $0x24] sm:$0xf] %vm4839_vm1, %v4816_v43  ;;  %v4717_v14 = vadd.f32 %v4652_v50, %v4319_v5  ;;  %v3605_v51 = vpop.f32.mrf.mxu2  ;;  %5346 = vmatmul.msk.bf16.gmra.mxu0 %vm1312_vm12, %v4564_v26  ;;  %v4506_v26 = vsel %vm6340_vm0, %v5330_v60, %v4505_v40  ;;  %v4548_v40 = vunpack.c.l.b16 %v4509_v31  ;;  %v5402_v5 = vld [vmem:[#allocation2 + $0xcc] sm:$0xff]  ;;  %v4113_v46 = vrot.slane %v4112_v7, 4 }
 0x2a9   : > { %v4547_v50 = vunpack.c.l.b16 %v4506_v26  ;;  %v3667_v60 = vadd.f32 %v3605_v51, %v3380_v23  ;;  %v4512_v51 = vrot.slane %v7234_v27, 5  ;;  %v4515_v26 = vrot.slane %v3734_v39, 5 }
 0x2aa   : > { %v4753_v42 = vadd.f32 %v7026_v9, %v4717_v14  ;;  %v4118_v36 = vsel %vm5852_vm13, %v4113_v46, %v4117_v48 }
 0x2ab   : > { %v4565_v37 = vpack.c.b16 %v4548_v40, %v4547_v50  ;;  %v4152_v35 = vunpack.c.l.b16 %v4118_v36 }
 0x2ac   : > { %v4785_v30 = vmax.f32 %v4753_v42, 0.0  ;;  %v3323_v38 = vpop.f32.mrf.mxu1 }
 0x2ad   : > { %v4256_v24 = vpop.f32.mrf.mxu3  ;;  %v4654_v29 = vpop.f32.mrf.mxu0 }
 0x2ae   : > { %v4817_v47 = vpack.c.bf16 %v4785_v30, %v4785_v30  ;;  %v4320_v59 = vadd.f32 %v4256_v24, %v3666_v55  ;;  %v3381_v55 = vadd.f32 %v7239_v56, %v6707_v17  ;;  %v5331_v30 = vrot.slane %v4356_v33, 9 }
 0x2af   : > { %5217 = vmatmul.msk.bf16.gmra.mxu1 %vm1312_vm12, %v3227_v28  ;;  %v4151_v28 = vunpack.c.l.b16 %v4108_v45 }
 0x2b0   : > { %4850 = vst.msk [vmem:[%s7056_s23 + $0x28] sm:$0xf] %vm4839_vm1, %v4817_v47  ;;  %v4718_v6 = vadd.f32 %v4654_v29, %v4320_v59  ;;  %v3607_v43 = vpop.f32.mrf.mxu2  ;;  %v4513_v17 = vsel %vm6340_vm0, %v5331_v30, %v4512_v51 }
 0x2b1   : > { %v3668_v10 = vadd.f32 %v3607_v43, %v3381_v55  ;;  %v4168_v47 = vpack.c.b16 %v4152_v35, %v4151_v28  ;;  %v4549_v23 = vunpack.c.l.b16 %v4513_v17 }
 0x2b2   : > { %v4754_v61 = vadd.f32 %v7026_v9, %v4718_v6  ;;  %5314 = vmatmul.msk.bf16.gmra.mxu3 %vm1312_vm12, %v4167_v18  ;;  %v4514_v18 = vrot.slane %v4512_v51, 4  ;;  %v3382_v6 = vadd.f32 %v3323_v38, %v6726_v2 }
 0x2b4   : > { %v4786_v14 = vmax.f32 %v4754_v61, 0.0  ;;  %v3325_v25 = vpop.f32.mrf.mxu1  ;;  %v4516_v56 = vsel %vm6340_vm0, %v4514_v18, %v4515_v26 }
 0x2b5   : > { %v4259_v63 = vpop.f32.mrf.mxu3  ;;  %5298 = vmatmul.msk.bf16.gmra.mxu2 %vm1312_vm12, %v5402_v5  ;;  %v4657_v32 = vpop.f32.mrf.mxu0  ;;  %v4550_v43 = vunpack.c.l.b16 %v4516_v56  ;;  %v3383_v2 = vadd.f32 %v3325_v25, %v6739_v13 }
 0x2b6   : > { %v4818_v19 = vpack.c.bf16 %v4786_v14, %v4786_v14  ;;  %v4321_v52 = vadd.f32 %v4259_v63, %v3667_v60 }
 0x2b7   : > { %v4566_v61 = vpack.c.b16 %v4550_v43, %v4549_v23 }
 0x2b8   : > { %4851 = vst.msk [vmem:[%s7056_s23 + $0x2c] sm:$0xf] %vm4839_vm1, %v4818_v19  ;;  %v4719_v42 = vadd.f32 %v4657_v32, %v4321_v52  ;;  %v3610_v62 = vpop.f32.mrf.mxu2  ;;  %5347 = vmatmul.msk.bf16.gmra.mxu0 %vm1312_vm12, %v4565_v37 }
 0x2b9   : > { %v3669_v40 = vadd.f32 %v3610_v62, %v3382_v6 }
 0x2ba   : > { %v4755_v24 = vadd.f32 %v7026_v9, %v4719_v42 }
 0x2bc   : > { %v4787_v31 = vmax.f32 %v4755_v24, 0.0  ;;  %v3328_v27 = vpop.f32.mrf.mxu1 }
 0x2bd   : > { %v4261_v53 = vpop.f32.mrf.mxu3  ;;  %v4659_v59 = vpop.f32.mrf.mxu0  ;;  %v3384_v42 = vadd.f32 %v3328_v27, %v6757_v57 }
 0x2be   : > { %v4819_v29 = vpack.c.bf16 %v4787_v31, %v4787_v31  ;;  %v4322_v7 = vadd.f32 %v4261_v53, %v3668_v10 }
 0x2c0   : > { %4852 = vst.msk [vmem:[%s7056_s23 + $0x30] sm:$0xf] %vm4839_vm1, %v4819_v29  ;;  %v4720_v0 = vadd.f32 %v4659_v59, %v4322_v7  ;;  %v3612_v39 = vpop.f32.mrf.mxu2 }
 0x2c1   : > { %v3670_v63 = vadd.f32 %v3612_v39, %v3383_v2 }
 0x2c2   : > { %v4756_v50 = vadd.f32 %v7026_v9, %v4720_v0  ;;  %5315 = vmatmul.msk.bf16.gmra.mxu3 %vm1312_vm12, %v4168_v47 }
 0x2c4   : > { %v4788_v5 = vmax.f32 %v4756_v50, 0.0  ;;  %v3330_v16 = vpop.f32.mrf.mxu1 }
 0x2c5   : > { %v4264_v60 = vpop.f32.mrf.mxu3  ;;  %v4662_v46 = vpop.f32.mrf.mxu0  ;;  %v3385_v26 = vadd.f32 %v3330_v16, %v6773_v21 }
 0x2c6   : > { %v4820_v54 = vpack.c.bf16 %v4788_v5, %v4788_v5  ;;  %v4323_v48 = vadd.f32 %v4264_v60, %v3669_v40 }
 0x2c8   : > { %4853 = vst.msk [vmem:[%s7056_s23 + $0x34] sm:$0xf] %vm4839_vm1, %v4820_v54  ;;  %v4721_v14 = vadd.f32 %v4662_v46, %v4323_v48  ;;  %v3615_v38 = vpop.f32.mrf.mxu2  ;;  %5348 = vmatmul.msk.bf16.gmra.mxu0 %vm1312_vm12, %v4566_v61 }
 0x2c9   : > { %v3671_v25 = vadd.f32 %v3615_v38, %v3384_v42 }
 0x2ca   : > { %v4757_v37 = vadd.f32 %v7026_v9, %v4721_v14 }
 0x2cc   : > { %v4789_v45 = vmax.f32 %v4757_v37, 0.0  ;;  %v3333_v19 = vpop.f32.mrf.mxu1 }
 0x2cd   : > { %v4266_v32 = vpop.f32.mrf.mxu3  ;;  %v4664_v36 = vpop.f32.mrf.mxu0  ;;  %v3386_v0 = vadd.f32 %v3333_v19, %v6792_v20 }
 0x2ce   : > { %v4821_v52 = vpack.c.bf16 %v4789_v45, %v4789_v45  ;;  %v4324_v33 = vadd.f32 %v4266_v32, %v3670_v63 }
 0x2d0   : > { %4854 = vst.msk [vmem:[%s7056_s23 + $0x38] sm:$0xf] %vm4839_vm1, %v4821_v52  ;;  %v4722_v51 = vadd.f32 %v4664_v36, %v4324_v33  ;;  %v3617_v55 = vpop.f32.mrf.mxu2 }
 0x2d1   : > { %v3672_v57 = vadd.f32 %v3617_v55, %v3385_v26 }
 0x2d2   : > { %v4758_v13 = vadd.f32 %v7026_v9, %v4722_v51 }
 0x2d4   : > { %v4790_v62 = vmax.f32 %v4758_v13, 0.0  ;;  %v3335_v28 = vpop.f32.mrf.mxu1 }
 0x2d5   : > { %v4269_v35 = vpop.f32.mrf.mxu3  ;;  %v4667_v24 = vpop.f32.mrf.mxu0  ;;  %v3387_v60 = vadd.f32 %v3335_v28, %v6805_v8  ;;  %v7317_v8 = vld [vmem:[%s7405_s2] ss:$0 sm:$0xff] }
 0x2d6   : > { %v4822_v30 = vpack.c.bf16 %v4790_v62, %v4790_v62  ;;  %v4325_v10 = vadd.f32 %v4269_v35, %v3671_v25 }
 0x2d8   : > { %4855 = vst.msk [vmem:[%s7056_s23 + $0x3c] sm:$0xf] %vm4839_vm1, %v4822_v30  ;;  %v4723_v18 = vadd.f32 %v4667_v24, %v4325_v10  ;;  %v3620_v31 = vpop.f32.mrf.mxu2 }
 0x2d9   : > { %v3673_v21 = vadd.f32 %v3620_v31, %v3386_v0 }
 0x2da   : > { %v4759_v53 = vadd.f32 %v7026_v9, %v4723_v18 }
 0x2dc   : > { %v4791_v27 = vmax.f32 %v4759_v53, 0.0  ;;  %v3338_v47 = vpop.f32.mrf.mxu1 }
 0x2dd   : > { %v4271_v29 = vpop.f32.mrf.mxu3  ;;  %v4669_v7 = vpop.f32.mrf.mxu0  ;;  %v3388_v19 = vadd.f32 %v3338_v47, %v6823_v3 }
 0x2de   : > { %v4823_v59 = vpack.c.bf16 %v4791_v27, %v4791_v27  ;;  %v4326_v17 = vadd.f32 %v4271_v29, %v3672_v57 }
 0x2e0   : > { %4856 = vst.msk [vmem:[%s7056_s23 + $0x40] sm:$0xf] %vm4839_vm1, %v4823_v59  ;;  %v4724_v56 = vadd.f32 %v4669_v7, %v4326_v17  ;;  %v3622_v6 = vpop.f32.mrf.mxu2 }
 0x2e1   : > { %v3674_v20 = vadd.f32 %v3622_v6, %v3387_v60 }
 0x2e2   : > { %v4760_v39 = vadd.f32 %v7026_v9, %v4724_v56 }
 0x2e4   : > { %v4792_v23 = vmax.f32 %v4760_v39, 0.0  ;;  %v3340_v43 = vpop.f32.mrf.mxu1 }
 0x2e5   : > { %v4274_v50 = vpop.f32.mrf.mxu3  ;;  %v4672_v5 = vpop.f32.mrf.mxu0  ;;  %v3389_v3 = vadd.f32 %v3340_v43, %v6839_v12 }
 0x2e6   : > { %v4824_v40 = vpack.c.bf16 %v4792_v23, %v4792_v23  ;;  %v4327_v16 = vadd.f32 %v4274_v50, %v3673_v21 }
 0x2e8   : > { %4857 = vst.msk [vmem:[%s7056_s23 + $0x44] sm:$0xf] %vm4839_vm1, %v4824_v40  ;;  %v4725_v61 = vadd.f32 %v4672_v5, %v4327_v16  ;;  %v3625_v54 = vpop.f32.mrf.mxu2 }
 0x2e9   : > { %v3675_v52 = vadd.f32 %v3625_v54, %v3388_v19 }
 0x2ea   : > { %v4761_v46 = vadd.f32 %v7026_v9, %v4725_v61 }
 0x2ec   : > { %v4793_v48 = vmax.f32 %v4761_v46, 0.0  ;;  %v3343_v14 = vpop.f32.mrf.mxu1 }
 0x2ed   : > { %v4276_v2 = vpop.f32.mrf.mxu3  ;;  %v4674_v37 = vpop.f32.mrf.mxu0  ;;  %v3390_v57 = vadd.f32 %v3343_v14, %v6858_v44 }
 0x2ee   : > { %v4825_v38 = vpack.c.bf16 %v4793_v48, %v4793_v48  ;;  %v4328_v63 = vadd.f32 %v4276_v2, %v3674_v20 }
 0x2f0   : > { %4858 = vst.msk [vmem:[%s7056_s23 + $0x48] sm:$0xf] %vm4839_vm1, %v4825_v38  ;;  %v4726_v45 = vadd.f32 %v4674_v37, %v4328_v63  ;;  %v3627_v32 = vpop.f32.mrf.mxu2 }
 0x2f1   : > { %v3676_v35 = vadd.f32 %v3627_v32, %v3389_v3 }
 0x2f2   : > { %v4762_v9 = vadd.f32 %v7317_v8, %v4726_v45 }
 0x2f4   : > { %v4794_v36 = vmax.f32 %v4762_v9, 0.0  ;;  %v3345_v51 = vpop.f32.mrf.mxu1 }
 0x2f5   : > { %v4279_v33 = vpop.f32.mrf.mxu3  ;;  %v4677_v55 = vpop.f32.mrf.mxu0  ;;  %v3391_v6 = vadd.f32 %v3345_v51, %v6871_v11 }
 0x2f6   : > { %v4826_v42 = vpack.c.bf16 %v4794_v36, %v4794_v36  ;;  %v4329_v13 = vadd.f32 %v4279_v33, %v3675_v52 }
 0x2f8   : > { %4859 = vst.msk [vmem:[%s7056_s23 + $0x4c] sm:$0xf] %vm4839_vm1, %v4826_v42  ;;  %v4727_v25 = vadd.f32 %v4677_v55, %v4329_v13  ;;  %v3630_v62 = vpop.f32.mrf.mxu2 }
 0x2f9   : > { %v3677_v12 = vadd.f32 %v3630_v62, %v3390_v57 }
 0x2fa   : > { %v4763_v28 = vadd.f32 %v7317_v8, %v4727_v25 }
 0x2fc   : > { %v4795_v30 = vmax.f32 %v4763_v28, 0.0  ;;  %v3348_v31 = vpop.f32.mrf.mxu1 }
 0x2fd   : > { %v4281_v24 = vpop.f32.mrf.mxu3  ;;  %v4679_v18 = vpop.f32.mrf.mxu0  ;;  %v3392_v60 = vadd.f32 %v3348_v31, %v6889_v34 }
 0x2fe   : > { %v4827_v10 = vpack.c.bf16 %v4795_v30, %v4795_v30  ;;  %v4330_v26 = vadd.f32 %v4281_v24, %v3676_v35 }
 0x300   : > { %4860 = vst.msk [vmem:[%s7056_s23 + $0x50] sm:$0xf] %vm4839_vm1, %v4827_v10  ;;  %v4728_v53 = vadd.f32 %v4679_v18, %v4330_v26  ;;  %v3632_v27 = vpop.f32.mrf.mxu2 }
 0x301   : > { %v3678_v44 = vadd.f32 %v3632_v27, %v3391_v6 }
 0x302   : > { %v4764_v47 = vadd.f32 %v7317_v8, %v4728_v53 }
 0x304   : > { %v4796_v29 = vmax.f32 %v4764_v47, 0.0  ;;  %v3350_v21 = vpop.f32.mrf.mxu1 }
 0x305   : > { %v4284_v59 = vpop.f32.mrf.mxu3  ;;  %v4682_v17 = vpop.f32.mrf.mxu0  ;;  %v3393_v45 = vadd.f32 %v3350_v21, %v6905_v58 }
 0x306   : > { %v4828_v7 = vpack.c.bf16 %v4796_v29, %v4796_v29  ;;  %v4331_v56 = vadd.f32 %v4284_v59, %v3677_v12 }
 0x308   : > { %4861 = vst.msk [vmem:[%s7056_s23 + $0x54] sm:$0xf] %vm4839_vm1, %v4828_v7  ;;  %v4729_v0 = vadd.f32 %v4682_v17, %v4331_v56  ;;  %v3635_v39 = vpop.f32.mrf.mxu2 }
 0x309   : > { %v3679_v11 = vadd.f32 %v3635_v39, %v3392_v60 }
 0x30a   : > { %v4765_v23 = vadd.f32 %v7317_v8, %v4729_v0 }
 0x30c   : > { %v4797_v43 = vmax.f32 %v4765_v23, 0.0  ;;  %v3353_v20 = vpop.f32.mrf.mxu1 }
 0x30d   : > { %v4286_v50 = vpop.f32.mrf.mxu3  ;;  %v4684_v5 = vpop.f32.mrf.mxu0  ;;  %v3394_v13 = vadd.f32 %v3353_v20, %v6925_v22 }
 0x30e   : > { %v4829_v40 = vpack.c.bf16 %v4797_v43, %v4797_v43  ;;  %v4332_v16 = vadd.f32 %v4286_v50, %v3678_v44 }
 0x310   : > { %4862 = vst.msk [vmem:[%s7056_s23 + $0x58] sm:$0xf] %vm4839_vm1, %v4829_v40  ;;  %v4730_v61 = vadd.f32 %v4684_v5, %v4332_v16  ;;  %v3637_v54 = vpop.f32.mrf.mxu2 }
 0x311   : > { %v3680_v34 = vadd.f32 %v3637_v54, %v3393_v45 }
 0x312   : > { %v4766_v46 = vadd.f32 %v7317_v8, %v4730_v61 }
 0x314   : > { %v4798_v48 = vmax.f32 %v4766_v46, 0.0  ;;  %v3355_v36 = vpop.f32.mrf.mxu1 }
 0x315   : > { %v4289_v14 = vpop.f32.mrf.mxu3  ;;  %v4687_v38 = vpop.f32.mrf.mxu0  ;;  %v3395_v26 = vadd.f32 %v3355_v36, %v6950_v4 }
 0x316   : > { %v4830_v2 = vpack.c.bf16 %v4798_v48, %v4798_v48  ;;  %v4333_v37 = vadd.f32 %v4289_v14, %v3679_v11 }
 0x318   : > { %4863 = vst.msk [vmem:[%s7056_s23 + $0x5c] sm:$0xf] %vm4839_vm1, %v4830_v2  ;;  %v4731_v63 = vadd.f32 %v4687_v38, %v4333_v37  ;;  %v3640_v19 = vpop.f32.mrf.mxu2 }
 0x319   : > { %v3681_v58 = vadd.f32 %v3640_v19, %v3394_v13 }
 0x31a   : > { %v4767_v32 = vadd.f32 %v7317_v8, %v4731_v63 }
 0x31c   : > { %v4799_v9 = vmax.f32 %v4767_v32, 0.0  ;;  %v3358_v10 = vpop.f32.mrf.mxu1 }
 0x31d   : > { %v4291_v52 = vpop.f32.mrf.mxu3  ;;  %v4689_v51 = vpop.f32.mrf.mxu0  ;;  %v3396_v7 = vadd.f32 %v3358_v10, %v6955_v41 }
 0x31e   : > { %v4831_v33 = vpack.c.bf16 %v4799_v9, %v4799_v9  ;;  %v4334_v42 = vadd.f32 %v4291_v52, %v3680_v34 }
 0x320   : > { %4864 = vst.msk [vmem:[%s7056_s23 + $0x60] sm:$0xf] %vm4839_vm1, %v4831_v33  ;;  %v4732_v55 = vadd.f32 %v4689_v51, %v4334_v42  ;;  %v3642_v25 = vpop.f32.mrf.mxu2 }
 0x321   : > { %v3682_v22 = vadd.f32 %v3642_v25, %v3395_v26 }
 0x322   : > { %v4768_v3 = vadd.f32 %v7317_v8, %v4732_v55 }
 0x324   : > { %v4800_v62 = vmax.f32 %v4768_v3, 0.0  ;;  %v3360_v17 = vpop.f32.mrf.mxu1 }
 0x325   : > { %v4294_v28 = vpop.f32.mrf.mxu3  ;;  %v4692_v30 = vpop.f32.mrf.mxu0  ;;  %v3397_v50 = vadd.f32 %v3360_v17, %v6983_v1 }
 0x326   : > { %v4832_v35 = vpack.c.bf16 %v4800_v62, %v4800_v62  ;;  %v4335_v24 = vadd.f32 %v4294_v28, %v3681_v58 }
 0x328   : > { %4865 = vst.msk [vmem:[%s7056_s23 + $0x64] sm:$0xf] %vm4839_vm1, %v4832_v35  ;;  %v4733_v18 = vadd.f32 %v4692_v30, %v4335_v24  ;;  %v3645_v31 = vpop.f32.mrf.mxu2 }
 0x329   : > { %v3683_v0 = vadd.f32 %v3645_v31, %v3396_v7 }
 0x32a   : > { %v4769_v53 = vadd.f32 %v7317_v8, %v4733_v18 }
 0x32c   : > { %v4801_v57 = vmax.f32 %v4769_v53, 0.0  ;;  %v3363_v41 = vpop.f32.mrf.mxu1 }
 0x32d   : > { %v4296_v27 = vpop.f32.mrf.mxu3  ;;  %v4694_v12 = vpop.f32.mrf.mxu0  ;;  %v3398_v48 = vadd.f32 %v3363_v41, %v6990_v15 }
 0x32e   : > { %v4833_v47 = vpack.c.bf16 %v4801_v57, %v4801_v57  ;;  %v4336_v29 = vadd.f32 %v4296_v27, %v3682_v22 }
 0x330   : > { %4866 = vst.msk [vmem:[%s7056_s23 + $0x68] sm:$0xf] %vm4839_vm1, %v4833_v47  ;;  %v4734_v59 = vadd.f32 %v4694_v12, %v4336_v29  ;;  %v3647_v4 = vpop.f32.mrf.mxu2 }
 0x331   : > { %v3684_v5 = vadd.f32 %v3647_v4, %v3397_v50 }
 0x332   : > { %v4770_v56 = vadd.f32 %v7317_v8, %v4734_v59 }
 0x334   : > { %v4802_v6 = vmax.f32 %v4770_v56, 0.0  ;;  %v3365_v37 = vpop.f32.mrf.mxu1 }
 0x335   : > { %v4299_v39 = vpop.f32.mrf.mxu3  ;;  %v4697_v23 = vpop.f32.mrf.mxu0  ;;  %v3399_v9 = vadd.f32 %v3365_v37, %v7021_v49 }
 0x336   : > { %v4834_v21 = vpack.c.bf16 %v4802_v6, %v4802_v6  ;;  %v4337_v44 = vadd.f32 %v4299_v39, %v3683_v0 }
 0x338   : > { %4867 = vst.msk [vmem:[%s7056_s23 + $0x6c] sm:$0xf] %vm4839_vm1, %v4834_v21  ;;  %v4735_v43 = vadd.f32 %v4697_v23, %v4337_v44  ;;  %v3650_v60 = vpop.f32.mrf.mxu2 }
 0x339   : > { %v3685_v1 = vadd.f32 %v3650_v60, %v3398_v48 }
 0x33a   : > { %v4771_v40 = vadd.f32 %v7317_v8, %v4735_v43 }
 0x33c   : > { %v4803_v16 = vmax.f32 %v4771_v40, 0.0 }
 0x33d   : > { %v4301_v61 = vpop.f32.mrf.mxu3  ;;  %v4699_v46 = vpop.f32.mrf.mxu0 }
 0x33e   : > { %v4835_v54 = vpack.c.bf16 %v4803_v16, %v4803_v16  ;;  %v4338_v11 = vadd.f32 %v4301_v61, %v3684_v5 }
 0x340   : > { %4868 = vst.msk [vmem:[%s7056_s23 + $0x70] sm:$0xf] %vm4839_vm1, %v4835_v54  ;;  %v4736_v20 = vadd.f32 %v4699_v46, %v4338_v11  ;;  %v3652_v32 = vpop.f32.mrf.mxu2 }
 0x341   : > { %v3686_v52 = vadd.f32 %v3652_v32, %v3399_v9 }
 0x342   : > { %v4772_v14 = vadd.f32 %v7317_v8, %v4736_v20 }
 0x344   : > { %v4804_v2 = vmax.f32 %v4772_v14, 0.0 }
 0x345   : > { %v4304_v38 = vpop.f32.mrf.mxu3  ;;  %v4702_v45 = vpop.f32.mrf.mxu0 }
 0x346   : > { %v4836_v63 = vpack.c.bf16 %v4804_v2, %v4804_v2  ;;  %v4339_v19 = vadd.f32 %v4304_v38, %v3685_v1 }
 0x348   : > { %4869 = vst.msk [vmem:[%s7056_s23 + $0x74] sm:$0xf] %vm4839_vm1, %v4836_v63  ;;  %v4737_v34 = vadd.f32 %v4702_v45, %v4339_v19 }
 0x34a   : > { %v4773_v15 = vadd.f32 %v7317_v8, %v4737_v34 }
 0x34c   : > { %v4805_v36 = vmax.f32 %v4773_v15, 0.0 }
 0x34d   : > { %v4306_v33 = vpop.f32.mrf.mxu3  ;;  %v4704_v55 = vpop.f32.mrf.mxu0 }
 0x34e   : > { %v4837_v51 = vpack.c.bf16 %v4805_v36, %v4805_v36  ;;  %v4340_v42 = vadd.f32 %v4306_v33, %v3686_v52 }
 0x350   : > { %4870 = vst.msk [vmem:[%s7056_s23 + $0x78] sm:$0xf] %vm4839_vm1, %v4837_v51  ;;  %v4738_v13 = vadd.f32 %v4704_v55, %v4340_v42 }
 0x352   : > { %v4774_v49 = vadd.f32 %v7317_v8, %v4738_v13 }
 0x354   : > { %v4806_v25 = vmax.f32 %v4774_v49, 0.0 }
 0x356   : > { %v4838_v3 = vpack.c.bf16 %v4806_v25, %v4806_v25 }
 0x358   : > { %4871 = vst.msk [vmem:[%s7056_s23 + $0x7c] sm:$0xf] %vm4839_vm1, %v4838_v3 }
 0x359   : > { %5617 = shalt.err (!%p5614_p3)
}
 0x35a   : > { %s5656_s20 = smov 64   ;;  %s5657_s23 = smov 4  }
 0x35b   : > { %5486 = dma.vmem_to_hbm [thread:$0]  (%p5721_p5), %s4886_s8, 2048, %s4888_s9, %s4873_s19, %s5656_s20, %s5656_s20, %s5657_s23  }
 0x35c PF: > { %p5492_p4 = scmp.ge.s32.totalorder %s5652_s18, 2  ;;  %s4902_s27 = sand.u32 1, %s5640_s15  }
 0x35d   : > { %s4903_s28 = scalar_lea.sflag [#allocation4], %s4902_s27 }
 0x35e   : > { %p5489_p7 = pnand %p5492_p4, %p5725_p6 }
 0x360   : > { %p5490_p8 = pneg %p5489_p7 }
 0x362   : > { %5635 = dma.done.wait (%p5490_p8), %s4903_s28, 2048  }
 0x363   : > { %5637 = vsyncadd (%p5490_p8), %s4903_s28, 4294965248  ;;  %p14_p9 = scmp.ge.s32.totalorder %s5708_s21, 4   ;;  %s7432_s15 = smov %s5644_s16 }
 0x364   : > { %s7433_s16 = smov %s5648_s17  ;;  %s7434_s17 = smov %s5719_s24 }
 0x365   : > { %s7435_s18 = smov %s5708_s21  ;;  %16 = sbr.rel (!%p14_p9) target bundleno = 3 (0x3), region = 81 }
 0x36a   :  { %4909 = vsyncpa [#allocation4], 1 }
 0x36b   :  { %4911 = vsyncpa [#allocation4 + $0x1], 1 }

</bundles_post_ra>
